<compile_context>
chip_gen: v5e
topology: v5e:2x2
jax: 0.10.0
libtpu: 0.0.40
codegen_flags: <defaults>
</compile_context>

<pallas_src>
import functools

import jax
import jax.numpy as jnp
from jax.experimental import pallas as pl
from jax.experimental.pallas import tpu as pltpu


_EPS = 1e-5            # InstanceNorm2d default eps
_SLOPE = 0.2           # LeakyReLU negative slope
_VMEM_LIMIT = 48 * 1024 * 1024   # fits v5e/v6e and v7x (64 MiB physical)
_DEF_MAX_TP = 512      # spatial (lane) tile; multiple of 256 feeds v6e/v7x MXU
_DEF_MAX_TK = 2048     # contraction tile (multiple of 128)


def _pick_tile(dim, multiple, max_tile):
    """Largest tile <= max_tile that is a multiple of `multiple` and evenly
    divides `dim`; falls back to the full dimension (allowed by BlockSpec)."""
    if dim % multiple == 0 and dim > max_tile:
        t = (max_tile // multiple) * multiple
        while t >= multiple:
            if dim % t == 0:
                return t
            t -= multiple
    return dim


# ---------------------------------------------------------------------------
# Kernels
# ---------------------------------------------------------------------------
def _conv_kernel(p_ref, w_ref, b_ref, y_ref, *rest, emit_stats, do_act):
    """One grid step of the conv matmul.

    grid = (batch, P tiles, K tiles); K innermost (reduction into acc scratch).
    Layout: acc(Cout, tp) += W(Cout, tk) @ X(tk, tp)  -> lane-dense along P.
    If emit_stats, per-channel sum / sum-of-squares of the biased conv output
    are accumulated across P tiles and written at the final (p, k) step.
    """
    if emit_stats:
        stat_ref, acc_ref, s_acc, ss_acc = rest
    else:
        (acc_ref,) = rest

    pi = pl.program_id(1)
    ki = pl.program_id(2)
    last_p = pi == pl.num_programs(1) - 1
    last_k = ki == pl.num_programs(2) - 1

    @pl.when(ki == 0)
    def _():
        acc_ref[...] = jnp.zeros_like(acc_ref)

    if emit_stats:
        @pl.when(jnp.logical_and(pi == 0, ki == 0))
        def _():
            s_acc[...] = jnp.zeros_like(s_acc)
            ss_acc[...] = jnp.zeros_like(ss_acc)

    # bf16 x bf16 -> f32 accumulation on the MXU.
    acc_ref[...] += jnp.dot(w_ref[...], p_ref[0],
                            preferred_element_type=jnp.float32)

    @pl.when(last_k)
    def _():
        y = acc_ref[...] + b_ref[...]                      # (Cout, tp), f32
        if emit_stats:
            # f32 sum / sumsq for the two-pass InstanceNorm (stats in f32).
            s_acc[...] += jnp.sum(y, axis=1, keepdims=True)
            ss_acc[...] += jnp.sum(y * y, axis=1, keepdims=True)
        if do_act:
            y = jnp.where(y > 0, y, _SLOPE * y)            # LeakyReLU(0.2)
        y_ref[0] = y.astype(y_ref.dtype)

    if emit_stats:
        @pl.when(jnp.logical_and(last_p, last_k))
        def _():
            stat_ref[0, :, 0:1] = s_acc[...]
            stat_ref[0, :, 1:2] = ss_acc[...]


def _in_lrelu_kernel(stat_ref, y_ref, o_ref, *, inv_p):
    """Pass 2: InstanceNorm2d(affine=False) + LeakyReLU(0.2) on a (Cout, tp)
    tile using the per-sample/per-channel stats from pass 1 (all in f32)."""
    s = stat_ref[0, :, 0:1]                                # (Cout, 1)
    ss = stat_ref[0, :, 1:2]
    mean = s * inv_p
    var = jnp.maximum(ss * inv_p - mean * mean, 0.0)       # biased variance
    y = (y_ref[0] - mean) * jax.lax.rsqrt(var + _EPS)
    o_ref[0] = jnp.where(y > 0, y, _SLOPE * y).astype(o_ref.dtype)


def _conv_pool_kernel(p_ref, w_ref, b_ref, o_ref, acc_ref, sum_acc, *, inv_p):
    """Final conv (Cout=1, no norm / act) with the global average pool fused:
    the (1, tp) result is reduced on-chip and only (1, 1) per sample is
    written to HBM."""
    pi = pl.program_id(1)
    ki = pl.program_id(2)
    last_p = pi == pl.num_programs(1) - 1
    last_k = ki == pl.num_programs(2) - 1

    @pl.when(ki == 0)
    def _():
        acc_ref[...] = jnp.zeros_like(acc_ref)

    @pl.when(jnp.logical_and(pi == 0, ki == 0))
    def _():
        sum_acc[...] = jnp.zeros_like(sum_acc)

    acc_ref[...] += jnp.dot(w_ref[...], p_ref[0],
                            preferred_element_type=jnp.float32)

    @pl.when(last_k)
    def _():
        y = acc_ref[...] + b_ref[...]                      # (1, tp)
        sum_acc[...] += jnp.sum(y, axis=1, keepdims=True)  # (1, 1)

    @pl.when(jnp.logical_and(last_p, last_k))
    def _():
        o_ref[0] = (sum_acc[...] * inv_p).astype(o_ref.dtype)


# ---------------------------------------------------------------------------
# Glue: transposed im2col (NCHW -> (N, K, P)) in PyTorch (Cin, KH, KW) order
# ---------------------------------------------------------------------------
def _im2col_t(x, kh, kw, stride, pad):
    # TODO(synk): replace the materialized im2col with an implicit-GEMM kernel
    # (DMA an activation tile once and accumulate the 16 shifted taps) to cut
    # activation HBM traffic ~16x.
    x = jnp.pad(x, ((0, 0), (0, 0), (pad, pad), (pad, pad)))
    n, c, h, w = x.shape
    oh = (h - kh) // stride + 1
    ow = (w - kw) // stride + 1
    taps = []
    for i in range(kh):
        for j in range(kw):
            taps.append(x[:, :, i:i + stride * oh:stride,
                          j:j + stride * ow:stride])       # (N, C, OH, OW)
    cols = jnp.stack(taps, axis=2)                         # (N, C, KH*KW, OH, OW)
    return cols.reshape(n, c * kh * kw, oh * ow), oh, ow


def _conv_layer(x, w, b, *, stride, pad, norm, act, pool,
                matmul_dtype, max_tp, max_tk):
    n = x.shape[0]
    cout, _, kh, kw = w.shape
    patches, oh, ow = _im2col_t(x, kh, kw, stride, pad)    # (N, K, P)
    k_dim, p_dim = patches.shape[1], patches.shape[2]

    patches = patches.astype(matmul_dtype)
    wf = w.reshape(cout, k_dim).astype(matmul_dtype)
    bf = b.reshape(cout, 1).astype(jnp.float32)

    tp = _pick_tile(p_dim, 128, max_tp)
    tk = _pick_tile(k_dim, 128, max_tk)
    grid = (n, p_dim // tp, k_dim // tk)

    in_specs = [
        pl.BlockSpec((1, tk, tp), lambda i, j, l: (i, l, j)),   # patches
        pl.BlockSpec((cout, tk), lambda i, j, l: (0, l)),       # weights
        pl.BlockSpec((cout, 1), lambda i, j, l: (0, 0)),        # bias
    ]
    itemsize = jnp.dtype(matmul_dtype).itemsize
    cost = pl.CostEstimate(
        flops=int(2 * n * p_dim * k_dim * cout),
        transcendentals=0,
        bytes_accessed=int(patches.size * itemsize + wf.size * itemsize
                           + n * cout * p_dim * 4),
    )

    if pool:
        # conv5 (Cout == 1): fused global average pool, output (N, 1).
        out = pl.pallas_call(
            functools.partial(_conv_pool_kernel, inv_p=1.0 / p_dim),
            out_shape=jax.ShapeDtypeStruct((n, 1, 1), jnp.float32),
            grid=grid,
            in_specs=in_specs,
            out_specs=pl.BlockSpec((1, 1, 1), lambda i, j, l: (i, 0, 0)),
            scratch_shapes=[pltpu.VMEM((cout, tp), jnp.float32),
                            pltpu.VMEM((1, 1), jnp.float32)],
            compiler_params=pltpu.CompilerParams(
                dimension_semantics=("parallel", "arbitrary", "arbitrary"),
                vmem_limit_bytes=_VMEM_LIMIT),
            cost_estimate=cost,
        )(patches, wf, bf)
        return out.reshape(n, 1)

    if norm:
        # Pass 1: conv matmul -> raw output + per-channel sum / sumsq stats.
        y, stats = pl.pallas_call(
            functools.partial(_conv_kernel, emit_stats=True, do_act=False),
            out_shape=(jax.ShapeDtypeStruct((n, cout, p_dim), jnp.float32),
                       jax.ShapeDtypeStruct((n, cout, 2), jnp.float32)),
            grid=grid,
            in_specs=in_specs,
            out_specs=(pl.BlockSpec((1, cout, tp), lambda i, j, l: (i, 0, j)),
                       pl.BlockSpec((1, cout, 2), lambda i, j, l: (i, 0, 0))),
            scratch_shapes=[pltpu.VMEM((cout, tp), jnp.float32),
                            pltpu.VMEM((cout, 1), jnp.float32),
                            pltpu.VMEM((cout, 1), jnp.float32)],
            compiler_params=pltpu.CompilerParams(
                # Stats accumulate across P tiles -> P must stay sequential.
                dimension_semantics=("parallel", "arbitrary", "arbitrary"),
                vmem_limit_bytes=_VMEM_LIMIT),
            cost_estimate=cost,
        )(patches, wf, bf)

        # Pass 2: InstanceNorm + LeakyReLU; output aliased onto `y`.
        y = pl.pallas_call(
            functools.partial(_in_lrelu_kernel, inv_p=1.0 / p_dim),
            out_shape=jax.ShapeDtypeStruct((n, cout, p_dim), jnp.float32),
            grid=(n, p_dim // tp),
            in_specs=[pl.BlockSpec((1, cout, 2), lambda i, j: (i, 0, 0)),
                      pl.BlockSpec((1, cout, tp), lambda i, j: (i, 0, j))],
            out_specs=pl.BlockSpec((1, cout, tp), lambda i, j: (i, 0, j)),
            input_output_aliases={1: 0},
            compiler_params=pltpu.CompilerParams(
                dimension_semantics=("parallel", "parallel"),
                vmem_limit_bytes=_VMEM_LIMIT),
        )(stats, y)
    else:
        # conv1: no norm, LeakyReLU fused into the conv kernel.
        y = pl.pallas_call(
            functools.partial(_conv_kernel, emit_stats=False, do_act=act),
            out_shape=jax.ShapeDtypeStruct((n, cout, p_dim), jnp.float32),
            grid=grid,
            in_specs=in_specs,
            out_specs=pl.BlockSpec((1, cout, tp), lambda i, j, l: (i, 0, j)),
            scratch_shapes=[pltpu.VMEM((cout, tp), jnp.float32)],
            compiler_params=pltpu.CompilerParams(
                dimension_semantics=("parallel", "parallel", "arbitrary"),
                vmem_limit_bytes=_VMEM_LIMIT),
            cost_estimate=cost,
        )(patches, wf, bf)

    return y.reshape(n, cout, oh, ow)                      # NCHW, no transpose


# ---------------------------------------------------------------------------
# Discriminator forward
# ---------------------------------------------------------------------------
_LAYER_CFGS = (
    dict(stride=2, pad=1, norm=False, act=True,  pool=False),  # conv1 + LReLU
    dict(stride=2, pad=1, norm=True,  act=True,  pool=False),  # conv2 + IN + LReLU
    dict(stride=2, pad=1, norm=True,  act=True,  pool=False),  # conv3 + IN + LReLU
    dict(stride=1, pad=1, norm=True,  act=True,  pool=False),  # conv4 + IN + LReLU
    dict(stride=1, pad=1, norm=False, act=False, pool=True),   # conv5 + global avg pool
)


def init_params(key, in_channels=3, n_feats=8):
    specs = []
    c, f = in_channels, n_feats
    specs.append((f, c))                  # conv1
    for _ in range(2):
        specs.append((f * 2, f)); f *= 2  # conv2 / conv3
    specs.append((f * 2, f)); f *= 2      # conv4
    specs.append((1, f))                  # conv5
    params = []
    for i, (cout, cin) in enumerate(specs):
        kw_key, kb_key = jax.random.split(jax.random.fold_in(key, i))
        w = jax.random.normal(kw_key, (cout, cin, 4, 4), jnp.float32) * 0.05
        b = jax.random.normal(kb_key, (cout,), jnp.float32) * 0.01
        params.append((w, b))
    return params


@functools.partial(jax.jit, static_argnames=("matmul_dtype", "max_tp", "max_tk"))
def discriminator_forward(x, params, matmul_dtype=jnp.bfloat16,
                          max_tp=_DEF_MAX_TP, max_tk=_DEF_MAX_TK):
    for (w, b), cfg in zip(params, _LAYER_CFGS):
        x = _conv_layer(x, w, b, matmul_dtype=matmul_dtype,
                        max_tp=max_tp, max_tk=max_tk, **cfg)
    return x                                               # (N, 1)


def _reference_forward(x, params):
    """Pure-JAX f32 reference matching the PyTorch module."""
    for (w, b), cfg in zip(params, _LAYER_CFGS):
        y = jax.lax.conv_general_dilated(
            x, w, window_strides=(cfg["stride"], cfg["stride"]),
            padding=[(cfg["pad"], cfg["pad"])] * 2,
            dimension_numbers=("NCHW", "OIHW", "NCHW"),
            precision=jax.lax.Precision.HIGHEST)
        y = y + b.reshape(1, -1, 1, 1)
        if cfg["norm"]:
            mean = jnp.mean(y, axis=(2, 3), keepdims=True)
            var = jnp.var(y, axis=(2, 3), keepdims=True)
            y = (y - mean) * jax.lax.rsqrt(var + _EPS)
        if cfg["act"]:
            y = jnp.where(y > 0, y, _SLOPE * y)
        x = y
    return jnp.mean(x, axis=(2, 3))                        # (N, 1)


if __name__ == "__main__":
    key = jax.random.PRNGKey(0)
    # Small shapes: batch=2, in_channels=3, n_feats=8, spatial=64x64
    # (spatial >= 24 keeps the two stride-1 4x4 convs valid; 64 also exercises
    # the tiled P / K accumulation paths with forced small tiles below).
    x = jax.random.normal(jax.random.fold_in(key, 1234), (2, 3, 64, 64),
                          jnp.float32)
    params = init_params(key, in_channels=3, n_feats=8)

    ref = jax.block_until_ready(_reference_forward(x, params))

    # Correctness run: f32 matmul path with small tiles so the multi-tile
    # P (two-pass norm stats) and K (accumulator) code paths are exercised.
    out_f32 = jax.block_until_ready(
        discriminator_forward(x, params, matmul_dtype=jnp.float32,
                              max_tp=128, max_tk=128))
    assert out_f32.shape == (2, 1), out_f32.shape
    err_f32 = float(jnp.max(jnp.abs(out_f32 - ref)))
    assert err_f32 < 1e-1, f"f32 path mismatch vs reference: {err_f32}"

    # Performance config: bf16 matmul inputs, production tile sizes.
    out = jax.block_until_ready(discriminator_forward(x, params))
    assert out.shape == (2, 1), out.shape
    assert bool(jnp.all(jnp.isfinite(out)))
    err_bf16 = float(jnp.max(jnp.abs(out - ref)))
    assert err_bf16 < 5e-1, f"bf16 path diverged from reference: {err_bf16}"

    print("KERNEL_OK")
</pallas_src>

<mosaic_0001>
module attributes {stable_mosaic.version = 11 : i64} {
  func.func @_conv_kernel(%arg0: i32, %arg1: i32, %arg2: i32, %arg3: memref<1x48x128xf32, #tpu.memory_space<vmem>>, %arg4: memref<8x48xf32, #tpu.memory_space<vmem>>, %arg5: memref<8x1xf32, #tpu.memory_space<vmem>>, %arg6: memref<1x8x128xf32, #tpu.memory_space<vmem>>, %arg7: memref<8x128xf32, #tpu.memory_space<vmem>>) attributes {dimension_semantics = [#tpu.dimension_semantics<parallel>, #tpu.dimension_semantics<parallel>, #tpu.dimension_semantics<arbitrary>], iteration_bounds = array<i64: 2, 8, 1>, scalar_prefetch = 0 : i64, scratch_operands = 1 : i64, tpu.core_type = #tpu.core_type<tc>, window_params = [{transform_indices = @transform_0, window_bounds = array<i64: 1, 48, 128>}, {transform_indices = @transform_1, window_bounds = array<i64: 8, 48>}, {pipeline_mode = #tpu.pipeline_mode<synchronous>, transform_indices = @transform_2, window_bounds = array<i64: 8, 1>}, {transform_indices = @transform_3, window_bounds = array<i64: 1, 8, 128>}]} {
    %c0_i32 = arith.constant 0 : i32
    %0 = arith.cmpi eq, %arg2, %c0_i32 : i32
    %c0_i32_0 = arith.constant 0 : i32
    %1 = arith.cmpi eq, %arg2, %c0_i32_0 : i32
    %2 = arith.extui %1 : i1 to i32
    %c0_i32_1 = arith.constant 0 : i32
    %3 = arith.cmpi ne, %2, %c0_i32_1 : i32
    scf.if %3 {
      %cst_11 = arith.constant 0.000000e+00 : f32
      %13 = vector.broadcast %cst_11 : f32 to vector<8x128xf32>
      %c0_12 = arith.constant 0 : index
      %c0_13 = arith.constant 0 : index
      %14 = vector.load %arg7[%c0_12, %c0_13] : memref<8x128xf32, #tpu.memory_space<vmem>>, vector<8x128xf32>
      tpu.vector_store %arg7[%c0_12, %c0_13], %13 {strides = array<i32>} : memref<8x128xf32, #tpu.memory_space<vmem>>, vector<8x128xf32>,
    } else {
    }
    %c0 = arith.constant 0 : index
    %c0_2 = arith.constant 0 : index
    %4 = vector.load %arg7[%c0, %c0_2] : memref<8x128xf32, #tpu.memory_space<vmem>>, vector<8x128xf32>
    %c0_3 = arith.constant 0 : index
    %c0_4 = arith.constant 0 : index
    %5 = vector.load %arg4[%c0_3, %c0_4] : memref<8x48xf32, #tpu.memory_space<vmem>>, vector<8x48xf32>
    %c0_5 = arith.constant 0 : index
    %c0_6 = arith.constant 0 : index
    %c0_7 = arith.constant 0 : index
    %6 = vector.load %arg3[%c0_5, %c0_6, %c0_7] : memref<1x48x128xf32, #tpu.memory_space<vmem>>, vector<1x48x128xf32>
    %7 = vector.shape_cast %6 : vector<1x48x128xf32> to vector<48x128xf32>
    %cst = arith.constant dense<0.000000e+00> : vector<8x128xf32>
    %8 = tpu.matmul %5, %7, %cst {dimension_numbers = #tpu.dot_dimension_numbers<[1], [0], [0], [1], [0, 0, 1, 1], [], []>} : vector<8x48xf32>, vector<48x128xf32>, vector<8x128xf32> -> vector<8x128xf32>
    %9 = arith.addf %4, %8 : vector<8x128xf32>
    %c0_8 = arith.constant 0 : index
    %c0_9 = arith.constant 0 : index
    %10 = vector.load %arg7[%c0_8, %c0_9] : memref<8x128xf32, #tpu.memory_space<vmem>>, vector<8x128xf32>
    tpu.vector_store %arg7[%c0_8, %c0_9], %9 {strides = array<i32>} : memref<8x128xf32, #tpu.memory_space<vmem>>, vector<8x128xf32>,
    %11 = arith.extui %0 : i1 to i32
    %c0_i32_10 = arith.constant 0 : i32
    %12 = arith.cmpi ne, %11, %c0_i32_10 : i32
    scf.if %12 {
      %c0_11 = arith.constant 0 : index
      %c0_12 = arith.constant 0 : index
      %13 = vector.load %arg7[%c0_11, %c0_12] : memref<8x128xf32, #tpu.memory_space<vmem>>, vector<8x128xf32>
      %c0_13 = arith.constant 0 : index
      %c0_14 = arith.constant 0 : index
      %14 = vector.load %arg5[%c0_13, %c0_14] : memref<8x1xf32, #tpu.memory_space<vmem>>, vector<8x1xf32>
      %15 = vector.broadcast %14 : vector<8x1xf32> to vector<8x128xf32>
      %16 = arith.addf %13, %15 : vector<8x128xf32>
      %cst_15 = arith.constant 0.000000e+00 : f32
      %17 = vector.broadcast %cst_15 : f32 to vector<8x128xf32>
      %18 = arith.cmpf ogt, %16, %17 : vector<8x128xf32>
      %cst_16 = arith.constant 2.000000e-01 : f32
      %19 = vector.broadcast %cst_16 : f32 to vector<8x128xf32>
      %20 = arith.mulf %19, %16 : vector<8x128xf32>
      %21 = arith.select %18, %16, %20 : vector<8x128xi1>, vector<8x128xf32>
      %c0_17 = arith.constant 0 : index
      %c0_18 = arith.constant 0 : index
      %c0_19 = arith.constant 0 : index
      %22 = vector.load %arg6[%c0_17, %c0_18, %c0_19] : memref<1x8x128xf32, #tpu.memory_space<vmem>>, vector<1x8x128xf32>
      %23 = vector.shape_cast %22 : vector<1x8x128xf32> to vector<8x128xf32>
      %24 = vector.shape_cast %21 : vector<8x128xf32> to vector<1x8x128xf32>
      tpu.vector_store %arg6[%c0_17, %c0_18, %c0_19], %24 {strides = array<i32>} : memref<1x8x128xf32, #tpu.memory_space<vmem>>, vector<1x8x128xf32>,
    } else {
    }
    return
  }
  func.func @transform_0(%arg0: i32, %arg1: i32, %arg2: i32) -> (i32, i32, i32) {
    %c0_i32 = arith.constant 0 : i32
    return %arg0, %arg2, %arg1 : i32, i32, i32
  }
  func.func @transform_1(%arg0: i32, %arg1: i32, %arg2: i32) -> (i32, i32) {
    %c0_i32 = arith.constant 0 : i32
    %c0_i32_0 = arith.constant 0 : i32
    return %c0_i32, %arg2 : i32, i32
  }
  func.func @transform_2(%arg0: i32, %arg1: i32, %arg2: i32) -> (i32, i32) {
    %c0_i32 = arith.constant 0 : i32
    %c0_i32_0 = arith.constant 0 : i32
    %c0_i32_1 = arith.constant 0 : i32
    return %c0_i32, %c0_i32_0 : i32, i32
  }
  func.func @transform_3(%arg0: i32, %arg1: i32, %arg2: i32) -> (i32, i32, i32) {
    %c0_i32 = arith.constant 0 : i32
    %c0_i32_0 = arith.constant 0 : i32
    return %arg0, %c0_i32, %arg1 : i32, i32, i32
  }
}

module attributes {stable_mosaic.version = 11 : i64} {
  func.func @_conv_kernel(%arg0: i32, %arg1: i32, %arg2: i32, %arg3: memref<1x128x128xf32, #tpu.memory_space<vmem>>, %arg4: memref<16x128xf32, #tpu.memory_space<vmem>>, %arg5: memref<16x1xf32, #tpu.memory_space<vmem>>, %arg6: memref<1x16x128xf32, #tpu.memory_space<vmem>>, %arg7: memref<1x16x2xf32, #tpu.memory_space<vmem>>, %arg8: memref<16x128xf32, #tpu.memory_space<vmem>>, %arg9: memref<16x1xf32, #tpu.memory_space<vmem>>, %arg10: memref<16x1xf32, #tpu.memory_space<vmem>>) attributes {dimension_semantics = [#tpu.dimension_semantics<parallel>, #tpu.dimension_semantics<arbitrary>, #tpu.dimension_semantics<arbitrary>], iteration_bounds = array<i64: 2, 2, 1>, scalar_prefetch = 0 : i64, scratch_operands = 3 : i64, tpu.core_type = #tpu.core_type<tc>, window_params = [{transform_indices = @transform_0, window_bounds = array<i64: 1, 128, 128>}, {transform_indices = @transform_1, window_bounds = array<i64: 16, 128>}, {pipeline_mode = #tpu.pipeline_mode<synchronous>, transform_indices = @transform_2, window_bounds = array<i64: 16, 1>}, {transform_indices = @transform_3, window_bounds = array<i64: 1, 16, 128>}, {transform_indices = @transform_4, window_bounds = array<i64: 1, 16, 2>}]} {
    %c1_i32 = arith.constant 1 : i32
    %0 = arith.cmpi eq, %arg1, %c1_i32 : i32
    %c0_i32 = arith.constant 0 : i32
    %1 = arith.cmpi eq, %arg2, %c0_i32 : i32
    %c0_i32_0 = arith.constant 0 : i32
    %2 = arith.cmpi eq, %arg2, %c0_i32_0 : i32
    %3 = arith.extui %2 : i1 to i32
    %c0_i32_1 = arith.constant 0 : i32
    %4 = arith.cmpi ne, %3, %c0_i32_1 : i32
    scf.if %4 {
      %cst_15 = arith.constant 0.000000e+00 : f32
      %22 = vector.broadcast %cst_15 : f32 to vector<16x128xf32>
      %c0_16 = arith.constant 0 : index
      %c0_17 = arith.constant 0 : index
      %23 = vector.load %arg8[%c0_16, %c0_17] : memref<16x128xf32, #tpu.memory_space<vmem>>, vector<16x128xf32>
      tpu.vector_store %arg8[%c0_16, %c0_17], %22 {strides = array<i32>} : memref<16x128xf32, #tpu.memory_space<vmem>>, vector<16x128xf32>,
    } else {
    }
    %c0_i32_2 = arith.constant 0 : i32
    %5 = arith.cmpi eq, %arg1, %c0_i32_2 : i32
    %c0_i32_3 = arith.constant 0 : i32
    %6 = arith.cmpi eq, %arg2, %c0_i32_3 : i32
    %7 = arith.andi %5, %6 : i1
    %8 = arith.extui %7 : i1 to i32
    %c0_i32_4 = arith.constant 0 : i32
    %9 = arith.cmpi ne, %8, %c0_i32_4 : i32
    scf.if %9 {
      %cst_15 = arith.constant 0.000000e+00 : f32
      %22 = vector.broadcast %cst_15 : f32 to vector<16x1xf32>
      %c0_16 = arith.constant 0 : index
      %c0_17 = arith.constant 0 : index
      %23 = vector.load %arg9[%c0_16, %c0_17] : memref<16x1xf32, #tpu.memory_space<vmem>>, vector<16x1xf32>
      tpu.vector_store %arg9[%c0_16, %c0_17], %22 {strides = array<i32>} : memref<16x1xf32, #tpu.memory_space<vmem>>, vector<16x1xf32>,
      %cst_18 = arith.constant 0.000000e+00 : f32
      %24 = vector.broadcast %cst_18 : f32 to vector<16x1xf32>
      %c0_19 = arith.constant 0 : index
      %c0_20 = arith.constant 0 : index
      %25 = vector.load %arg10[%c0_19, %c0_20] : memref<16x1xf32, #tpu.memory_space<vmem>>, vector<16x1xf32>
      tpu.vector_store %arg10[%c0_19, %c0_20], %24 {strides = array<i32>} : memref<16x1xf32, #tpu.memory_space<vmem>>, vector<16x1xf32>,
    } else {
    }
    %c0 = arith.constant 0 : index
    %c0_5 = arith.constant 0 : index
    %10 = vector.load %arg8[%c0, %c0_5] : memref<16x128xf32, #tpu.memory_space<vmem>>, vector<16x128xf32>
    %c0_6 = arith.constant 0 : index
    %c0_7 = arith.constant 0 : index
    %11 = vector.load %arg4[%c0_6, %c0_7] : memref<16x128xf32, #tpu.memory_space<vmem>>, vector<16x128xf32>
    %c0_8 = arith.constant 0 : index
    %c0_9 = arith.constant 0 : index
    %c0_10 = arith.constant 0 : index
    %12 = vector.load %arg3[%c0_8, %c0_9, %c0_10] : memref<1x128x128xf32, #tpu.memory_space<vmem>>, vector<1x128x128xf32>
    %13 = vector.shape_cast %12 : vector<1x128x128xf32> to vector<128x128xf32>
    %cst = arith.constant dense<0.000000e+00> : vector<16x128xf32>
    %14 = tpu.matmul %11, %13, %cst {dimension_numbers = #tpu.dot_dimension_numbers<[1], [0], [0], [1], [0, 0, 1, 1], [], []>} : vector<16x128xf32>, vector<128x128xf32>, vector<16x128xf32> -> vector<16x128xf32>
    %15 = arith.addf %10, %14 : vector<16x128xf32>
    %c0_11 = arith.constant 0 : index
    %c0_12 = arith.constant 0 : index
    %16 = vector.load %arg8[%c0_11, %c0_12] : memref<16x128xf32, #tpu.memory_space<vmem>>, vector<16x128xf32>
    tpu.vector_store %arg8[%c0_11, %c0_12], %15 {strides = array<i32>} : memref<16x128xf32, #tpu.memory_space<vmem>>, vector<16x128xf32>,
    %17 = arith.extui %1 : i1 to i32
    %c0_i32_13 = arith.constant 0 : i32
    %18 = arith.cmpi ne, %17, %c0_i32_13 : i32
    scf.if %18 {
      %c0_15 = arith.constant 0 : index
      %c0_16 = arith.constant 0 : index
      %22 = vector.load %arg8[%c0_15, %c0_16] : memref<16x128xf32, #tpu.memory_space<vmem>>, vector<16x128xf32>
      %c0_17 = arith.constant 0 : index
      %c0_18 = arith.constant 0 : index
      %23 = vector.load %arg5[%c0_17, %c0_18] : memref<16x1xf32, #tpu.memory_space<vmem>>, vector<16x1xf32>
      %24 = vector.broadcast %23 : vector<16x1xf32> to vector<16x128xf32>
      %25 = arith.addf %22, %24 : vector<16x128xf32>
      %c0_19 = arith.constant 0 : index
      %c0_20 = arith.constant 0 : index
      %26 = vector.load %arg9[%c0_19, %c0_20] : memref<16x1xf32, #tpu.memory_space<vmem>>, vector<16x1xf32>
      %cst_21 = arith.constant dense<0.000000e+00> : vector<16xf32>
      %27 = vector.multi_reduction <add>, %25, %cst_21 [1] : vector<16x128xf32> to vector<16xf32>
      %28 = vector.shape_cast %27 : vector<16xf32> to vector<16x1xf32>
      %29 = arith.addf %26, %28 : vector<16x1xf32>
      %c0_22 = arith.constant 0 : index
      %c0_23 = arith.constant 0 : index
      %30 = vector.load %arg9[%c0_22, %c0_23] : memref<16x1xf32, #tpu.memory_space<vmem>>, vector<16x1xf32>
      tpu.vector_store %arg9[%c0_22, %c0_23], %29 {strides = array<i32>} : memref<16x1xf32, #tpu.memory_space<vmem>>, vector<16x1xf32>,
      %c0_24 = arith.constant 0 : index
      %c0_25 = arith.constant 0 : index
      %31 = vector.load %arg10[%c0_24, %c0_25] : memref<16x1xf32, #tpu.memory_space<vmem>>, vector<16x1xf32>
      %32 = arith.mulf %25, %25 : vector<16x128xf32>
      %cst_26 = arith.constant dense<0.000000e+00> : vector<16xf32>
      %33 = vector.multi_reduction <add>, %32, %cst_26 [1] : vector<16x128xf32> to vector<16xf32>
      %34 = vector.shape_cast %33 : vector<16xf32> to vector<16x1xf32>
      %35 = arith.addf %31, %34 : vector<16x1xf32>
      %c0_27 = arith.constant 0 : index
      %c0_28 = arith.constant 0 : index
      %36 = vector.load %arg10[%c0_27, %c0_28] : memref<16x1xf32, #tpu.memory_space<vmem>>, vector<16x1xf32>
      tpu.vector_store %arg10[%c0_27, %c0_28], %35 {strides = array<i32>} : memref<16x1xf32, #tpu.memory_space<vmem>>, vector<16x1xf32>,
      %c0_29 = arith.constant 0 : index
      %c0_30 = arith.constant 0 : index
      %c0_31 = arith.constant 0 : index
      %37 = vector.load %arg6[%c0_29, %c0_30, %c0_31] : memref<1x16x128xf32, #tpu.memory_space<vmem>>, vector<1x16x128xf32>
      %38 = vector.shape_cast %37 : vector<1x16x128xf32> to vector<16x128xf32>
      %39 = vector.shape_cast %25 : vector<16x128xf32> to vector<1x16x128xf32>
      tpu.vector_store %arg6[%c0_29, %c0_30, %c0_31], %39 {strides = array<i32>} : memref<1x16x128xf32, #tpu.memory_space<vmem>>, vector<1x16x128xf32>,
    } else {
    }
    %19 = arith.andi %0, %1 : i1
    %20 = arith.extui %19 : i1 to i32
    %c0_i32_14 = arith.constant 0 : i32
    %21 = arith.cmpi ne, %20, %c0_i32_14 : i32
    scf.if %21 {
      %c0_15 = arith.constant 0 : index
      %c0_16 = arith.constant 0 : index
      %22 = vector.load %arg9[%c0_15, %c0_16] : memref<16x1xf32, #tpu.memory_space<vmem>>, vector<16x1xf32>
      %c0_17 = arith.constant 0 : index
      %c0_18 = arith.constant 0 : index
      %c0_19 = arith.constant 0 : index
      %23 = vector.load %arg7[%c0_17, %c0_18, %c0_19] : memref<1x16x2xf32, #tpu.memory_space<vmem>>, vector<1x16x1xf32>
      %24 = vector.shape_cast %23 : vector<1x16x1xf32> to vector<16x1xf32>
      %25 = vector.shape_cast %22 : vector<16x1xf32> to vector<1x16x1xf32>
      tpu.vector_store %arg7[%c0_17, %c0_18, %c0_19], %25 {strides = array<i32>} : memref<1x16x2xf32, #tpu.memory_space<vmem>>, vector<1x16x1xf32>,
      %c0_20 = arith.constant 0 : index
      %c0_21 = arith.constant 0 : index
      %26 = vector.load %arg10[%c0_20, %c0_21] : memref<16x1xf32, #tpu.memory_space<vmem>>, vector<16x1xf32>
      %c0_22 = arith.constant 0 : index
      %c0_23 = arith.constant 0 : index
      %c1 = arith.constant 1 : index
      %27 = vector.load %arg7[%c0_22, %c0_23, %c1] : memref<1x16x2xf32, #tpu.memory_space<vmem>>, vector<1x16x1xf32>
      %28 = vector.shape_cast %27 : vector<1x16x1xf32> to vector<16x1xf32>
      %29 = vector.shape_cast %26 : vector<16x1xf32> to vector<1x16x1xf32>
      tpu.vector_store %arg7[%c0_22, %c0_23, %c1], %29 {strides = array<i32>} : memref<1x16x2xf32, #tpu.memory_space<vmem>>, vector<1x16x1xf32>,
    } else {
    }
    return
  }
  func.func @transform_0(%arg0: i32, %arg1: i32, %arg2: i32) -> (i32, i32, i32) {
    %c0_i32 = arith.constant 0 : i32
    return %arg0, %arg2, %arg1 : i32, i32, i32
  }
  func.func @transform_1(%arg0: i32, %arg1: i32, %arg2: i32) -> (i32, i32) {
    %c0_i32 = arith.constant 0 : i32
    %c0_i32_0 = arith.constant 0 : i32
    return %c0_i32, %arg2 : i32, i32
  }
  func.func @transform_2(%arg0: i32, %arg1: i32, %arg2: i32) -> (i32, i32) {
    %c0_i32 = arith.constant 0 : i32
    %c0_i32_0 = arith.constant 0 : i32
    %c0_i32_1 = arith.constant 0 : i32
    return %c0_i32, %c0_i32_0 : i32, i32
  }
  func.func @transform_3(%arg0: i32, %arg1: i32, %arg2: i32) -> (i32, i32, i32) {
    %c0_i32 = arith.constant 0 : i32
    %c0_i32_0 = arith.constant 0 : i32
    return %arg0, %c0_i32, %arg1 : i32, i32, i32
  }
  func.func @transform_4(%arg0: i32, %arg1: i32, %arg2: i32) -> (i32, i32, i32) {
    %c0_i32 = arith.constant 0 : i32
    %c0_i32_0 = arith.constant 0 : i32
    %c0_i32_1 = arith.constant 0 : i32
    return %arg0, %c0_i32, %c0_i32_0 : i32, i32, i32
  }
}

module attributes {stable_mosaic.version = 11 : i64} {
  func.func @_in_lrelu_kernel(%arg0: i32, %arg1: i32, %arg2: memref<1x16x2xf32, #tpu.memory_space<vmem>>, %arg3: memref<1x16x128xf32, #tpu.memory_space<vmem>>, %arg4: memref<1x16x128xf32, #tpu.memory_space<vmem>>) attributes {dimension_semantics = [#tpu.dimension_semantics<parallel>, #tpu.dimension_semantics<parallel>], iteration_bounds = array<i64: 2, 2>, scalar_prefetch = 0 : i64, scratch_operands = 0 : i64, tpu.core_type = #tpu.core_type<tc>, window_params = [{transform_indices = @transform_0, window_bounds = array<i64: 1, 16, 2>}, {transform_indices = @transform_1, window_bounds = array<i64: 1, 16, 128>}, {transform_indices = @transform_2, window_bounds = array<i64: 1, 16, 128>}]} {
    %c0 = arith.constant 0 : index
    %c0_0 = arith.constant 0 : index
    %c0_1 = arith.constant 0 : index
    %0 = vector.load %arg2[%c0, %c0_0, %c0_1] : memref<1x16x2xf32, #tpu.memory_space<vmem>>, vector<1x16x1xf32>
    %1 = vector.shape_cast %0 : vector<1x16x1xf32> to vector<16x1xf32>
    %c0_2 = arith.constant 0 : index
    %c0_3 = arith.constant 0 : index
    %c1 = arith.constant 1 : index
    %2 = vector.load %arg2[%c0_2, %c0_3, %c1] : memref<1x16x2xf32, #tpu.memory_space<vmem>>, vector<1x16x1xf32>
    %3 = vector.shape_cast %2 : vector<1x16x1xf32> to vector<16x1xf32>
    %cst = arith.constant 3.906250e-03 : f32
    %4 = vector.broadcast %cst : f32 to vector<16x1xf32>
    %5 = arith.mulf %1, %4 : vector<16x1xf32>
    %cst_4 = arith.constant 3.906250e-03 : f32
    %6 = vector.broadcast %cst_4 : f32 to vector<16x1xf32>
    %7 = arith.mulf %3, %6 : vector<16x1xf32>
    %8 = arith.mulf %5, %5 : vector<16x1xf32>
    %9 = arith.subf %7, %8 : vector<16x1xf32>
    %cst_5 = arith.constant 0.000000e+00 : f32
    %10 = vector.broadcast %cst_5 : f32 to vector<16x1xf32>
    %11 = arith.maximumf %9, %10 : vector<16x1xf32>
    %c0_6 = arith.constant 0 : index
    %c0_7 = arith.constant 0 : index
    %c0_8 = arith.constant 0 : index
    %12 = vector.load %arg3[%c0_6, %c0_7, %c0_8] : memref<1x16x128xf32, #tpu.memory_space<vmem>>, vector<1x16x128xf32>
    %13 = vector.shape_cast %12 : vector<1x16x128xf32> to vector<16x128xf32>
    %14 = vector.broadcast %5 : vector<16x1xf32> to vector<16x128xf32>
    %15 = arith.subf %13, %14 : vector<16x128xf32>
    %cst_9 = arith.constant 9.99999974E-6 : f32
    %16 = vector.broadcast %cst_9 : f32 to vector<16x1xf32>
    %17 = arith.addf %11, %16 : vector<16x1xf32>
    %18 = math.rsqrt %17 : vector<16x1xf32>
    %19 = vector.broadcast %18 : vector<16x1xf32> to vector<16x128xf32>
    %20 = arith.mulf %15, %19 : vector<16x128xf32>
    %cst_10 = arith.constant 0.000000e+00 : f32
    %21 = vector.broadcast %cst_10 : f32 to vector<16x128xf32>
    %22 = arith.cmpf ogt, %20, %21 : vector<16x128xf32>
    %cst_11 = arith.constant 2.000000e-01 : f32
    %23 = vector.broadcast %cst_11 : f32 to vector<16x128xf32>
    %24 = arith.mulf %23, %20 : vector<16x128xf32>
    %25 = arith.select %22, %20, %24 : vector<16x128xi1>, vector<16x128xf32>
    %c0_12 = arith.constant 0 : index
    %c0_13 = arith.constant 0 : index
    %c0_14 = arith.constant 0 : index
    %26 = vector.load %arg4[%c0_12, %c0_13, %c0_14] : memref<1x16x128xf32, #tpu.memory_space<vmem>>, vector<1x16x128xf32>
    %27 = vector.shape_cast %26 : vector<1x16x128xf32> to vector<16x128xf32>
    %28 = vector.shape_cast %25 : vector<16x128xf32> to vector<1x16x128xf32>
    tpu.vector_store %arg4[%c0_12, %c0_13, %c0_14], %28 {strides = array<i32>} : memref<1x16x128xf32, #tpu.memory_space<vmem>>, vector<1x16x128xf32>,
    return
  }
  func.func @transform_0(%arg0: i32, %arg1: i32) -> (i32, i32, i32) {
    %c0_i32 = arith.constant 0 : i32
    %c0_i32_0 = arith.constant 0 : i32
    %c0_i32_1 = arith.constant 0 : i32
    return %arg0, %c0_i32, %c0_i32_0 : i32, i32, i32
  }
  func.func @transform_1(%arg0: i32, %arg1: i32) -> (i32, i32, i32) {
    %c0_i32 = arith.constant 0 : i32
    %c0_i32_0 = arith.constant 0 : i32
    return %arg0, %c0_i32, %arg1 : i32, i32, i32
  }
  func.func @transform_2(%arg0: i32, %arg1: i32) -> (i32, i32, i32) {
    %c0_i32 = arith.constant 0 : i32
    %c0_i32_0 = arith.constant 0 : i32
    return %arg0, %c0_i32, %arg1 : i32, i32, i32
  }
}

module attributes {stable_mosaic.version = 11 : i64} {
  func.func @_conv_kernel(%arg0: i32, %arg1: i32, %arg2: i32, %arg3: memref<1x128x64xf32, #tpu.memory_space<vmem>>, %arg4: memref<32x128xf32, #tpu.memory_space<vmem>>, %arg5: memref<32x1xf32, #tpu.memory_space<vmem>>, %arg6: memref<1x32x64xf32, #tpu.memory_space<vmem>>, %arg7: memref<1x32x2xf32, #tpu.memory_space<vmem>>, %arg8: memref<32x64xf32, #tpu.memory_space<vmem>>, %arg9: memref<32x1xf32, #tpu.memory_space<vmem>>, %arg10: memref<32x1xf32, #tpu.memory_space<vmem>>) attributes {dimension_semantics = [#tpu.dimension_semantics<parallel>, #tpu.dimension_semantics<arbitrary>, #tpu.dimension_semantics<arbitrary>], iteration_bounds = array<i64: 2, 1, 2>, scalar_prefetch = 0 : i64, scratch_operands = 3 : i64, tpu.core_type = #tpu.core_type<tc>, window_params = [{transform_indices = @transform_0, window_bounds = array<i64: 1, 128, 64>}, {transform_indices = @transform_1, window_bounds = array<i64: 32, 128>}, {pipeline_mode = #tpu.pipeline_mode<synchronous>, transform_indices = @transform_2, window_bounds = array<i64: 32, 1>}, {transform_indices = @transform_3, window_bounds = array<i64: 1, 32, 64>}, {transform_indices = @transform_4, window_bounds = array<i64: 1, 32, 2>}]} {
    %c0_i32 = arith.constant 0 : i32
    %0 = arith.cmpi eq, %arg1, %c0_i32 : i32
    %c1_i32 = arith.constant 1 : i32
    %1 = arith.cmpi eq, %arg2, %c1_i32 : i32
    %c0_i32_0 = arith.constant 0 : i32
    %2 = arith.cmpi eq, %arg2, %c0_i32_0 : i32
    %3 = arith.extui %2 : i1 to i32
    %c0_i32_1 = arith.constant 0 : i32
    %4 = arith.cmpi ne, %3, %c0_i32_1 : i32
    scf.if %4 {
      %cst_15 = arith.constant 0.000000e+00 : f32
      %22 = vector.broadcast %cst_15 : f32 to vector<32x64xf32>
      %c0_16 = arith.constant 0 : index
      %c0_17 = arith.constant 0 : index
      %23 = vector.load %arg8[%c0_16, %c0_17] : memref<32x64xf32, #tpu.memory_space<vmem>>, vector<32x64xf32>
      tpu.vector_store %arg8[%c0_16, %c0_17], %22 {strides = array<i32>} : memref<32x64xf32, #tpu.memory_space<vmem>>, vector<32x64xf32>,
    } else {
    }
    %c0_i32_2 = arith.constant 0 : i32
    %5 = arith.cmpi eq, %arg1, %c0_i32_2 : i32
    %c0_i32_3 = arith.constant 0 : i32
    %6 = arith.cmpi eq, %arg2, %c0_i32_3 : i32
    %7 = arith.andi %5, %6 : i1
    %8 = arith.extui %7 : i1 to i32
    %c0_i32_4 = arith.constant 0 : i32
    %9 = arith.cmpi ne, %8, %c0_i32_4 : i32
    scf.if %9 {
      %cst_15 = arith.constant 0.000000e+00 : f32
      %22 = vector.broadcast %cst_15 : f32 to vector<32x1xf32>
      %c0_16 = arith.constant 0 : index
      %c0_17 = arith.constant 0 : index
      %23 = vector.load %arg9[%c0_16, %c0_17] : memref<32x1xf32, #tpu.memory_space<vmem>>, vector<32x1xf32>
      tpu.vector_store %arg9[%c0_16, %c0_17], %22 {strides = array<i32>} : memref<32x1xf32, #tpu.memory_space<vmem>>, vector<32x1xf32>,
      %cst_18 = arith.constant 0.000000e+00 : f32
      %24 = vector.broadcast %cst_18 : f32 to vector<32x1xf32>
      %c0_19 = arith.constant 0 : index
      %c0_20 = arith.constant 0 : index
      %25 = vector.load %arg10[%c0_19, %c0_20] : memref<32x1xf32, #tpu.memory_space<vmem>>, vector<32x1xf32>
      tpu.vector_store %arg10[%c0_19, %c0_20], %24 {strides = array<i32>} : memref<32x1xf32, #tpu.memory_space<vmem>>, vector<32x1xf32>,
    } else {
    }
    %c0 = arith.constant 0 : index
    %c0_5 = arith.constant 0 : index
    %10 = vector.load %arg8[%c0, %c0_5] : memref<32x64xf32, #tpu.memory_space<vmem>>, vector<32x64xf32>
    %c0_6 = arith.constant 0 : index
    %c0_7 = arith.constant 0 : index
    %11 = vector.load %arg4[%c0_6, %c0_7] : memref<32x128xf32, #tpu.memory_space<vmem>>, vector<32x128xf32>
    %c0_8 = arith.constant 0 : index
    %c0_9 = arith.constant 0 : index
    %c0_10 = arith.constant 0 : index
    %12 = vector.load %arg3[%c0_8, %c0_9, %c0_10] : memref<1x128x64xf32, #tpu.memory_space<vmem>>, vector<1x128x64xf32>
    %13 = vector.shape_cast %12 : vector<1x128x64xf32> to vector<128x64xf32>
    %cst = arith.constant dense<0.000000e+00> : vector<32x64xf32>
    %14 = tpu.matmul %11, %13, %cst {dimension_numbers = #tpu.dot_dimension_numbers<[1], [0], [0], [1], [0, 0, 1, 1], [], []>} : vector<32x128xf32>, vector<128x64xf32>, vector<32x64xf32> -> vector<32x64xf32>
    %15 = arith.addf %10, %14 : vector<32x64xf32>
    %c0_11 = arith.constant 0 : index
    %c0_12 = arith.constant 0 : index
    %16 = vector.load %arg8[%c0_11, %c0_12] : memref<32x64xf32, #tpu.memory_space<vmem>>, vector<32x64xf32>
    tpu.vector_store %arg8[%c0_11, %c0_12], %15 {strides = array<i32>} : memref<32x64xf32, #tpu.memory_space<vmem>>, vector<32x64xf32>,
    %17 = arith.extui %1 : i1 to i32
    %c0_i32_13 = arith.constant 0 : i32
    %18 = arith.cmpi ne, %17, %c0_i32_13 : i32
    scf.if %18 {
      %c0_15 = arith.constant 0 : index
      %c0_16 = arith.constant 0 : index
      %22 = vector.load %arg8[%c0_15, %c0_16] : memref<32x64xf32, #tpu.memory_space<vmem>>, vector<32x64xf32>
      %c0_17 = arith.constant 0 : index
      %c0_18 = arith.constant 0 : index
      %23 = vector.load %arg5[%c0_17, %c0_18] : memref<32x1xf32, #tpu.memory_space<vmem>>, vector<32x1xf32>
      %24 = vector.broadcast %23 : vector<32x1xf32> to vector<32x64xf32>
      %25 = arith.addf %22, %24 : vector<32x64xf32>
      %c0_19 = arith.constant 0 : index
      %c0_20 = arith.constant 0 : index
      %26 = vector.load %arg9[%c0_19, %c0_20] : memref<32x1xf32, #tpu.memory_space<vmem>>, vector<32x1xf32>
      %cst_21 = arith.constant dense<0.000000e+00> : vector<32xf32>
      %27 = vector.multi_reduction <add>, %25, %cst_21 [1] : vector<32x64xf32> to vector<32xf32>
      %28 = vector.shape_cast %27 : vector<32xf32> to vector<32x1xf32>
      %29 = arith.addf %26, %28 : vector<32x1xf32>
      %c0_22 = arith.constant 0 : index
      %c0_23 = arith.constant 0 : index
      %30 = vector.load %arg9[%c0_22, %c0_23] : memref<32x1xf32, #tpu.memory_space<vmem>>, vector<32x1xf32>
      tpu.vector_store %arg9[%c0_22, %c0_23], %29 {strides = array<i32>} : memref<32x1xf32, #tpu.memory_space<vmem>>, vector<32x1xf32>,
      %c0_24 = arith.constant 0 : index
      %c0_25 = arith.constant 0 : index
      %31 = vector.load %arg10[%c0_24, %c0_25] : memref<32x1xf32, #tpu.memory_space<vmem>>, vector<32x1xf32>
      %32 = arith.mulf %25, %25 : vector<32x64xf32>
      %cst_26 = arith.constant dense<0.000000e+00> : vector<32xf32>
      %33 = vector.multi_reduction <add>, %32, %cst_26 [1] : vector<32x64xf32> to vector<32xf32>
      %34 = vector.shape_cast %33 : vector<32xf32> to vector<32x1xf32>
      %35 = arith.addf %31, %34 : vector<32x1xf32>
      %c0_27 = arith.constant 0 : index
      %c0_28 = arith.constant 0 : index
      %36 = vector.load %arg10[%c0_27, %c0_28] : memref<32x1xf32, #tpu.memory_space<vmem>>, vector<32x1xf32>
      tpu.vector_store %arg10[%c0_27, %c0_28], %35 {strides = array<i32>} : memref<32x1xf32, #tpu.memory_space<vmem>>, vector<32x1xf32>,
      %c0_29 = arith.constant 0 : index
      %c0_30 = arith.constant 0 : index
      %c0_31 = arith.constant 0 : index
      %37 = vector.load %arg6[%c0_29, %c0_30, %c0_31] : memref<1x32x64xf32, #tpu.memory_space<vmem>>, vector<1x32x64xf32>
      %38 = vector.shape_cast %37 : vector<1x32x64xf32> to vector<32x64xf32>
      %39 = vector.shape_cast %25 : vector<32x64xf32> to vector<1x32x64xf32>
      tpu.vector_store %arg6[%c0_29, %c0_30, %c0_31], %39 {strides = array<i32>} : memref<1x32x64xf32, #tpu.memory_space<vmem>>, vector<1x32x64xf32>,
    } else {
    }
    %19 = arith.andi %0, %1 : i1
    %20 = arith.extui %19 : i1 to i32
    %c0_i32_14 = arith.constant 0 : i32
    %21 = arith.cmpi ne, %20, %c0_i32_14 : i32
    scf.if %21 {
      %c0_15 = arith.constant 0 : index
      %c0_16 = arith.constant 0 : index
      %22 = vector.load %arg9[%c0_15, %c0_16] : memref<32x1xf32, #tpu.memory_space<vmem>>, vector<32x1xf32>
      %c0_17 = arith.constant 0 : index
      %c0_18 = arith.constant 0 : index
      %c0_19 = arith.constant 0 : index
      %23 = vector.load %arg7[%c0_17, %c0_18, %c0_19] : memref<1x32x2xf32, #tpu.memory_space<vmem>>, vector<1x32x1xf32>
      %24 = vector.shape_cast %23 : vector<1x32x1xf32> to vector<32x1xf32>
      %25 = vector.shape_cast %22 : vector<32x1xf32> to vector<1x32x1xf32>
      tpu.vector_store %arg7[%c0_17, %c0_18, %c0_19], %25 {strides = array<i32>} : memref<1x32x2xf32, #tpu.memory_space<vmem>>, vector<1x32x1xf32>,
      %c0_20 = arith.constant 0 : index
      %c0_21 = arith.constant 0 : index
      %26 = vector.load %arg10[%c0_20, %c0_21] : memref<32x1xf32, #tpu.memory_space<vmem>>, vector<32x1xf32>
      %c0_22 = arith.constant 0 : index
      %c0_23 = arith.constant 0 : index
      %c1 = arith.constant 1 : index
      %27 = vector.load %arg7[%c0_22, %c0_23, %c1] : memref<1x32x2xf32, #tpu.memory_space<vmem>>, vector<1x32x1xf32>
      %28 = vector.shape_cast %27 : vector<1x32x1xf32> to vector<32x1xf32>
      %29 = vector.shape_cast %26 : vector<32x1xf32> to vector<1x32x1xf32>
      tpu.vector_store %arg7[%c0_22, %c0_23, %c1], %29 {strides = array<i32>} : memref<1x32x2xf32, #tpu.memory_space<vmem>>, vector<1x32x1xf32>,
    } else {
    }
    return
  }
  func.func @transform_0(%arg0: i32, %arg1: i32, %arg2: i32) -> (i32, i32, i32) {
    %c0_i32 = arith.constant 0 : i32
    return %arg0, %arg2, %arg1 : i32, i32, i32
  }
  func.func @transform_1(%arg0: i32, %arg1: i32, %arg2: i32) -> (i32, i32) {
    %c0_i32 = arith.constant 0 : i32
    %c0_i32_0 = arith.constant 0 : i32
    return %c0_i32, %arg2 : i32, i32
  }
  func.func @transform_2(%arg0: i32, %arg1: i32, %arg2: i32) -> (i32, i32) {
    %c0_i32 = arith.constant 0 : i32
    %c0_i32_0 = arith.constant 0 : i32
    %c0_i32_1 = arith.constant 0 : i32
    return %c0_i32, %c0_i32_0 : i32, i32
  }
  func.func @transform_3(%arg0: i32, %arg1: i32, %arg2: i32) -> (i32, i32, i32) {
    %c0_i32 = arith.constant 0 : i32
    %c0_i32_0 = arith.constant 0 : i32
    return %arg0, %c0_i32, %arg1 : i32, i32, i32
  }
  func.func @transform_4(%arg0: i32, %arg1: i32, %arg2: i32) -> (i32, i32, i32) {
    %c0_i32 = arith.constant 0 : i32
    %c0_i32_0 = arith.constant 0 : i32
    %c0_i32_1 = arith.constant 0 : i32
    return %arg0, %c0_i32, %c0_i32_0 : i32, i32, i32
  }
}

module attributes {stable_mosaic.version = 11 : i64} {
  func.func @_in_lrelu_kernel(%arg0: i32, %arg1: i32, %arg2: memref<1x32x2xf32, #tpu.memory_space<vmem>>, %arg3: memref<1x32x64xf32, #tpu.memory_space<vmem>>, %arg4: memref<1x32x64xf32, #tpu.memory_space<vmem>>) attributes {dimension_semantics = [#tpu.dimension_semantics<parallel>, #tpu.dimension_semantics<parallel>], iteration_bounds = array<i64: 2, 1>, scalar_prefetch = 0 : i64, scratch_operands = 0 : i64, tpu.core_type = #tpu.core_type<tc>, window_params = [{transform_indices = @transform_0, window_bounds = array<i64: 1, 32, 2>}, {transform_indices = @transform_1, window_bounds = array<i64: 1, 32, 64>}, {transform_indices = @transform_2, window_bounds = array<i64: 1, 32, 64>}]} {
    %c0 = arith.constant 0 : index
    %c0_0 = arith.constant 0 : index
    %c0_1 = arith.constant 0 : index
    %0 = vector.load %arg2[%c0, %c0_0, %c0_1] : memref<1x32x2xf32, #tpu.memory_space<vmem>>, vector<1x32x1xf32>
    %1 = vector.shape_cast %0 : vector<1x32x1xf32> to vector<32x1xf32>
    %c0_2 = arith.constant 0 : index
    %c0_3 = arith.constant 0 : index
    %c1 = arith.constant 1 : index
    %2 = vector.load %arg2[%c0_2, %c0_3, %c1] : memref<1x32x2xf32, #tpu.memory_space<vmem>>, vector<1x32x1xf32>
    %3 = vector.shape_cast %2 : vector<1x32x1xf32> to vector<32x1xf32>
    %cst = arith.constant 1.562500e-02 : f32
    %4 = vector.broadcast %cst : f32 to vector<32x1xf32>
    %5 = arith.mulf %1, %4 : vector<32x1xf32>
    %cst_4 = arith.constant 1.562500e-02 : f32
    %6 = vector.broadcast %cst_4 : f32 to vector<32x1xf32>
    %7 = arith.mulf %3, %6 : vector<32x1xf32>
    %8 = arith.mulf %5, %5 : vector<32x1xf32>
    %9 = arith.subf %7, %8 : vector<32x1xf32>
    %cst_5 = arith.constant 0.000000e+00 : f32
    %10 = vector.broadcast %cst_5 : f32 to vector<32x1xf32>
    %11 = arith.maximumf %9, %10 : vector<32x1xf32>
    %c0_6 = arith.constant 0 : index
    %c0_7 = arith.constant 0 : index
    %c0_8 = arith.constant 0 : index
    %12 = vector.load %arg3[%c0_6, %c0_7, %c0_8] : memref<1x32x64xf32, #tpu.memory_space<vmem>>, vector<1x32x64xf32>
    %13 = vector.shape_cast %12 : vector<1x32x64xf32> to vector<32x64xf32>
    %14 = vector.broadcast %5 : vector<32x1xf32> to vector<32x64xf32>
    %15 = arith.subf %13, %14 : vector<32x64xf32>
    %cst_9 = arith.constant 9.99999974E-6 : f32
    %16 = vector.broadcast %cst_9 : f32 to vector<32x1xf32>
    %17 = arith.addf %11, %16 : vector<32x1xf32>
    %18 = math.rsqrt %17 : vector<32x1xf32>
    %19 = vector.broadcast %18 : vector<32x1xf32> to vector<32x64xf32>
    %20 = arith.mulf %15, %19 : vector<32x64xf32>
    %cst_10 = arith.constant 0.000000e+00 : f32
    %21 = vector.broadcast %cst_10 : f32 to vector<32x64xf32>
    %22 = arith.cmpf ogt, %20, %21 : vector<32x64xf32>
    %cst_11 = arith.constant 2.000000e-01 : f32
    %23 = vector.broadcast %cst_11 : f32 to vector<32x64xf32>
    %24 = arith.mulf %23, %20 : vector<32x64xf32>
    %25 = arith.select %22, %20, %24 : vector<32x64xi1>, vector<32x64xf32>
    %c0_12 = arith.constant 0 : index
    %c0_13 = arith.constant 0 : index
    %c0_14 = arith.constant 0 : index
    %26 = vector.load %arg4[%c0_12, %c0_13, %c0_14] : memref<1x32x64xf32, #tpu.memory_space<vmem>>, vector<1x32x64xf32>
    %27 = vector.shape_cast %26 : vector<1x32x64xf32> to vector<32x64xf32>
    %28 = vector.shape_cast %25 : vector<32x64xf32> to vector<1x32x64xf32>
    tpu.vector_store %arg4[%c0_12, %c0_13, %c0_14], %28 {strides = array<i32>} : memref<1x32x64xf32, #tpu.memory_space<vmem>>, vector<1x32x64xf32>,
    return
  }
  func.func @transform_0(%arg0: i32, %arg1: i32) -> (i32, i32, i32) {
    %c0_i32 = arith.constant 0 : i32
    %c0_i32_0 = arith.constant 0 : i32
    %c0_i32_1 = arith.constant 0 : i32
    return %arg0, %c0_i32, %c0_i32_0 : i32, i32, i32
  }
  func.func @transform_1(%arg0: i32, %arg1: i32) -> (i32, i32, i32) {
    %c0_i32 = arith.constant 0 : i32
    %c0_i32_0 = arith.constant 0 : i32
    return %arg0, %c0_i32, %arg1 : i32, i32, i32
  }
  func.func @transform_2(%arg0: i32, %arg1: i32) -> (i32, i32, i32) {
    %c0_i32 = arith.constant 0 : i32
    %c0_i32_0 = arith.constant 0 : i32
    return %arg0, %c0_i32, %arg1 : i32, i32, i32
  }
}

module attributes {stable_mosaic.version = 11 : i64} {
  func.func @_conv_kernel(%arg0: i32, %arg1: i32, %arg2: i32, %arg3: memref<1x128x49xf32, #tpu.memory_space<vmem>>, %arg4: memref<64x128xf32, #tpu.memory_space<vmem>>, %arg5: memref<64x1xf32, #tpu.memory_space<vmem>>, %arg6: memref<1x64x49xf32, #tpu.memory_space<vmem>>, %arg7: memref<1x64x2xf32, #tpu.memory_space<vmem>>, %arg8: memref<64x49xf32, #tpu.memory_space<vmem>>, %arg9: memref<64x1xf32, #tpu.memory_space<vmem>>, %arg10: memref<64x1xf32, #tpu.memory_space<vmem>>) attributes {dimension_semantics = [#tpu.dimension_semantics<parallel>, #tpu.dimension_semantics<arbitrary>, #tpu.dimension_semantics<arbitrary>], iteration_bounds = array<i64: 2, 1, 4>, scalar_prefetch = 0 : i64, scratch_operands = 3 : i64, tpu.core_type = #tpu.core_type<tc>, window_params = [{transform_indices = @transform_0, window_bounds = array<i64: 1, 128, 49>}, {transform_indices = @transform_1, window_bounds = array<i64: 64, 128>}, {pipeline_mode = #tpu.pipeline_mode<synchronous>, transform_indices = @transform_2, window_bounds = array<i64: 64, 1>}, {transform_indices = @transform_3, window_bounds = array<i64: 1, 64, 49>}, {transform_indices = @transform_4, window_bounds = array<i64: 1, 64, 2>}]} {
    %c0_i32 = arith.constant 0 : i32
    %0 = arith.cmpi eq, %arg1, %c0_i32 : i32
    %c3_i32 = arith.constant 3 : i32
    %1 = arith.cmpi eq, %arg2, %c3_i32 : i32
    %c0_i32_0 = arith.constant 0 : i32
    %2 = arith.cmpi eq, %arg2, %c0_i32_0 : i32
    %3 = arith.extui %2 : i1 to i32
    %c0_i32_1 = arith.constant 0 : i32
    %4 = arith.cmpi ne, %3, %c0_i32_1 : i32
    scf.if %4 {
      %cst_15 = arith.constant 0.000000e+00 : f32
      %22 = vector.broadcast %cst_15 : f32 to vector<64x49xf32>
      %c0_16 = arith.constant 0 : index
      %c0_17 = arith.constant 0 : index
      %23 = vector.load %arg8[%c0_16, %c0_17] : memref<64x49xf32, #tpu.memory_space<vmem>>, vector<64x49xf32>
      tpu.vector_store %arg8[%c0_16, %c0_17], %22 {strides = array<i32>} : memref<64x49xf32, #tpu.memory_space<vmem>>, vector<64x49xf32>,
    } else {
    }
    %c0_i32_2 = arith.constant 0 : i32
    %5 = arith.cmpi eq, %arg1, %c0_i32_2 : i32
    %c0_i32_3 = arith.constant 0 : i32
    %6 = arith.cmpi eq, %arg2, %c0_i32_3 : i32
    %7 = arith.andi %5, %6 : i1
    %8 = arith.extui %7 : i1 to i32
    %c0_i32_4 = arith.constant 0 : i32
    %9 = arith.cmpi ne, %8, %c0_i32_4 : i32
    scf.if %9 {
      %cst_15 = arith.constant 0.000000e+00 : f32
      %22 = vector.broadcast %cst_15 : f32 to vector<64x1xf32>
      %c0_16 = arith.constant 0 : index
      %c0_17 = arith.constant 0 : index
      %23 = vector.load %arg9[%c0_16, %c0_17] : memref<64x1xf32, #tpu.memory_space<vmem>>, vector<64x1xf32>
      tpu.vector_store %arg9[%c0_16, %c0_17], %22 {strides = array<i32>} : memref<64x1xf32, #tpu.memory_space<vmem>>, vector<64x1xf32>,
      %cst_18 = arith.constant 0.000000e+00 : f32
      %24 = vector.broadcast %cst_18 : f32 to vector<64x1xf32>
      %c0_19 = arith.constant 0 : index
      %c0_20 = arith.constant 0 : index
      %25 = vector.load %arg10[%c0_19, %c0_20] : memref<64x1xf32, #tpu.memory_space<vmem>>, vector<64x1xf32>
      tpu.vector_store %arg10[%c0_19, %c0_20], %24 {strides = array<i32>} : memref<64x1xf32, #tpu.memory_space<vmem>>, vector<64x1xf32>,
    } else {
    }
    %c0 = arith.constant 0 : index
    %c0_5 = arith.constant 0 : index
    %10 = vector.load %arg8[%c0, %c0_5] : memref<64x49xf32, #tpu.memory_space<vmem>>, vector<64x49xf32>
    %c0_6 = arith.constant 0 : index
    %c0_7 = arith.constant 0 : index
    %11 = vector.load %arg4[%c0_6, %c0_7] : memref<64x128xf32, #tpu.memory_space<vmem>>, vector<64x128xf32>
    %c0_8 = arith.constant 0 : index
    %c0_9 = arith.constant 0 : index
    %c0_10 = arith.constant 0 : index
    %12 = vector.load %arg3[%c0_8, %c0_9, %c0_10] : memref<1x128x49xf32, #tpu.memory_space<vmem>>, vector<1x128x49xf32>
    %13 = vector.shape_cast %12 : vector<1x128x49xf32> to vector<128x49xf32>
    %cst = arith.constant dense<0.000000e+00> : vector<64x49xf32>
    %14 = tpu.matmul %11, %13, %cst {dimension_numbers = #tpu.dot_dimension_numbers<[1], [0], [0], [1], [0, 0, 1, 1], [], []>} : vector<64x128xf32>, vector<128x49xf32>, vector<64x49xf32> -> vector<64x49xf32>
    %15 = arith.addf %10, %14 : vector<64x49xf32>
    %c0_11 = arith.constant 0 : index
    %c0_12 = arith.constant 0 : index
    %16 = vector.load %arg8[%c0_11, %c0_12] : memref<64x49xf32, #tpu.memory_space<vmem>>, vector<64x49xf32>
    tpu.vector_store %arg8[%c0_11, %c0_12], %15 {strides = array<i32>} : memref<64x49xf32, #tpu.memory_space<vmem>>, vector<64x49xf32>,
    %17 = arith.extui %1 : i1 to i32
    %c0_i32_13 = arith.constant 0 : i32
    %18 = arith.cmpi ne, %17, %c0_i32_13 : i32
    scf.if %18 {
      %c0_15 = arith.constant 0 : index
      %c0_16 = arith.constant 0 : index
      %22 = vector.load %arg8[%c0_15, %c0_16] : memref<64x49xf32, #tpu.memory_space<vmem>>, vector<64x49xf32>
      %c0_17 = arith.constant 0 : index
      %c0_18 = arith.constant 0 : index
      %23 = vector.load %arg5[%c0_17, %c0_18] : memref<64x1xf32, #tpu.memory_space<vmem>>, vector<64x1xf32>
      %24 = vector.broadcast %23 : vector<64x1xf32> to vector<64x49xf32>
      %25 = arith.addf %22, %24 : vector<64x49xf32>
      %c0_19 = arith.constant 0 : index
      %c0_20 = arith.constant 0 : index
      %26 = vector.load %arg9[%c0_19, %c0_20] : memref<64x1xf32, #tpu.memory_space<vmem>>, vector<64x1xf32>
      %cst_21 = arith.constant dense<0.000000e+00> : vector<64xf32>
      %27 = vector.multi_reduction <add>, %25, %cst_21 [1] : vector<64x49xf32> to vector<64xf32>
      %28 = vector.shape_cast %27 : vector<64xf32> to vector<64x1xf32>
      %29 = arith.addf %26, %28 : vector<64x1xf32>
      %c0_22 = arith.constant 0 : index
      %c0_23 = arith.constant 0 : index
      %30 = vector.load %arg9[%c0_22, %c0_23] : memref<64x1xf32, #tpu.memory_space<vmem>>, vector<64x1xf32>
      tpu.vector_store %arg9[%c0_22, %c0_23], %29 {strides = array<i32>} : memref<64x1xf32, #tpu.memory_space<vmem>>, vector<64x1xf32>,
      %c0_24 = arith.constant 0 : index
      %c0_25 = arith.constant 0 : index
      %31 = vector.load %arg10[%c0_24, %c0_25] : memref<64x1xf32, #tpu.memory_space<vmem>>, vector<64x1xf32>
      %32 = arith.mulf %25, %25 : vector<64x49xf32>
      %cst_26 = arith.constant dense<0.000000e+00> : vector<64xf32>
      %33 = vector.multi_reduction <add>, %32, %cst_26 [1] : vector<64x49xf32> to vector<64xf32>
      %34 = vector.shape_cast %33 : vector<64xf32> to vector<64x1xf32>
      %35 = arith.addf %31, %34 : vector<64x1xf32>
      %c0_27 = arith.constant 0 : index
      %c0_28 = arith.constant 0 : index
      %36 = vector.load %arg10[%c0_27, %c0_28] : memref<64x1xf32, #tpu.memory_space<vmem>>, vector<64x1xf32>
      tpu.vector_store %arg10[%c0_27, %c0_28], %35 {strides = array<i32>} : memref<64x1xf32, #tpu.memory_space<vmem>>, vector<64x1xf32>,
      %c0_29 = arith.constant 0 : index
      %c0_30 = arith.constant 0 : index
      %c0_31 = arith.constant 0 : index
      %37 = vector.load %arg6[%c0_29, %c0_30, %c0_31] : memref<1x64x49xf32, #tpu.memory_space<vmem>>, vector<1x64x49xf32>
      %38 = vector.shape_cast %37 : vector<1x64x49xf32> to vector<64x49xf32>
      %39 = vector.shape_cast %25 : vector<64x49xf32> to vector<1x64x49xf32>
      tpu.vector_store %arg6[%c0_29, %c0_30, %c0_31], %39 {strides = array<i32>} : memref<1x64x49xf32, #tpu.memory_space<vmem>>, vector<1x64x49xf32>,
    } else {
    }
    %19 = arith.andi %0, %1 : i1
    %20 = arith.extui %19 : i1 to i32
    %c0_i32_14 = arith.constant 0 : i32
    %21 = arith.cmpi ne, %20, %c0_i32_14 : i32
    scf.if %21 {
      %c0_15 = arith.constant 0 : index
      %c0_16 = arith.constant 0 : index
      %22 = vector.load %arg9[%c0_15, %c0_16] : memref<64x1xf32, #tpu.memory_space<vmem>>, vector<64x1xf32>
      %c0_17 = arith.constant 0 : index
      %c0_18 = arith.constant 0 : index
      %c0_19 = arith.constant 0 : index
      %23 = vector.load %arg7[%c0_17, %c0_18, %c0_19] : memref<1x64x2xf32, #tpu.memory_space<vmem>>, vector<1x64x1xf32>
      %24 = vector.shape_cast %23 : vector<1x64x1xf32> to vector<64x1xf32>
      %25 = vector.shape_cast %22 : vector<64x1xf32> to vector<1x64x1xf32>
      tpu.vector_store %arg7[%c0_17, %c0_18, %c0_19], %25 {strides = array<i32>} : memref<1x64x2xf32, #tpu.memory_space<vmem>>, vector<1x64x1xf32>,
      %c0_20 = arith.constant 0 : index
      %c0_21 = arith.constant 0 : index
      %26 = vector.load %arg10[%c0_20, %c0_21] : memref<64x1xf32, #tpu.memory_space<vmem>>, vector<64x1xf32>
      %c0_22 = arith.constant 0 : index
      %c0_23 = arith.constant 0 : index
      %c1 = arith.constant 1 : index
      %27 = vector.load %arg7[%c0_22, %c0_23, %c1] : memref<1x64x2xf32, #tpu.memory_space<vmem>>, vector<1x64x1xf32>
      %28 = vector.shape_cast %27 : vector<1x64x1xf32> to vector<64x1xf32>
      %29 = vector.shape_cast %26 : vector<64x1xf32> to vector<1x64x1xf32>
      tpu.vector_store %arg7[%c0_22, %c0_23, %c1], %29 {strides = array<i32>} : memref<1x64x2xf32, #tpu.memory_space<vmem>>, vector<1x64x1xf32>,
    } else {
    }
    return
  }
  func.func @transform_0(%arg0: i32, %arg1: i32, %arg2: i32) -> (i32, i32, i32) {
    %c0_i32 = arith.constant 0 : i32
    return %arg0, %arg2, %arg1 : i32, i32, i32
  }
  func.func @transform_1(%arg0: i32, %arg1: i32, %arg2: i32) -> (i32, i32) {
    %c0_i32 = arith.constant 0 : i32
    %c0_i32_0 = arith.constant 0 : i32
    return %c0_i32, %arg2 : i32, i32
  }
  func.func @transform_2(%arg0: i32, %arg1: i32, %arg2: i32) -> (i32, i32) {
    %c0_i32 = arith.constant 0 : i32
    %c0_i32_0 = arith.constant 0 : i32
    %c0_i32_1 = arith.constant 0 : i32
    return %c0_i32, %c0_i32_0 : i32, i32
  }
  func.func @transform_3(%arg0: i32, %arg1: i32, %arg2: i32) -> (i32, i32, i32) {
    %c0_i32 = arith.constant 0 : i32
    %c0_i32_0 = arith.constant 0 : i32
    return %arg0, %c0_i32, %arg1 : i32, i32, i32
  }
  func.func @transform_4(%arg0: i32, %arg1: i32, %arg2: i32) -> (i32, i32, i32) {
    %c0_i32 = arith.constant 0 : i32
    %c0_i32_0 = arith.constant 0 : i32
    %c0_i32_1 = arith.constant 0 : i32
    return %arg0, %c0_i32, %c0_i32_0 : i32, i32, i32
  }
}

module attributes {stable_mosaic.version = 11 : i64} {
  func.func @_in_lrelu_kernel(%arg0: i32, %arg1: i32, %arg2: memref<1x64x2xf32, #tpu.memory_space<vmem>>, %arg3: memref<1x64x49xf32, #tpu.memory_space<vmem>>, %arg4: memref<1x64x49xf32, #tpu.memory_space<vmem>>) attributes {dimension_semantics = [#tpu.dimension_semantics<parallel>, #tpu.dimension_semantics<parallel>], iteration_bounds = array<i64: 2, 1>, scalar_prefetch = 0 : i64, scratch_operands = 0 : i64, tpu.core_type = #tpu.core_type<tc>, window_params = [{transform_indices = @transform_0, window_bounds = array<i64: 1, 64, 2>}, {transform_indices = @transform_1, window_bounds = array<i64: 1, 64, 49>}, {transform_indices = @transform_2, window_bounds = array<i64: 1, 64, 49>}]} {
    %c0 = arith.constant 0 : index
    %c0_0 = arith.constant 0 : index
    %c0_1 = arith.constant 0 : index
    %0 = vector.load %arg2[%c0, %c0_0, %c0_1] : memref<1x64x2xf32, #tpu.memory_space<vmem>>, vector<1x64x1xf32>
    %1 = vector.shape_cast %0 : vector<1x64x1xf32> to vector<64x1xf32>
    %c0_2 = arith.constant 0 : index
    %c0_3 = arith.constant 0 : index
    %c1 = arith.constant 1 : index
    %2 = vector.load %arg2[%c0_2, %c0_3, %c1] : memref<1x64x2xf32, #tpu.memory_space<vmem>>, vector<1x64x1xf32>
    %3 = vector.shape_cast %2 : vector<1x64x1xf32> to vector<64x1xf32>
    %cst = arith.constant 0.0204081628 : f32
    %4 = vector.broadcast %cst : f32 to vector<64x1xf32>
    %5 = arith.mulf %1, %4 : vector<64x1xf32>
    %cst_4 = arith.constant 0.0204081628 : f32
    %6 = vector.broadcast %cst_4 : f32 to vector<64x1xf32>
    %7 = arith.mulf %3, %6 : vector<64x1xf32>
    %8 = arith.mulf %5, %5 : vector<64x1xf32>
    %9 = arith.subf %7, %8 : vector<64x1xf32>
    %cst_5 = arith.constant 0.000000e+00 : f32
    %10 = vector.broadcast %cst_5 : f32 to vector<64x1xf32>
    %11 = arith.maximumf %9, %10 : vector<64x1xf32>
    %c0_6 = arith.constant 0 : index
    %c0_7 = arith.constant 0 : index
    %c0_8 = arith.constant 0 : index
    %12 = vector.load %arg3[%c0_6, %c0_7, %c0_8] : memref<1x64x49xf32, #tpu.memory_space<vmem>>, vector<1x64x49xf32>
    %13 = vector.shape_cast %12 : vector<1x64x49xf32> to vector<64x49xf32>
    %14 = vector.broadcast %5 : vector<64x1xf32> to vector<64x49xf32>
    %15 = arith.subf %13, %14 : vector<64x49xf32>
    %cst_9 = arith.constant 9.99999974E-6 : f32
    %16 = vector.broadcast %cst_9 : f32 to vector<64x1xf32>
    %17 = arith.addf %11, %16 : vector<64x1xf32>
    %18 = math.rsqrt %17 : vector<64x1xf32>
    %19 = vector.broadcast %18 : vector<64x1xf32> to vector<64x49xf32>
    %20 = arith.mulf %15, %19 : vector<64x49xf32>
    %cst_10 = arith.constant 0.000000e+00 : f32
    %21 = vector.broadcast %cst_10 : f32 to vector<64x49xf32>
    %22 = arith.cmpf ogt, %20, %21 : vector<64x49xf32>
    %cst_11 = arith.constant 2.000000e-01 : f32
    %23 = vector.broadcast %cst_11 : f32 to vector<64x49xf32>
    %24 = arith.mulf %23, %20 : vector<64x49xf32>
    %25 = arith.select %22, %20, %24 : vector<64x49xi1>, vector<64x49xf32>
    %c0_12 = arith.constant 0 : index
    %c0_13 = arith.constant 0 : index
    %c0_14 = arith.constant 0 : index
    %26 = vector.load %arg4[%c0_12, %c0_13, %c0_14] : memref<1x64x49xf32, #tpu.memory_space<vmem>>, vector<1x64x49xf32>
    %27 = vector.shape_cast %26 : vector<1x64x49xf32> to vector<64x49xf32>
    %28 = vector.shape_cast %25 : vector<64x49xf32> to vector<1x64x49xf32>
    tpu.vector_store %arg4[%c0_12, %c0_13, %c0_14], %28 {strides = array<i32>} : memref<1x64x49xf32, #tpu.memory_space<vmem>>, vector<1x64x49xf32>,
    return
  }
  func.func @transform_0(%arg0: i32, %arg1: i32) -> (i32, i32, i32) {
    %c0_i32 = arith.constant 0 : i32
    %c0_i32_0 = arith.constant 0 : i32
    %c0_i32_1 = arith.constant 0 : i32
    return %arg0, %c0_i32, %c0_i32_0 : i32, i32, i32
  }
  func.func @transform_1(%arg0: i32, %arg1: i32) -> (i32, i32, i32) {
    %c0_i32 = arith.constant 0 : i32
    %c0_i32_0 = arith.constant 0 : i32
    return %arg0, %c0_i32, %arg1 : i32, i32, i32
  }
  func.func @transform_2(%arg0: i32, %arg1: i32) -> (i32, i32, i32) {
    %c0_i32 = arith.constant 0 : i32
    %c0_i32_0 = arith.constant 0 : i32
    return %arg0, %c0_i32, %arg1 : i32, i32, i32
  }
}

module attributes {stable_mosaic.version = 11 : i64} {
  func.func @_conv_pool_kernel(%arg0: i32, %arg1: i32, %arg2: i32, %arg3: memref<1x128x36xf32, #tpu.memory_space<vmem>>, %arg4: memref<1x128xf32, #tpu.memory_space<vmem>>, %arg5: memref<1x1xf32, #tpu.memory_space<vmem>>, %arg6: memref<1x1x1xf32, #tpu.memory_space<vmem>>, %arg7: memref<1x36xf32, #tpu.memory_space<vmem>>, %arg8: memref<1x1xf32, #tpu.memory_space<vmem>>) attributes {dimension_semantics = [#tpu.dimension_semantics<parallel>, #tpu.dimension_semantics<arbitrary>, #tpu.dimension_semantics<arbitrary>], iteration_bounds = array<i64: 2, 1, 8>, scalar_prefetch = 0 : i64, scratch_operands = 2 : i64, tpu.core_type = #tpu.core_type<tc>, window_params = [{transform_indices = @transform_0, window_bounds = array<i64: 1, 128, 36>}, {transform_indices = @transform_1, window_bounds = array<i64: 1, 128>}, {pipeline_mode = #tpu.pipeline_mode<synchronous>, transform_indices = @transform_2, window_bounds = array<i64: 1, 1>}, {transform_indices = @transform_3, window_bounds = array<i64: 1, 1, 1>}]} {
    %c0_i32 = arith.constant 0 : i32
    %0 = arith.cmpi eq, %arg1, %c0_i32 : i32
    %c7_i32 = arith.constant 7 : i32
    %1 = arith.cmpi eq, %arg2, %c7_i32 : i32
    %c0_i32_0 = arith.constant 0 : i32
    %2 = arith.cmpi eq, %arg2, %c0_i32_0 : i32
    %3 = arith.extui %2 : i1 to i32
    %c0_i32_1 = arith.constant 0 : i32
    %4 = arith.cmpi ne, %3, %c0_i32_1 : i32
    scf.if %4 {
      %cst_15 = arith.constant 0.000000e+00 : f32
      %22 = vector.broadcast %cst_15 : f32 to vector<1x36xf32>
      %c0_16 = arith.constant 0 : index
      %c0_17 = arith.constant 0 : index
      %23 = vector.load %arg7[%c0_16, %c0_17] : memref<1x36xf32, #tpu.memory_space<vmem>>, vector<1x36xf32>
      tpu.vector_store %arg7[%c0_16, %c0_17], %22 {strides = array<i32>} : memref<1x36xf32, #tpu.memory_space<vmem>>, vector<1x36xf32>,
    } else {
    }
    %c0_i32_2 = arith.constant 0 : i32
    %5 = arith.cmpi eq, %arg1, %c0_i32_2 : i32
    %c0_i32_3 = arith.constant 0 : i32
    %6 = arith.cmpi eq, %arg2, %c0_i32_3 : i32
    %7 = arith.andi %5, %6 : i1
    %8 = arith.extui %7 : i1 to i32
    %c0_i32_4 = arith.constant 0 : i32
    %9 = arith.cmpi ne, %8, %c0_i32_4 : i32
    scf.if %9 {
      %cst_15 = arith.constant 0.000000e+00 : f32
      %22 = vector.broadcast %cst_15 : f32 to vector<1x1xf32>
      %c0_16 = arith.constant 0 : index
      %c0_17 = arith.constant 0 : index
      %23 = vector.load %arg8[%c0_16, %c0_17] : memref<1x1xf32, #tpu.memory_space<vmem>>, vector<1x1xf32>
      tpu.vector_store %arg8[%c0_16, %c0_17], %22 {strides = array<i32>} : memref<1x1xf32, #tpu.memory_space<vmem>>, vector<1x1xf32>,
    } else {
    }
    %c0 = arith.constant 0 : index
    %c0_5 = arith.constant 0 : index
    %10 = vector.load %arg7[%c0, %c0_5] : memref<1x36xf32, #tpu.memory_space<vmem>>, vector<1x36xf32>
    %c0_6 = arith.constant 0 : index
    %c0_7 = arith.constant 0 : index
    %11 = vector.load %arg4[%c0_6, %c0_7] : memref<1x128xf32, #tpu.memory_space<vmem>>, vector<1x128xf32>
    %c0_8 = arith.constant 0 : index
    %c0_9 = arith.constant 0 : index
    %c0_10 = arith.constant 0 : index
    %12 = vector.load %arg3[%c0_8, %c0_9, %c0_10] : memref<1x128x36xf32, #tpu.memory_space<vmem>>, vector<1x128x36xf32>
    %13 = vector.shape_cast %12 : vector<1x128x36xf32> to vector<128x36xf32>
    %cst = arith.constant dense<0.000000e+00> : vector<1x36xf32>
    %14 = tpu.matmul %11, %13, %cst {dimension_numbers = #tpu.dot_dimension_numbers<[1], [0], [0], [1], [0, 0, 1, 1], [], []>} : vector<1x128xf32>, vector<128x36xf32>, vector<1x36xf32> -> vector<1x36xf32>
    %15 = arith.addf %10, %14 : vector<1x36xf32>
    %c0_11 = arith.constant 0 : index
    %c0_12 = arith.constant 0 : index
    %16 = vector.load %arg7[%c0_11, %c0_12] : memref<1x36xf32, #tpu.memory_space<vmem>>, vector<1x36xf32>
    tpu.vector_store %arg7[%c0_11, %c0_12], %15 {strides = array<i32>} : memref<1x36xf32, #tpu.memory_space<vmem>>, vector<1x36xf32>,
    %17 = arith.extui %1 : i1 to i32
    %c0_i32_13 = arith.constant 0 : i32
    %18 = arith.cmpi ne, %17, %c0_i32_13 : i32
    scf.if %18 {
      %c0_15 = arith.constant 0 : index
      %c0_16 = arith.constant 0 : index
      %22 = vector.load %arg7[%c0_15, %c0_16] : memref<1x36xf32, #tpu.memory_space<vmem>>, vector<1x36xf32>
      %c0_17 = arith.constant 0 : index
      %c0_18 = arith.constant 0 : index
      %23 = vector.load %arg5[%c0_17, %c0_18] : memref<1x1xf32, #tpu.memory_space<vmem>>, vector<1x1xf32>
      %24 = vector.broadcast %23 : vector<1x1xf32> to vector<1x36xf32>
      %25 = arith.addf %22, %24 : vector<1x36xf32>
      %c0_19 = arith.constant 0 : index
      %c0_20 = arith.constant 0 : index
      %26 = vector.load %arg8[%c0_19, %c0_20] : memref<1x1xf32, #tpu.memory_space<vmem>>, vector<1x1xf32>
      %cst_21 = arith.constant dense<0.000000e+00> : vector<1xf32>
      %27 = vector.multi_reduction <add>, %25, %cst_21 [1] : vector<1x36xf32> to vector<1xf32>
      %28 = vector.shape_cast %27 : vector<1xf32> to vector<1x1xf32>
      %29 = arith.addf %26, %28 : vector<1x1xf32>
      %c0_22 = arith.constant 0 : index
      %c0_23 = arith.constant 0 : index
      %30 = vector.load %arg8[%c0_22, %c0_23] : memref<1x1xf32, #tpu.memory_space<vmem>>, vector<1x1xf32>
      tpu.vector_store %arg8[%c0_22, %c0_23], %29 {strides = array<i32>} : memref<1x1xf32, #tpu.memory_space<vmem>>, vector<1x1xf32>,
    } else {
    }
    %19 = arith.andi %0, %1 : i1
    %20 = arith.extui %19 : i1 to i32
    %c0_i32_14 = arith.constant 0 : i32
    %21 = arith.cmpi ne, %20, %c0_i32_14 : i32
    scf.if %21 {
      %c0_15 = arith.constant 0 : index
      %c0_16 = arith.constant 0 : index
      %22 = vector.load %arg8[%c0_15, %c0_16] : memref<1x1xf32, #tpu.memory_space<vmem>>, vector<1x1xf32>
      %cst_17 = arith.constant 0.027777778 : f32
      %23 = vector.broadcast %cst_17 : f32 to vector<1x1xf32>
      %24 = arith.mulf %22, %23 : vector<1x1xf32>
      %c0_18 = arith.constant 0 : index
      %c0_19 = arith.constant 0 : index
      %c0_20 = arith.constant 0 : index
      %25 = vector.load %arg6[%c0_18, %c0_19, %c0_20] : memref<1x1x1xf32, #tpu.memory_space<vmem>>, vector<1x1x1xf32>
      %26 = vector.shape_cast %25 : vector<1x1x1xf32> to vector<1x1xf32>
      %27 = vector.shape_cast %24 : vector<1x1xf32> to vector<1x1x1xf32>
      tpu.vector_store %arg6[%c0_18, %c0_19, %c0_20], %27 {strides = array<i32>} : memref<1x1x1xf32, #tpu.memory_space<vmem>>, vector<1x1x1xf32>,
    } else {
    }
    return
  }
  func.func @transform_0(%arg0: i32, %arg1: i32, %arg2: i32) -> (i32, i32, i32) {
    %c0_i32 = arith.constant 0 : i32
    return %arg0, %arg2, %arg1 : i32, i32, i32
  }
  func.func @transform_1(%arg0: i32, %arg1: i32, %arg2: i32) -> (i32, i32) {
    %c0_i32 = arith.constant 0 : i32
    %c0_i32_0 = arith.constant 0 : i32
    return %c0_i32, %arg2 : i32, i32
  }
  func.func @transform_2(%arg0: i32, %arg1: i32, %arg2: i32) -> (i32, i32) {
    %c0_i32 = arith.constant 0 : i32
    %c0_i32_0 = arith.constant 0 : i32
    %c0_i32_1 = arith.constant 0 : i32
    return %c0_i32, %c0_i32_0 : i32, i32
  }
  func.func @transform_3(%arg0: i32, %arg1: i32, %arg2: i32) -> (i32, i32, i32) {
    %c0_i32 = arith.constant 0 : i32
    %c0_i32_0 = arith.constant 0 : i32
    %c0_i32_1 = arith.constant 0 : i32
    return %arg0, %c0_i32, %c0_i32_0 : i32, i32, i32
  }
}

</mosaic_0001>

<bundles_post_ra>
// kernel: discriminator_forward.8
= control target key start
LH: loop header
LB: loop body
LE: loop exit
PB: predicated region body
PF: predicated region fallthrough
CT: control target
= control target key end

     0   :  { %s593_s12 = smov 0   ;;  %s595_s13 = smov 0   ;;  %s690_s0 = inlined_call_operand.vmem [shape: f32[2,48,1024], index: 0, kind: input, shape index: {}]   ;;  %s691_s1 = inlined_call_operand.vmem [shape: f32[8,48], index: 1, kind: input, shape index: {}]   ;;  %s692_s2 = inlined_call_operand.vmem [shape: f32[8,1], index: 2, kind: input, shape index: {}]   ;;  %s693_s3 = inlined_call_operand.vmem [shape: f32[2,8,1024], index: 3, kind: output, shape index: {}]  }
   0x1   :  { %s597_s14 = smov 0   ;;  %s599_s15 = smov 0  }
   0x2   :  { %s601_s16 = smov 0   ;;  %s603_s17 = smov 0  }
   0x3   :  { %s605_s18 = smov 0  }
   0x4 LB: > { %s28_s19 = sadd.s32 1, %s562_s16  ;;  %s32_s20 = sadd.s32 1, %s566_s17  ;;  %s570_s18 = sphi %s605_s18, %s13_s18   ;;  %s566_s17 = sphi %s603_s17, %s699_s17   ;;  %s562_s16 = sphi %s601_s16, %s698_s16   ;;  %s558_s15 = sphi %s599_s15, %s697_s15   ;;  %s554_s14 = sphi %s597_s14, %s696_s14   ;;  %s550_s13 = sphi %s595_s13, %s695_s13   ;;  %s546_s12 = sphi %s593_s12, %s694_s12  }
   0x5   : > { %p30_p0 = scmp.ge.s32.totalorder %s28_s19, 8  ;;  %p50_p1 = scmp.ne.s32.totalorder %s550_s13, %s546_s12 }
   0x6   : > { %p51_p2 = scmp.eq.s32.totalorder %s570_s18, 0  ;;  %s43_s24 = sadd.s32 1, %s550_s13 }
   0x7   : > { %s701_s19 = smov (%p30_p0, %s28_s19), 0  ;;  %s703_s20 = smov (!%p30_p0, %s32_s20), %s566_s17 }
   0x8   : > { %p52_p3 = por %p51_p2, %p50_p1  ;;  %p34_p4 = scmp.ge.s32.totalorder %s703_s20, 2 }
   0x9   : > { %s39_s21 = ssub.s32 %s562_s16, %s701_s19  ;;  %p447_p6 = scmp.ge.s32.totalorder %s570_s18, 16 }
   0xa   : > { %s705_s20 = smov (%p34_p4, %s703_s20), 0 }
   0xb   : > { %s36_s22 = ssub.s32 %s566_s17, %s705_s20  ;;  %161 = sbr.rel (%p447_p6) target bundleno = 29 (0x1d), region = 24 }
   0xc   : > { %s40_s23 = sor.u32 %s39_s21, %s36_s22 }
   0xd   : > { %p41_p5 = scmp.eq.s32.totalorder %s40_s23, 0 }
   0xf   : > { %s644_s25 = scalar_select %p41_p5, %s550_s13, %s43_s24  }
  0x10   : > { %164 = sbr.rel (!%p52_p3) target bundleno = 29 (0x1d), region = 28  ;;  %s166_s26 = sand.u32 (%p52_p3), 1, %s550_s13  }
  0x11   : > { %s456_s27 = smul.u32 (%p52_p3), 48, %s566_s17 }
  0x12   : > { %s455_s28 = smul.u32 (%p52_p3), 48, %s166_s26 }
  0x13   : > { %s173_s29 = sadd.s32 (%p52_p3), %s562_s16, %s456_s27 }
  0x14   : > { %s448_s30 = sshll.u32 (%p52_p3), %s173_s29, 3  ;;  %s168_s7 = scalar_lea.vmem (%p52_p3), [#allocation3], %s455_s28 }
  0x15   : > { %s175_s6 = scalar_lea.vmem %s690_s0, %s448_s30 }
  0x16   : > { %v214_v0 = vld [vmem:[%s175_s6] sm:$0xff] }
  0x17   : > { %v216_v1 = vld [vmem:[%s175_s6 + $0x40] sm:$0xff]  ;;  %215 = vst [vmem:[%s168_s7] sm:$0xff] %v214_v0 }
  0x18   : > { %v218_v2 = vld [vmem:[%s175_s6 + $0x80] sm:$0xff]  ;;  %217 = vst [vmem:[%s168_s7 + $0x8] sm:$0xff] %v216_v1 }
  0x19   : > { %v220_v3 = vld [vmem:[%s175_s6 + $0xc0] sm:$0xff]  ;;  %219 = vst [vmem:[%s168_s7 + $0x10] sm:$0xff] %v218_v2 }
  0x1a   : > { %v222_v4 = vld [vmem:[%s175_s6 + $0x100] sm:$0xff]  ;;  %221 = vst [vmem:[%s168_s7 + $0x18] sm:$0xff] %v220_v3 }
  0x1b   : > { %v224_v5 = vld [vmem:[%s175_s6 + $0x140] sm:$0xff]  ;;  %223 = vst [vmem:[%s168_s7 + $0x20] sm:$0xff] %v222_v4 }
  0x1c   : > { %225 = vst [vmem:[%s168_s7 + $0x28] sm:$0xff] %v224_v5 }
  0x1d PF: > { %p449_p7 = scmp.ge.s32.totalorder %s570_s18, 1  ;;  %p230_p8 = scmp.lt.s32.totalorder %s570_s18, 17 }
  0x1f   : > { %p231_p9 = pnand %p449_p7, %p230_p8 }
  0x20   : > { %s237_s8 = sand.u32 (!%p231_p9), 1, %s546_s12   ;;  %p272_p10 = scmp.lt.s32.totalorder (!%p231_p9), %s558_s15, 1 }
  0x21   : > { %234 = sbr.rel (%p231_p9) target bundleno = 182 (0xb6), region = 66  ;;  %p274_p11 = scmp.lt.s32.totalorder (!%p231_p9), %s554_s14, 7 }
  0x22   : > { %s457_s11 = smul.u32 (!%p231_p9), 48, %s237_s8 }
  0x24   : > { %s239_s21 = scalar_lea.vmem (!%p231_p9), [#allocation3], %s457_s11 }
  0x26   : > { %v323_v6 = vld [vmem:[%s692_s2] sm:$0xff]  ;;  %v572_v7 = vmov 0   ;;  %v292_v8 = vld [vmem:[%s239_s21 + $0x28] sm:$0xff]  ;;  %v290_v10 = vld [vmem:[%s239_s21 + $0x18] sm:$0xff]  ;;  %vm293_vm0 = vcmask 392192   ;;  %s707_s15 = smov (!%p272_p10, %s558_s15), 1 }
  0x27   : > { %515 = vset.pattern.permute.xlu0 %v572_v7  ;;  %v291_v9 = vld [vmem:[%s239_s21 + $0x20] sm:$0xff]  ;;  %307 = vmatpush.msra.mxu0 %v292_v8  ;;  %v289_v11 = vld [vmem:[%s239_s21 + $0x10] sm:$0xff]  ;;  %v288_v12 = vld [vmem:[%s239_s21 + $0x8] sm:$0xff]  ;;  %s709_s14 = smov (!%p274_p11, %s554_s14), 7  ;;  %s450_s23 = sshll.u32 %s707_s15, 3 }
  0x28   : > { %326 = vperm.xlu0 %515, %v323_v6   ;;  %v287_v13 = vld [vmem:[%s239_s21] sm:$0xff]  ;;  %s277_s24 = sadd.s32 %s450_s23, %s709_s14 }
  0x29   : > { %308 = vmatpush.msra.mxu0 %v291_v9  ;;  %v286_v14 = vld [vmem:[%s691_s1] sm:$0xff]  ;;  %s451_s26 = sshll.u32 %s277_s24, 3 }
  0x2a   : > { %s279_s29 = scalar_lea.vmem %s693_s3, %s451_s26 }
  0x2b   : > { %309 = vmatpush.msra.mxu0 %v290_v10 }
  0x2d   : > { %310 = vmatpush.msra.mxu0 %v289_v11 }
  0x2f   : > { %311 = vmatpush.msra.mxu0 %v288_v12 }
  0x31   : > { %312 = vmatpush.msra.mxu0 %v287_v13 }
  0x32   : > { %452 = vmatmul.msk.f32.vlgmr.msra.gmra.mxu0 %vm293_vm0, %v286_v14 }
  0x9a   : > { %v327_v15 = vpop.permute.xlu0 %326 }
  0xaf   : > { %v314_v16 = vpop.f32.mrf.mxu0 }
  0xb0   : > { %v329_v17 = vadd.f32 %v327_v15, %v314_v16 }
  0xb2   : > { %vm330_vm1 = vcmp.gt.f32.partialorder %v329_v17, 0.0  ;;  %v331_v18 = vmul.f32 0.2, %v329_v17 }
  0xb4   : > { %v332_v19 = vsel %vm330_vm1, %v329_v17, %v331_v18 }
  0xb5   : > { %333 = vst [vmem:[%s279_s29] sm:$0xff] %v332_v19 }
  0xb6 PF: > { %s13_s18 = sadd.s32 1, %s570_s18   ;;  %s694_s12 = smov %s550_s13 }
  0xb7   : > { %p10_p12 = scmp.ge.s32.totalorder %s13_s18, 18   ;;  %s695_s13 = smov %s644_s25 }
  0xb8   : > { %s696_s14 = smov %s562_s16  ;;  %s697_s15 = smov %s566_s17 }
  0xb9   : > { %s698_s16 = smov %s701_s19  ;;  %s699_s17 = smov %s705_s20 }
  0xba   :  { %12 = sbr.rel (!%p10_p12) target bundleno = 4 (0x4), region = 116 }

// kernel: discriminator_forward.9
= control target key start
LH: loop header
LB: loop body
LE: loop exit
PB: predicated region body
PF: predicated region fallthrough
CT: control target
= control target key end

     0   :  { %s836_s15 = smov 0   ;;  %s838_s16 = smov 0   ;;  %s1007_s0 = inlined_call_operand.vmem [shape: f32[2,128,256], index: 0, kind: input, shape index: {}]   ;;  %s1008_s1 = inlined_call_operand.vmem [shape: f32[16,128], index: 1, kind: input, shape index: {}]   ;;  %s1009_s2 = inlined_call_operand.vmem [shape: f32[16,1], index: 2, kind: input, shape index: {}]   ;;  %s1010_s3 = inlined_call_operand.vmem [shape: f32[2,16,256], index: 3, kind: output, shape index: {0}]   ;;  %s1011_s4 = inlined_call_operand.vmem [shape: f32[2,16,2], index: 4, kind: output, shape index: {1}]  }
   0x1   :  { %s840_s17 = smov 0   ;;  %s842_s18 = smov 0  }
   0x2   :  { %s844_s19 = smov 0   ;;  %s846_s20 = smov 0  }
   0x3   :  { %s848_s21 = smov 0  }
   0x4 LB: > { %s30_s22 = sadd.s32 1, %s797_s19  ;;  %s34_s23 = sadd.s32 1, %s801_s20  ;;  %s805_s21 = sphi %s848_s21, %s15_s21   ;;  %s801_s20 = sphi %s846_s20, %s1018_s20   ;;  %s797_s19 = sphi %s844_s19, %s1017_s19   ;;  %s793_s18 = sphi %s842_s18, %s1016_s18   ;;  %s789_s17 = sphi %s840_s17, %s1015_s17   ;;  %s785_s16 = sphi %s838_s16, %s1014_s16   ;;  %s781_s15 = sphi %s836_s15, %s1013_s15  }
   0x5   : > { %p32_p0 = scmp.ge.s32.totalorder %s30_s22, 2  ;;  %s651_s24 = sadd.s32 4294967295, %s805_s21  }
   0x6   : > { %p52_p1 = scmp.ne.s32.totalorder %s785_s16, %s781_s15  ;;  %p53_p2 = scmp.eq.s32.totalorder %s805_s21, 0 }
   0x7   : > { %s1020_s22 = smov (%p32_p0, %s30_s22), 0  ;;  %s1022_s23 = smov (!%p32_p0, %s34_s23), %s801_s20 }
   0x8   : > { %p36_p3 = scmp.ge.s32.totalorder %s1022_s23, 2  ;;  %p131_p4 = scmp.eq.s32.totalorder %s651_s24, 3 }
   0x9   : > { %s41_s25 = ssub.s32 %s797_s19, %s1020_s22  ;;  %p54_p5 = por %p53_p2, %p52_p1 }
   0xa   : > { %s1024_s23 = smov (%p36_p3, %s1022_s23), 0  ;;  %p884_p6 = por %p131_p4, %p52_p1 }
   0xb   : > { %s38_s27 = ssub.s32 %s801_s20, %s1024_s23  ;;  %s45_s29 = sadd.s32 1, %s785_s16 }
   0xc   : > { %s42_s28 = sor.u32 %s41_s25, %s38_s27  ;;  %p655_p8 = scmp.ge.s32.totalorder %s805_s21, 4 }
   0xd   : > { %p43_p7 = scmp.eq.s32.totalorder %s42_s28, 0 }
   0xe   : > { %189 = sbr.rel (%p655_p8) target bundleno = 41 (0x29), region = 24 }
   0xf   : > { %s892_s30 = scalar_select %p43_p7, %s785_s16, %s45_s29  }
  0x13   : > { %192 = sbr.rel (!%p54_p5) target bundleno = 41 (0x29), region = 28  ;;  %s194_s5 = sand.u32 (%p54_p5), 1, %s785_s16  }
  0x14   : > { %s657_s6 = sshll.u32 (%p54_p5), %s801_s20, 5  ;;  %s656_s7 = sshll.u32 (%p54_p5), %s194_s5, 7 }
  0x15   : > { %s201_s8 = sadd.s32 (%p54_p5), %s797_s19, %s657_s6  ;;  %s196_s13 = scalar_lea.vmem (%p54_p5), [#allocation5], %s656_s7 }
  0x16   : > { %s658_s9 = sshll.u32 (%p54_p5), %s201_s8, 3 }
  0x17   : > { %s901_s12 = scalar_lea.vmem (%p54_p5), %s1007_s0, %s658_s9 }
  0x18   : > { %v262_v0 = vld [vmem:[%s901_s12] sm:$0xff]  ;;  %v264_v1 = vld [vmem:[%s901_s12 + $0x10] sm:$0xff] }
  0x19   : > { %v266_v2 = vld [vmem:[%s901_s12 + $0x20] sm:$0xff]  ;;  %263 = vst [vmem:[%s196_s13] sm:$0xff] %v262_v0  ;;  %v268_v3 = vld [vmem:[%s901_s12 + $0x30] sm:$0xff] }
  0x1a   : > { %265 = vst [vmem:[%s196_s13 + $0x8] sm:$0xff] %v264_v1  ;;  %v270_v4 = vld [vmem:[%s901_s12 + $0x40] sm:$0xff]  ;;  %v272_v5 = vld [vmem:[%s901_s12 + $0x50] sm:$0xff] }
  0x1b   : > { %267 = vst [vmem:[%s196_s13 + $0x10] sm:$0xff] %v266_v2  ;;  %v274_v6 = vld [vmem:[%s901_s12 + $0x60] sm:$0xff]  ;;  %v276_v7 = vld [vmem:[%s901_s12 + $0x70] sm:$0xff] }
  0x1c   : > { %269 = vst [vmem:[%s196_s13 + $0x18] sm:$0xff] %v268_v3  ;;  %v278_v8 = vld [vmem:[%s901_s12 + $0x80] sm:$0xff]  ;;  %v280_v9 = vld [vmem:[%s901_s12 + $0x90] sm:$0xff] }
  0x1d   : > { %271 = vst [vmem:[%s196_s13 + $0x20] sm:$0xff] %v270_v4  ;;  %v282_v10 = vld [vmem:[%s901_s12 + $0xa0] sm:$0xff]  ;;  %v284_v11 = vld [vmem:[%s901_s12 + $0xb0] sm:$0xff] }
  0x1e   : > { %273 = vst [vmem:[%s196_s13 + $0x28] sm:$0xff] %v272_v5  ;;  %v286_v12 = vld [vmem:[%s901_s12 + $0xc0] sm:$0xff]  ;;  %v288_v13 = vld [vmem:[%s901_s12 + $0xd0] sm:$0xff] }
  0x1f   : > { %275 = vst [vmem:[%s196_s13 + $0x30] sm:$0xff] %v274_v6  ;;  %v290_v14 = vld [vmem:[%s901_s12 + $0xe0] sm:$0xff]  ;;  %v292_v15 = vld [vmem:[%s901_s12 + $0xf0] sm:$0xff] }
  0x20   : > { %277 = vst [vmem:[%s196_s13 + $0x38] sm:$0xff] %v276_v7 }
  0x21   : > { %279 = vst [vmem:[%s196_s13 + $0x40] sm:$0xff] %v278_v8 }
  0x22   : > { %281 = vst [vmem:[%s196_s13 + $0x48] sm:$0xff] %v280_v9 }
  0x23   : > { %283 = vst [vmem:[%s196_s13 + $0x50] sm:$0xff] %v282_v10 }
  0x24   : > { %285 = vst [vmem:[%s196_s13 + $0x58] sm:$0xff] %v284_v11 }
  0x25   : > { %287 = vst [vmem:[%s196_s13 + $0x60] sm:$0xff] %v286_v12 }
  0x26   : > { %289 = vst [vmem:[%s196_s13 + $0x68] sm:$0xff] %v288_v13 }
  0x27   : > { %291 = vst [vmem:[%s196_s13 + $0x70] sm:$0xff] %v290_v14 }
  0x28   : > { %293 = vst [vmem:[%s196_s13 + $0x78] sm:$0xff] %v292_v15 }
  0x29 PF: > { %p659_p9 = scmp.ge.s32.totalorder %s805_s21, 1  ;;  %p298_p10 = scmp.lt.s32.totalorder %s805_s21, 5 }
  0x2b   : > { %p299_p11 = pnand %p659_p9, %p298_p10 }
  0x2c   : > { %s305_s14 = sand.u32 (!%p299_p11), 1, %s781_s15   ;;  %p343_p12 = scmp.lt.s32.totalorder (!%p299_p11), %s793_s18, 1 }
  0x2d   : > { %302 = sbr.rel (%p299_p11) target bundleno = 477 (0x1dd), region = 66  ;;  %s660_s24 = sshll.u32 (!%p299_p11), %s305_s14, 7 }
  0x2e   : > { %s661_s25 = sshll.u32 (!%p299_p11), %s305_s14, 4  ;;  %p348_p13 = scmp.eq.s32.totalorder (!%p299_p11), %s789_s17, 1 }
  0x2f   : > { %p355_p0 = scmp.eq.s32.totalorder (!%p299_p11), %s789_s17, 0  ;;  %s931_s7 = scalar_lea.vmem (!%p299_p11), [#allocation5], %s660_s24 }
  0x30   : > { %s933_s8 = scalar_lea.vmem (!%p299_p11), [#allocation6], %s661_s25 }
  0x32   : > { %v807_v16 = vmov 0.0   ;;  %s344_s27 = scalar_select %p343_p12, %s793_s18, 1  ;;  %vm360_vm0 = vcmask (%p355_p0), 7168   ;;  %v808_v17 = vmov (%p355_p0), 0.0  }
  0x33   : > { %353 = vst [vmem:[#allocation2] sm:$0xff] %v807_v16  ;;  %359 = sbr.rel (!%p355_p0) target bundleno = 57 (0x39), region = 78 }
  0x34   : > { %354 = vst [vmem:[#allocation2 + $0x8] sm:$0xff] %v807_v16  ;;  %s671_s28 = sshll.u32 %s344_s27, 4 }
  0x35   : > { %s929_s6 = scalar_lea.vmem %s1011_s4, %s671_s28  ;;  %361 = vst.msk [vmem:[#allocation3] sm:$0xff] (%p355_p0), %vm360_vm0, %v808_v17 }
  0x36   : > { %362 = vst.msk [vmem:[#allocation3 + $0x8] sm:$0xff] (%p355_p0), %vm360_vm0, %v808_v17 }
  0x37   : > { %363 = vst.msk [vmem:[#allocation4] sm:$0xff] (%p355_p0), %vm360_vm0, %v808_v17 }
  0x38   : > { %364 = vst.msk [vmem:[#allocation4 + $0x8] sm:$0xff] %vm360_vm0, %v808_v17 }
  0x39 PF: > { %v384_v18 = vld [vmem:[%s931_s7 + $0x78] sm:$0xff]  ;;  %v383_v19 = vld [vmem:[%s931_s7 + $0x70] sm:$0xff]  ;;  %v382_v20 = vld [vmem:[%s931_s7 + $0x68] sm:$0xff]  ;;  %v809_v21 = vmov 0   ;;  %vm439_vm1 = vcmask 7168   ;;  %s810_s25 = smov (%p348_p13), 1  }
  0x3a   : > { %385 = vmatpush.msra.mxu0 %v384_v18  ;;  %674 = vmatpush.msra.mxu1 %v384_v18  ;;  %v381_v22 = vld [vmem:[%s931_s7 + $0x60] sm:$0xff]  ;;  %v380_v23 = vld [vmem:[%s931_s7 + $0x58] sm:$0xff]  ;;  %v417_v24 = vld [vmem:[%s1009_s2] sm:$0xff]  ;;  %vm475_vm2 = vcmask (%p348_p13), 15368  }
  0x3b   : > { %750 = vset.pattern.permute.xlu0 %v809_v21  ;;  %v379_v25 = vld [vmem:[%s931_s7 + $0x50] sm:$0xff]  ;;  %v378_v26 = vld [vmem:[%s931_s7 + $0x48] sm:$0xff]  ;;  %v377_v27 = vld [vmem:[%s931_s7 + $0x40] sm:$0xff] }
  0x3c   : > { %386 = vmatpush.msra.mxu0 %v383_v19  ;;  %675 = vmatpush.msra.mxu1 %v383_v19  ;;  %v418_v28 = vld [vmem:[%s1009_s2 + $0x8] sm:$0xff]  ;;  %v375_v30 = vld [vmem:[%s931_s7 + $0x30] sm:$0xff]  ;;  %v374_v31 = vld [vmem:[%s931_s7 + $0x28] sm:$0xff] }
  0x3d   : > { %421 = vperm.xlu0 %750, %v417_v24   ;;  %v376_v29 = vld [vmem:[%s931_s7 + $0x38] sm:$0xff]  ;;  %v373_v32 = vld [vmem:[%s931_s7 + $0x20] sm:$0xff]  ;;  %v371_v34 = vld [vmem:[%s931_s7 + $0x10] sm:$0xff] }
  0x3e   : > { %387 = vmatpush.msra.mxu0 %v382_v20  ;;  %676 = vmatpush.msra.mxu1 %v382_v20  ;;  %v372_v33 = vld [vmem:[%s931_s7 + $0x18] sm:$0xff]  ;;  %v370_v35 = vld [vmem:[%s931_s7 + $0x8] sm:$0xff]  ;;  %v369_v36 = vld [vmem:[%s931_s7] sm:$0xff] }
  0x3f   : > { %v367_v37 = vld [vmem:[%s1008_s1] sm:$0xff]  ;;  %v368_v38 = vld [vmem:[%s1008_s1 + $0x8] sm:$0xff]  ;;  %v431_v51 = vld [vmem:[#allocation3] sm:$0xff] }
  0x40   : > { %388 = vmatpush.msra.mxu0 %v381_v22  ;;  %677 = vmatpush.msra.mxu1 %v381_v22  ;;  %v365_v40 = vld [vmem:[#allocation2] sm:$0xff]  ;;  %v366_v41 = vld [vmem:[#allocation2 + $0x8] sm:$0xff]  ;;  %v432_v57 = vld [vmem:[#allocation3 + $0x8] sm:$0xff] }
  0x41   : > { %v442_v53 = vld [vmem:[#allocation4] sm:$0xff]  ;;  %v443_v59 = vld [vmem:[#allocation4 + $0x8] sm:$0xff] }
  0x42   : > { %389 = vmatpush.msra.mxu0 %v380_v23  ;;  %678 = vmatpush.msra.mxu1 %v380_v23 }
  0x44   : > { %390 = vmatpush.msra.mxu0 %v379_v25  ;;  %679 = vmatpush.msra.mxu1 %v379_v25 }
  0x45   : > { %426 = vperm.xlu0 %750, %v418_v28  }
  0x46   : > { %391 = vmatpush.msra.mxu0 %v378_v26  ;;  %680 = vmatpush.msra.mxu1 %v378_v26 }
  0x48   : > { %392 = vmatpush.msra.mxu0 %v377_v27  ;;  %681 = vmatpush.msra.mxu1 %v377_v27 }
  0x4a   : > { %393 = vmatpush.msra.mxu0 %v376_v29  ;;  %682 = vmatpush.msra.mxu1 %v376_v29 }
  0x4c   : > { %394 = vmatpush.msra.mxu0 %v375_v30  ;;  %683 = vmatpush.msra.mxu1 %v375_v30 }
  0x4e   : > { %395 = vmatpush.msra.mxu0 %v374_v31  ;;  %684 = vmatpush.msra.mxu1 %v374_v31 }
  0x50   : > { %396 = vmatpush.msra.mxu0 %v373_v32  ;;  %685 = vmatpush.msra.mxu1 %v373_v32 }
  0x52   : > { %397 = vmatpush.msra.mxu0 %v372_v33  ;;  %686 = vmatpush.msra.mxu1 %v372_v33 }
  0x54   : > { %398 = vmatpush.msra.mxu0 %v371_v34  ;;  %687 = vmatpush.msra.mxu1 %v371_v34 }
  0x56   : > { %399 = vmatpush.msra.mxu0 %v370_v35  ;;  %688 = vmatpush.msra.mxu1 %v370_v35 }
  0x58   : > { %400 = vmatpush.msra.mxu0 %v369_v36  ;;  %689 = vmatpush.msra.mxu1 %v369_v36 }
  0x59   : > { %401 = vmatmul.f32.vlgmr.msra.gmra.mxu0 %v367_v37  ;;  %404 = vmatmul.f32.vlgmr.msra.gmra.mxu1 %v368_v38 }
  0xaf   : > { %v422_v39 = vpop.permute.xlu0 %421 }
  0xb7   : > { %v427_v42 = vpop.permute.xlu0 %426 }
  0xd6   : > { %v402_v43 = vpop.f32.mrf.mxu0  ;;  %v405_v44 = vpop.f32.mrf.mxu1 }
  0xd7   : > { %v408_v45 = vadd.f32 %v402_v43, %v365_v40  ;;  %v409_v46 = vadd.f32 %v405_v44, %v366_v41 }
  0xd9   : > { %410 = vst [vmem:[#allocation2] sm:$0xff] %v408_v45  ;;  %v429_v47 = vadd.f32 %v422_v39, %v408_v45  ;;  %v430_v48 = vadd.f32 %v427_v42, %v409_v46 }
  0xda   : > { %411 = vst [vmem:[#allocation2 + $0x8] sm:$0xff] %v409_v46 }
  0xdb   : > { %454 = vst [vmem:[%s933_s8] sm:$0xff] %v429_v47  ;;  %433 = vadd.xlane.f32.xlu1 %v429_v47  ;;  %v444_v49 = vmul.f32 %v429_v47, %v429_v47  ;;  %v445_v50 = vmul.f32 %v430_v48, %v430_v48 }
  0xdc   : > { %455 = vst [vmem:[%s933_s8 + $0x8] sm:$0xff] %v430_v48 }
  0xdd   : > { %446 = vadd.xlane.f32.xlu2 %v444_v49 }
  0xe3   : > { %435 = vadd.xlane.f32.xlu1 %v430_v48 }
  0xe5   : > { %448 = vadd.xlane.f32.xlu2 %v445_v50 }
 0x14e   : > { %v434_v52 = vpop.xlane.xlu1 %433 }
 0x14f   : > { %v437_v54 = vadd.f32 %v434_v52, %v431_v51 }
 0x150   : > { %v447_v55 = vpop.xlane.xlu2 %446 }
 0x151   : > { %440 = vst.msk [vmem:[#allocation3] sm:$0xff] %vm439_vm1, %v437_v54  ;;  %v450_v56 = vadd.f32 %v447_v55, %v442_v53 }
 0x153   : > { %452 = vst.msk [vmem:[#allocation4] sm:$0xff] %vm439_vm1, %v450_v56 }
 0x156   : > { %v436_v58 = vpop.xlane.xlu1 %435 }
 0x157   : > { %v438_v60 = vadd.f32 %v436_v58, %v432_v57  ;;  %459 = sbr.rel (!%p348_p13) target bundleno = 471 (0x1d7), region = 86 }
 0x158   : > { %v449_v61 = vpop.xlane.xlu2 %448  ;;  %v460_v1 = vld [vmem:[#allocation3] sm:$0xff] (%p348_p13) }
 0x159   : > { %441 = vst.msk [vmem:[#allocation3 + $0x8] sm:$0xff] %vm439_vm1, %v438_v60  ;;  %v451_v62 = vadd.f32 %v449_v61, %v443_v59 }
 0x15a   : > { %v465_v63 = vld [vmem:[#allocation4] sm:$0xff] (%p348_p13)  ;;  %463 = vst.msk [vmem:[%s929_s6] sm:$0xff] (%p348_p13), %vm439_vm1, %v460_v1 }
 0x15b   : > { %453 = vst.msk [vmem:[#allocation4 + $0x8] sm:$0xff] %vm439_vm1, %v451_v62  ;;  %469 = vrot.lane.b32.xlu0 (%p348_p13), %v465_v63, %s810_s25 }
 0x160   : > { %v461_v2 = vld [vmem:[#allocation3 + $0x8] sm:$0xff] }
 0x161   : > { %464 = vst.msk [vmem:[%s929_s6 + $0x8] sm:$0xff] %vm439_vm1, %v461_v2 }
 0x162   : > { %v466_v0 = vld [vmem:[#allocation4 + $0x8] sm:$0xff] }
 0x163   : > { %471 = vrot.lane.b32.xlu0 %v466_v0, %s810_s25 }
 0x1cd   : > { %v470_v3 = vpop.permute.xlu0 %469 }
 0x1ce   : > { %476 = vst.msk [vmem:[%s929_s6] sm:$0xff] %vm475_vm2, %v470_v3 }
 0x1d5   : > { %v472_v4 = vpop.permute.xlu0 %471 }
 0x1d6   : > { %477 = vst.msk [vmem:[%s929_s6 + $0x8] sm:$0xff] %vm475_vm2, %v472_v4 }
 0x1d7 PF: > { %489 = sbr.rel (!%p884_p6) target bundleno = 477 (0x1dd), region = 90  ;;  %s667_s27 = sshll.u32 (%p884_p6), %s793_s18, 2  ;;  %v524_v5 = vld [vmem:[%s933_s8] sm:$0xff] (%p884_p6)  ;;  %v526_v6 = vld [vmem:[%s933_s8 + $0x8] sm:$0xff] (%p884_p6) }
 0x1d8   : > { %s491_s28 = sadd.s32 (%p884_p6), %s789_s17, %s667_s27 }
 0x1d9   : > { %s668_s29 = sshll.u32 (%p884_p6), %s491_s28, 3 }
 0x1da   : > { %s493_s15 = scalar_lea.vmem (%p884_p6), %s1010_s3, %s668_s29 }
 0x1db   : > { %525 = vst [vmem:[%s493_s15] sm:$0xff] (%p884_p6), %v524_v5 }
 0x1dc   : > { %527 = vst [vmem:[%s493_s15 + $0x10] sm:$0xff] %v526_v6 }
 0x1dd PF: > { %s15_s21 = sadd.s32 1, %s805_s21   ;;  %s1013_s15 = smov %s785_s16 }
 0x1de   : > { %p12_p1 = scmp.ge.s32.totalorder %s15_s21, 6   ;;  %s1014_s16 = smov %s892_s30 }
 0x1df   : > { %s1015_s17 = smov %s797_s19  ;;  %s1016_s18 = smov %s801_s20 }
 0x1e0   : > { %s1017_s19 = smov %s1020_s22  ;;  %s1018_s20 = smov %s1024_s23 }
 0x1e1   :  { %14 = sbr.rel (!%p12_p1) target bundleno = 4 (0x4), region = 174 }

// kernel: discriminator_forward.10
= control target key start
LH: loop header
LB: loop body
LE: loop exit
PB: predicated region body
PF: predicated region fallthrough
CT: control target
= control target key end

     0   :  { %s579_s9 = smov 0   ;;  %s581_s10 = smov 0   ;;  %s680_s0 = inlined_call_operand.vmem [shape: f32[2,16,2], index: 0, kind: input, shape index: {}]   ;;  %s681_s1 = inlined_call_operand.vmem [shape: f32[2,16,256], index: 1, kind: input, shape index: {}, may-alias: {1,2}]   ;;  %s682_s2 = inlined_call_operand.vmem [shape: f32[2,16,256], index: 2, kind: output, shape index: {}, may-alias: {1,2}]  }
   0x1   :  { %s583_s11 = smov 0   ;;  %s585_s12 = smov 0  }
   0x2   :  { %s587_s13 = smov 0   ;;  %s589_s14 = smov 0  }
   0x3   :  { %s591_s15 = smov 0  }
   0x4 LB: > { %s21_s16 = sadd.s32 1, %s551_s13  ;;  %s24_s17 = sadd.s32 1, %s555_s14  ;;  %s559_s15 = sphi %s591_s15, %s12_s15   ;;  %s555_s14 = sphi %s589_s14, %s689_s14   ;;  %s551_s13 = sphi %s587_s13, %s688_s13   ;;  %s547_s12 = sphi %s585_s12, %s687_s12   ;;  %s543_s11 = sphi %s583_s11, %s686_s11   ;;  %s539_s10 = sphi %s581_s10, %s685_s10   ;;  %s535_s9 = sphi %s579_s9, %s684_s9  }
   0x5   : > { %p22_p0 = scmp.ge.s32.totalorder %s21_s16, 2  ;;  %s421_s18 = sadd.s32 4294967295, %s559_s15  }
   0x6   : > { %p66_p1 = scmp.ne.s32.totalorder %s539_s10, %s535_s9  ;;  %p67_p2 = scmp.eq.s32.totalorder %s559_s15, 0 }
   0x7   : > { %s691_s16 = smov (%p22_p0, %s21_s16), 0  ;;  %s693_s17 = smov (!%p22_p0, %s24_s17), %s555_s14 }
   0x8   : > { %p26_p3 = scmp.ge.s32.totalorder %s693_s17, 2  ;;  %p98_p4 = scmp.eq.s32.totalorder %s421_s18, 3 }
   0x9   : > { %s55_s19 = ssub.s32 %s551_s13, %s691_s16  ;;  %p68_p5 = por %p67_p2, %p66_p1 }
   0xa   : > { %s695_s17 = smov (%p26_p3, %s693_s17), 0  ;;  %p627_p6 = por %p98_p4, %p66_p1 }
   0xb   : > { %s54_s21 = ssub.s32 %s555_s14, %s695_s17  ;;  %s59_s23 = sadd.s32 1, %s539_s10 }
   0xc   : > { %s56_s22 = sor.u32 %s55_s19, %s54_s21  ;;  %p424_p8 = scmp.ge.s32.totalorder %s559_s15, 4 }
   0xd   : > { %p57_p7 = scmp.eq.s32.totalorder %s56_s22, 0 }
   0xe   : > { %120 = sbr.rel (%p424_p8) target bundleno = 27 (0x1b), region = 16 }
   0xf   : > { %s635_s24 = scalar_select %p57_p7, %s539_s10, %s59_s23  }
  0x13   : > { %131 = sbr.rel (!%p68_p5) target bundleno = 27 (0x1b), region = 24  ;;  %s133_s25 = sand.u32 (%p68_p5), 1, %s539_s10  }
  0x14   : > { %s426_s26 = sshll.u32 (%p68_p5), %s555_s14, 2  ;;  %s425_s27 = sshll.u32 (%p68_p5), %s133_s25, 4 }
  0x15   : > { %s137_s28 = sadd.s32 (%p68_p5), %s551_s13, %s426_s26  ;;  %s135_s5 = scalar_lea.vmem (%p68_p5), [#allocation2], %s425_s27 }
  0x16   : > { %s427_s29 = sshll.u32 (%p68_p5), %s137_s28, 3 }
  0x17   : > { %s139_s4 = scalar_lea.vmem (%p68_p5), %s681_s1, %s427_s29 }
  0x18   : > { %v170_v0 = vld [vmem:[%s139_s4] sm:$0xff]  ;;  %v172_v1 = vld [vmem:[%s139_s4 + $0x10] sm:$0xff] }
  0x19   : > { %171 = vst [vmem:[%s135_s5] sm:$0xff] %v170_v0 }
  0x1a   : > { %173 = vst [vmem:[%s135_s5 + $0x8] sm:$0xff] %v172_v1 }
  0x1b PF: > { %p428_p9 = scmp.ge.s32.totalorder %s559_s15, 1  ;;  %p178_p10 = scmp.lt.s32.totalorder %s559_s15, 5 }
  0x1d   : > { %p179_p11 = pnand %p428_p9, %p178_p10 }
  0x1e   : > { %p210_p12 = scmp.lt.s32.totalorder (!%p179_p11), %s547_s12, 1  ;;  %s562_s21 = smov (!%p179_p11), 1  }
  0x1f   : > { %182 = sbr.rel (%p179_p11) target bundleno = 297 (0x129), region = 62  ;;  %s185_s22 = sand.u32 (!%p179_p11), 1, %s535_s9  }
  0x20   : > { %s429_s23 = sshll.u32 (!%p179_p11), %s185_s22, 4 }
  0x21   : > { %s187_s25 = scalar_lea.vmem (!%p179_p11), [#allocation2], %s429_s23  ;;  %s209_s26 = scalar_lea.vmem (!%p179_p11), [#allocation3], %s429_s23 }
  0x24   : > { %v561_v2 = vmov 0   ;;  %s211_s6 = scalar_select %p210_p12, %s547_s12, 1  ;;  %v563_v9 = vmov 1   ;;  %v233_v33 = vld [vmem:[%s187_s25] sm:$0xff]  ;;  %v234_v39 = vld [vmem:[%s187_s25 + $0x8] sm:$0xff] }
  0x25   : > { %498 = vset.pattern.permute.xlu1 %v561_v2  ;;  %499 = vset.pattern.permute.xlu2 %v563_v9  ;;  %s434_s9 = sshll.u32 (%p627_p6), %s547_s12, 2 }
  0x26   : > { %s438_s7 = sshll.u32 %s211_s6, 4  ;;  %500 = vset.pattern.permute.xlu0 %v563_v9  ;;  %s297_s27 = sadd.s32 (%p627_p6), %s543_s11, %s434_s9 }
  0x27   : > { %s214_s19 = scalar_lea.vmem %s680_s0, %s438_s7  ;;  %s435_s28 = sshll.u32 (%p627_p6), %s297_s27, 3 }
  0x28   : > { %v215_v3 = vld [vmem:[%s214_s19] sm:$0xff]  ;;  %v216_v5 = vld [vmem:[%s214_s19 + $0x8] sm:$0xff]  ;;  %s299_s3 = scalar_lea.vmem (%p627_p6), %s682_s2, %s435_s28 }
  0x29   : > { %v217_v4 = vmul.f32 0.00390625, %v215_v3  ;;  %v218_v7 = vmul.f32 0.00390625, %v216_v5 }
  0x2b   : > { %v219_v6 = vmul.f32 %v217_v4, %v217_v4  ;;  %237 = vperm.xlu1 %498, %v217_v4   ;;  %v220_v8 = vmul.f32 %v218_v7, %v218_v7 }
  0x2d   : > { %223 = vrot.lane.b32.xlu0 %v219_v6, %s562_s21 }
  0x33   : > { %242 = vperm.xlu1 %498, %v218_v7  }
  0x35   : > { %225 = vrot.lane.b32.xlu0 %v220_v8, %s562_s21 }
  0x9d   : > { %v238_v32 = vpop.permute.xlu1 %237 }
  0x9e   : > { %v245_v34 = vsub.f32 %v233_v33, %v238_v32 }
  0x9f   : > { %v224_v10 = vpop.permute.xlu0 %223 }
  0xa0   : > { %v229_v11 = vsub.f32 %v217_v4, %v224_v10 }
  0xa2   : > { %v231_v12 = vmax.f32 %v229_v11, 0.0 }
  0xa4   : > { %v247_v13 = vadd.f32 1e-05, %v231_v12 }
  0xa5   : > { %v243_v38 = vpop.permute.xlu1 %242 }
  0xa6   : > { %501 = vrsqrt.f32 %v247_v13  ;;  %vm255_vm1 = vweird.f32 %v247_v13  ;;  %v246_v41 = vsub.f32 %v234_v39, %v243_v38 }
  0xa7   : > { %v226_v14 = vpop.permute.xlu0 %225 }
  0xa8   : > { %v230_v15 = vsub.f32 %v218_v7, %v226_v14 }
  0xaa   : > { %v232_v16 = vmax.f32 %v230_v15, 0.0 }
  0xac   : > { %v502_v17 = vpop.eup %501  ;;  %v248_v18 = vadd.f32 1e-05, %v232_v16 }
  0xad   : > { %v250_v19 = vmul.f32 %v502_v17, %v247_v13  ;;  %vm256_vm0 = vweird.f32 %v502_v17 }
  0xae   : > { %503 = vrsqrt.f32 %v248_v18  ;;  %vm257_vm2 = vmor %vm255_vm1, %vm256_vm0  ;;  %vm265_vm4 = vweird.f32 %v248_v18 }
  0xaf   : > { %v251_v20 = vmul.f32 %v502_v17, %v250_v19 }
  0xb1   : > { %v252_v21 = vmul.f32 0.5, %v251_v20 }
  0xb3   : > { %v253_v22 = vsub.f32 1.5, %v252_v21 }
  0xb4   : > { %v504_v23 = vpop.eup %503 }
  0xb5   : > { %v260_v24 = vmul.f32 %v504_v23, %v248_v18  ;;  %v254_v25 = vmul.f32 %v502_v17, %v253_v22  ;;  %vm266_vm3 = vweird.f32 %v504_v23 }
  0xb6   : > { %vm267_vm5 = vmor %vm265_vm4, %vm266_vm3 }
  0xb7   : > { %v261_v26 = vmul.f32 %v504_v23, %v260_v24  ;;  %v258_v27 = vsel %vm257_vm2, %v502_v17, %v254_v25 }
  0xb8   : > { %271 = vperm.xlu2 %499, %v258_v27  }
  0xb9   : > { %v262_v28 = vmul.f32 0.5, %v261_v26 }
  0xbb   : > { %v263_v29 = vsub.f32 1.5, %v262_v28 }
  0xbd   : > { %v264_v30 = vmul.f32 %v504_v23, %v263_v29 }
  0xbf   : > { %v268_v31 = vsel %vm267_vm5, %v504_v23, %v264_v30 }
  0xc0   : > { %276 = vperm.xlu2 %499, %v268_v31  }
 0x112   : > { %v272_v35 = vpop.permute.xlu2 %271 }
 0x113   : > { %v279_v36 = vmul.f32 %v272_v35, %v245_v34 }
 0x115   : > { %vm281_vm6 = vcmp.gt.f32.partialorder %v279_v36, 0.0  ;;  %v283_v37 = vmul.f32 0.2, %v279_v36 }
 0x117   : > { %v285_v40 = vsel %vm281_vm6, %v279_v36, %v283_v37 }
 0x118   : > { %287 = vst [vmem:[%s209_s26] sm:$0xff] %v285_v40 }
 0x11a   : > { %v277_v42 = vpop.permute.xlu2 %276 }
 0x11b   : > { %v280_v43 = vmul.f32 %v277_v42, %v246_v41 }
 0x11c   : > { %295 = sbr.rel (!%p627_p6) target bundleno = 297 (0x129), region = 70 }
 0x11d   : > { %vm282_vm7 = vcmp.gt.f32.partialorder %v280_v43, 0.0  ;;  %v284_v44 = vmul.f32 0.2, %v280_v43 }
 0x11f   : > { %v286_v45 = vsel %vm282_vm7, %v280_v43, %v284_v44  ;;  %v330_v46 = vld [vmem:[%s209_s26] sm:$0xff] (%p627_p6) }
 0x120   : > { %288 = vst [vmem:[%s209_s26 + $0x8] sm:$0xff] %v286_v45 }
 0x121   : > { %331 = vst [vmem:[%s299_s3] sm:$0xff] %v330_v46 }
 0x127   : > { %v332_v47 = vld [vmem:[%s209_s26 + $0x8] sm:$0xff] }
 0x128   : > { %333 = vst [vmem:[%s299_s3 + $0x10] sm:$0xff] %v332_v47 }
 0x129 PF: > { %s12_s15 = sadd.s32 1, %s559_s15   ;;  %s684_s9 = smov %s539_s10 }
 0x12a   : > { %p9_p13 = scmp.ge.s32.totalorder %s12_s15, 6   ;;  %s685_s10 = smov %s635_s24 }
 0x12b   : > { %s686_s11 = smov %s551_s13  ;;  %s687_s12 = smov %s555_s14 }
 0x12c   : > { %s688_s13 = smov %s691_s16  ;;  %s689_s14 = smov %s695_s17 }
 0x12d   :  { %11 = sbr.rel (!%p9_p13) target bundleno = 4 (0x4), region = 142 }

// kernel: discriminator_forward.11
= control target key start
LH: loop header
LB: loop body
LE: loop exit
PB: predicated region body
PF: predicated region fallthrough
CT: control target
= control target key end

     0   :  { %s911_s15 = smov 0   ;;  %s913_s16 = smov 0   ;;  %s1086_s0 = inlined_call_operand.vmem [shape: f32[2,256,64], index: 0, kind: input, shape index: {}]   ;;  %s1087_s1 = inlined_call_operand.vmem [shape: f32[32,256], index: 1, kind: input, shape index: {}]   ;;  %s1088_s2 = inlined_call_operand.vmem [shape: f32[32,1], index: 2, kind: input, shape index: {}]   ;;  %s1089_s3 = inlined_call_operand.vmem [shape: f32[2,32,64], index: 3, kind: output, shape index: {0}]   ;;  %s1090_s4 = inlined_call_operand.vmem [shape: f32[2,32,2], index: 4, kind: output, shape index: {1}]  }
   0x1   :  { %s915_s17 = smov 0   ;;  %s917_s18 = smov 0  }
   0x2   :  { %s919_s19 = smov 0   ;;  %s921_s20 = smov 0  }
   0x3   :  { %s923_s21 = smov 0  }
   0x4 LB: > { %s27_s22 = sadd.s32 1, %s872_s19  ;;  %s34_s23 = sadd.s32 1, %s876_s20  ;;  %s880_s21 = sphi %s923_s21, %s15_s21   ;;  %s876_s20 = sphi %s921_s20, %s1096_s20   ;;  %s872_s19 = sphi %s919_s19, %s1095_s19   ;;  %s868_s18 = sphi %s917_s18, %s1094_s18   ;;  %s864_s17 = sphi %s915_s17, %s1093_s17   ;;  %s860_s16 = sphi %s913_s16, %s1092_s16   ;;  %s856_s15 = sphi %s911_s15, %s1091_s15  }
   0x5   : > { %p28_p0 = scmp.ge.s32.totalorder %s27_s22, 2  ;;  %s71_s24 = sadd.s32 1, %s860_s16 }
   0x6   : > { %p78_p1 = scmp.ne.s32.totalorder %s860_s16, %s856_s15  ;;  %p79_p2 = scmp.eq.s32.totalorder %s880_s21, 0 }
   0x7   : > { %s1098_s22 = smov (%p28_p0, %s27_s22), 0  ;;  %s1100_s23 = smov (!%p28_p0, %s34_s23), %s876_s20 }
   0x8   : > { %s68_s25 = ssub.s32 %s872_s19, %s1098_s22  ;;  %p80_p3 = por %p79_p2, %p78_p1 }
   0x9   : > { %p36_p4 = scmp.ge.s32.totalorder %s1100_s23, 2  ;;  %p69_p5 = scmp.eq.s32.totalorder %s68_s25, 0 }
   0xa   : > { %p694_p6 = scmp.ge.s32.totalorder %s880_s21, 4 }
   0xb   : > { %s1102_s23 = smov (%p36_p4, %s1100_s23), 0 }
   0xc   : > { %s960_s26 = scalar_select %p69_p5, %s860_s16, %s71_s24  }
   0xd   : > { %182 = sbr.rel (%p694_p6) target bundleno = 26 (0x1a), region = 20 }
  0x12   : > { %201 = sbr.rel (!%p80_p3) target bundleno = 26 (0x1a), region = 28  ;;  %s203_s27 = sand.u32 (%p80_p3), 1, %s860_s16  }
  0x13   : > { %s696_s28 = sshll.u32 (%p80_p3), %s872_s19, 3  ;;  %s695_s29 = sshll.u32 (%p80_p3), %s203_s27, 5 }
  0x14   : > { %s207_s6 = scalar_lea.vmem (%p80_p3), %s1087_s1, %s696_s28  ;;  %s205_s7 = scalar_lea.vmem (%p80_p3), [#allocation5], %s695_s29 }
  0x15   : > { %v242_v0 = vld [vmem:[%s207_s6] sm:$0xff] (%p80_p3)  ;;  %v244_v1 = vld [vmem:[%s207_s6 + $0x10] sm:$0xff] (%p80_p3) }
  0x16   : > { %v246_v2 = vld [vmem:[%s207_s6 + $0x20] sm:$0xff] (%p80_p3)  ;;  %243 = vst [vmem:[%s205_s7] sm:$0xff] (%p80_p3), %v242_v0  ;;  %v248_v3 = vld [vmem:[%s207_s6 + $0x30] sm:$0xff] (%p80_p3) }
  0x17   : > { %245 = vst [vmem:[%s205_s7 + $0x8] sm:$0xff] %v244_v1 }
  0x18   : > { %247 = vst [vmem:[%s205_s7 + $0x10] sm:$0xff] %v246_v2 }
  0x19   : > { %249 = vst [vmem:[%s205_s7 + $0x18] sm:$0xff] %v248_v3 }
  0x1a PF: > { %p697_p7 = scmp.ge.s32.totalorder %s880_s21, 1  ;;  %p254_p8 = scmp.lt.s32.totalorder %s880_s21, 5 }
  0x1c   : > { %p255_p9 = pnand %p697_p7, %p254_p8 }
  0x1d   : > { %s261_s8 = sand.u32 (!%p255_p9), 1, %s856_s15   ;;  %s699_s9 = sshll.u32 (!%p255_p9), %s864_s17, 4 }
  0x1e   : > { %258 = sbr.rel (%p255_p9) target bundleno = 631 (0x277), region = 66  ;;  %s698_s10 = sshll.u32 (!%p255_p9), %s261_s8, 5 }
  0x1f   : > { %p307_p10 = scmp.lt.s32.totalorder (!%p255_p9), %s868_s18, 1  ;;  %p309_p11 = scmp.lt.s32.totalorder (!%p255_p9), %s699_s9, 31 }
  0x20   : > { %p333_p12 = scmp.eq.s32.totalorder (!%p255_p9), %s864_s17, 1  ;;  %p334_p13 = scmp.eq.s32.totalorder (!%p255_p9), %s864_s17, 0 }
  0x21   : > { %p706_p0 = scmp.ne.s32.totalorder (!%p255_p9), %s864_s17, 0 }
  0x23   : > { %s1104_s18 = smov (!%p307_p10, %s868_s18), 1  ;;  %s1106_s9 = smov (!%p309_p11, %s699_s9), 31 }
  0x24   : > { %s700_s11 = sshll.u32 %s1104_s18, 5  ;;  %s991_s18 = scalar_lea.vmem [#allocation5], %s698_s10 }
  0x25   : > { %s315_s12 = sadd.s32 %s700_s11, %s1106_s9  ;;  %s978_s24 = scalar_lea.vmem %s1089_s3, %s700_s11 }
  0x26   : > { %s701_s25 = sshll.u32 %s315_s12, 3  ;;  %s983_s29 = scalar_lea.vmem %s1090_s4, %s700_s11 }
  0x27   : > { %s988_s5 = scalar_lea.vmem %s1086_s0, %s701_s25  ;;  %337 = sbr.rel (%p706_p0) target bundleno = 49 (0x31), region = 74 }
  0x2c   : > { %vm338_vm0 = vcmask 523264   ;;  %v882_v4 = vmov 0.0  }
  0x2d   : > { %339 = vst.msk [vmem:[#allocation2] sm:$0xff] %vm338_vm0, %v882_v4 }
  0x2e   : > { %340 = vst.msk [vmem:[#allocation2 + $0x8] sm:$0xff] %vm338_vm0, %v882_v4 }
  0x2f   : > { %341 = vst.msk [vmem:[#allocation2 + $0x10] sm:$0xff] %vm338_vm0, %v882_v4 }
  0x30   : > { %342 = vst.msk [vmem:[#allocation2 + $0x18] sm:$0xff] %vm338_vm0, %v882_v4 }
  0x31 PF: > { %346 = sbr.rel (!%p334_p13) target bundleno = 58 (0x3a), region = 78  ;;  %vm347_vm1 = vcmask (%p334_p13), 7168   ;;  %v883_v5 = vmov (%p334_p13), 0.0  }
  0x32   : > { %348 = vst.msk [vmem:[#allocation3] sm:$0xff] (%p334_p13), %vm347_vm1, %v883_v5 }
  0x33   : > { %349 = vst.msk [vmem:[#allocation3 + $0x8] sm:$0xff] (%p334_p13), %vm347_vm1, %v883_v5 }
  0x34   : > { %350 = vst.msk [vmem:[#allocation3 + $0x10] sm:$0xff] (%p334_p13), %vm347_vm1, %v883_v5 }
  0x35   : > { %351 = vst.msk [vmem:[#allocation3 + $0x18] sm:$0xff] (%p334_p13), %vm347_vm1, %v883_v5 }
  0x36   : > { %352 = vst.msk [vmem:[#allocation4] sm:$0xff] %vm347_vm1, %v883_v5 }
  0x37   : > { %353 = vst.msk [vmem:[#allocation4 + $0x8] sm:$0xff] %vm347_vm1, %v883_v5 }
  0x38   : > { %354 = vst.msk [vmem:[#allocation4 + $0x10] sm:$0xff] %vm347_vm1, %v883_v5 }
  0x39   : > { %355 = vst.msk [vmem:[#allocation4 + $0x18] sm:$0xff] %vm347_vm1, %v883_v5 }
  0x3a PF: > { %v379_v6 = vld [vmem:[%s988_s5 + $0x78] sm:$0xff]  ;;  %v378_v7 = vld [vmem:[%s988_s5 + $0x70] sm:$0xff]  ;;  %v377_v8 = vld [vmem:[%s988_s5 + $0x68] sm:$0xff]  ;;  %vm413_vm2 = vcmask 523264   ;;  %p708_p1 = scmp.ne.s32.totalorder %s864_s17, 1 }
  0x3b   : > { %717 = vmatpush.msra.mxu2 %v379_v6  ;;  %718 = vmatpush.msra.mxu3 %v379_v6  ;;  %v376_v9 = vld [vmem:[%s988_s5 + $0x60] sm:$0xff]  ;;  %v375_v10 = vld [vmem:[%s988_s5 + $0x58] sm:$0xff]  ;;  %v374_v11 = vld [vmem:[%s988_s5 + $0x50] sm:$0xff] }
  0x3c   : > { %380 = vmatpush.msra.mxu0 %v379_v6  ;;  %716 = vmatpush.msra.mxu1 %v379_v6  ;;  %v373_v12 = vld [vmem:[%s988_s5 + $0x48] sm:$0xff]  ;;  %v372_v13 = vld [vmem:[%s988_s5 + $0x40] sm:$0xff]  ;;  %v371_v14 = vld [vmem:[%s988_s5 + $0x38] sm:$0xff] }
  0x3d   : > { %720 = vmatpush.msra.mxu2 %v378_v7  ;;  %721 = vmatpush.msra.mxu3 %v378_v7  ;;  %v370_v15 = vld [vmem:[%s988_s5 + $0x30] sm:$0xff]  ;;  %v369_v16 = vld [vmem:[%s988_s5 + $0x28] sm:$0xff]  ;;  %v368_v17 = vld [vmem:[%s988_s5 + $0x20] sm:$0xff] }
  0x3e   : > { %381 = vmatpush.msra.mxu0 %v378_v7  ;;  %719 = vmatpush.msra.mxu1 %v378_v7  ;;  %v367_v18 = vld [vmem:[%s988_s5 + $0x18] sm:$0xff]  ;;  %v366_v19 = vld [vmem:[%s988_s5 + $0x10] sm:$0xff]  ;;  %v365_v20 = vld [vmem:[%s988_s5 + $0x8] sm:$0xff] }
  0x3f   : > { %723 = vmatpush.msra.mxu2 %v377_v8  ;;  %724 = vmatpush.msra.mxu3 %v377_v8  ;;  %v364_v21 = vld [vmem:[%s988_s5] sm:$0xff]  ;;  %v362_v22 = vld [vmem:[%s991_s18 + $0x10] sm:$0xff]  ;;  %v363_v23 = vld [vmem:[%s991_s18 + $0x18] sm:$0xff] }
  0x40   : > { %382 = vmatpush.msra.mxu0 %v377_v8  ;;  %722 = vmatpush.msra.mxu1 %v377_v8  ;;  %v360_v24 = vld [vmem:[%s991_s18] sm:$0xff]  ;;  %v361_v25 = vld [vmem:[%s991_s18 + $0x8] sm:$0xff]  ;;  %v358_v32 = vld [vmem:[#allocation2 + $0x10] sm:$0xff] }
  0x41   : > { %726 = vmatpush.msra.mxu2 %v376_v9  ;;  %727 = vmatpush.msra.mxu3 %v376_v9  ;;  %v356_v26 = vld [vmem:[#allocation2] sm:$0xff]  ;;  %v357_v27 = vld [vmem:[#allocation2 + $0x8] sm:$0xff]  ;;  %v359_v33 = vld [vmem:[#allocation2 + $0x18] sm:$0xff] }
  0x42   : > { %383 = vmatpush.msra.mxu0 %v376_v9  ;;  %725 = vmatpush.msra.mxu1 %v376_v9 }
  0x43   : > { %729 = vmatpush.msra.mxu2 %v375_v10  ;;  %730 = vmatpush.msra.mxu3 %v375_v10 }
  0x44   : > { %384 = vmatpush.msra.mxu0 %v375_v10  ;;  %728 = vmatpush.msra.mxu1 %v375_v10 }
  0x45   : > { %732 = vmatpush.msra.mxu2 %v374_v11  ;;  %733 = vmatpush.msra.mxu3 %v374_v11 }
  0x46   : > { %385 = vmatpush.msra.mxu0 %v374_v11  ;;  %731 = vmatpush.msra.mxu1 %v374_v11 }
  0x47   : > { %735 = vmatpush.msra.mxu2 %v373_v12  ;;  %736 = vmatpush.msra.mxu3 %v373_v12 }
  0x48   : > { %386 = vmatpush.msra.mxu0 %v373_v12  ;;  %734 = vmatpush.msra.mxu1 %v373_v12 }
  0x49   : > { %738 = vmatpush.msra.mxu2 %v372_v13  ;;  %739 = vmatpush.msra.mxu3 %v372_v13 }
  0x4a   : > { %387 = vmatpush.msra.mxu0 %v372_v13  ;;  %737 = vmatpush.msra.mxu1 %v372_v13 }
  0x4b   : > { %741 = vmatpush.msra.mxu2 %v371_v14  ;;  %742 = vmatpush.msra.mxu3 %v371_v14 }
  0x4c   : > { %388 = vmatpush.msra.mxu0 %v371_v14  ;;  %740 = vmatpush.msra.mxu1 %v371_v14 }
  0x4d   : > { %744 = vmatpush.msra.mxu2 %v370_v15  ;;  %745 = vmatpush.msra.mxu3 %v370_v15 }
  0x4e   : > { %389 = vmatpush.msra.mxu0 %v370_v15  ;;  %743 = vmatpush.msra.mxu1 %v370_v15 }
  0x4f   : > { %747 = vmatpush.msra.mxu2 %v369_v16  ;;  %748 = vmatpush.msra.mxu3 %v369_v16 }
  0x50   : > { %390 = vmatpush.msra.mxu0 %v369_v16  ;;  %746 = vmatpush.msra.mxu1 %v369_v16 }
  0x51   : > { %750 = vmatpush.msra.mxu2 %v368_v17  ;;  %751 = vmatpush.msra.mxu3 %v368_v17 }
  0x52   : > { %391 = vmatpush.msra.mxu0 %v368_v17  ;;  %749 = vmatpush.msra.mxu1 %v368_v17 }
  0x53   : > { %753 = vmatpush.msra.mxu2 %v367_v18  ;;  %754 = vmatpush.msra.mxu3 %v367_v18 }
  0x54   : > { %392 = vmatpush.msra.mxu0 %v367_v18  ;;  %752 = vmatpush.msra.mxu1 %v367_v18 }
  0x55   : > { %756 = vmatpush.msra.mxu2 %v366_v19  ;;  %757 = vmatpush.msra.mxu3 %v366_v19 }
  0x56   : > { %393 = vmatpush.msra.mxu0 %v366_v19  ;;  %755 = vmatpush.msra.mxu1 %v366_v19 }
  0x57   : > { %759 = vmatpush.msra.mxu2 %v365_v20  ;;  %760 = vmatpush.msra.mxu3 %v365_v20 }
  0x58   : > { %394 = vmatpush.msra.mxu0 %v365_v20  ;;  %758 = vmatpush.msra.mxu1 %v365_v20 }
  0x59   : > { %762 = vmatpush.msra.mxu2 %v364_v21  ;;  %763 = vmatpush.msra.mxu3 %v364_v21 }
  0x5a   : > { %402 = vmatmul.f32.vlgmr.msra.gmra.mxu2 %v362_v22  ;;  %405 = vmatmul.f32.vlgmr.msra.gmra.mxu3 %v363_v23 }
  0x5b   : > { %395 = vmatpush.msra.mxu0 %v364_v21  ;;  %761 = vmatpush.msra.mxu1 %v364_v21 }
  0x5c   : > { %396 = vmatmul.f32.vlgmr.msra.gmra.mxu0 %v360_v24  ;;  %399 = vmatmul.f32.vlgmr.msra.gmra.mxu1 %v361_v25 }
  0xd9   : > { %v397_v28 = vpop.f32.mrf.mxu0  ;;  %v400_v29 = vpop.f32.mrf.mxu1 }
  0xda   : > { %v409_v30 = vadd.f32 %v397_v28, %v356_v26  ;;  %v410_v31 = vadd.f32 %v400_v29, %v357_v27 }
  0xdc   : > { %414 = vst.msk [vmem:[#allocation2] sm:$0xff] %vm413_vm2, %v409_v30 }
  0xdd   : > { %415 = vst.msk [vmem:[#allocation2 + $0x8] sm:$0xff] %vm413_vm2, %v410_v31  ;;  %v403_v34 = vpop.f32.mrf.mxu2  ;;  %v406_v35 = vpop.f32.mrf.mxu3  ;;  %420 = sbr.rel (%p708_p1) target bundleno = 505 (0x1f9), region = 82 }
  0xde   : > { %v411_v36 = vadd.f32 %v403_v34, %v358_v32  ;;  %v412_v37 = vadd.f32 %v406_v35, %v359_v33 }
  0xe0   : > { %416 = vst.msk [vmem:[#allocation2 + $0x10] sm:$0xff] %vm413_vm2, %v411_v36 }
  0xe1   : > { %417 = vst.msk [vmem:[#allocation2 + $0x18] sm:$0xff] %vm413_vm2, %v412_v37 }
  0xe2   : > { %v425_v38 = vld [vmem:[%s1088_s2] sm:$0xff]  ;;  %v427_v39 = vld [vmem:[%s1088_s2 + $0x10] sm:$0xff]  ;;  %v884_v40 = vmov 0   ;;  %v426_v41 = vld [vmem:[%s1088_s2 + $0x8] sm:$0xff]  ;;  %vm473_vm3 = vcmask 7168  }
  0xe3   : > { %824 = vset.pattern.permute.xlu0 %v884_v40  ;;  %825 = vset.pattern.permute.xlu1 %v884_v40  ;;  %v428_v42 = vld [vmem:[%s1088_s2 + $0x18] sm:$0xff]  ;;  %v421_v43 = vld [vmem:[#allocation2] sm:$0xff]  ;;  %v455_v4 = vld [vmem:[#allocation3 + $0x10] sm:$0xff] }
  0xe4   : > { %431 = vperm.xlu0 %824, %v425_v38   ;;  %441 = vperm.xlu1 %825, %v427_v39   ;;  %v422_v51 = vld [vmem:[#allocation2 + $0x8] sm:$0xff]  ;;  %v453_v3 = vld [vmem:[#allocation3] sm:$0xff]  ;;  %v456_v10 = vld [vmem:[#allocation3 + $0x18] sm:$0xff] }
  0xe5   : > { %v454_v9 = vld [vmem:[#allocation3 + $0x8] sm:$0xff]  ;;  %v478_v15 = vld [vmem:[#allocation4] sm:$0xff]  ;;  %v480_v21 = vld [vmem:[#allocation4 + $0x10] sm:$0xff] }
  0xe6   : > { %v479_v18 = vld [vmem:[#allocation4 + $0x8] sm:$0xff]  ;;  %v481_v24 = vld [vmem:[#allocation4 + $0x18] sm:$0xff] }
  0xe7   : > { %v423_v44 = vld [vmem:[#allocation2 + $0x10] sm:$0xff] }
  0xe8   : > { %v424_v52 = vld [vmem:[#allocation2 + $0x18] sm:$0xff] }
  0xec   : > { %436 = vperm.xlu0 %824, %v426_v41   ;;  %446 = vperm.xlu1 %825, %v428_v42  }
 0x156   : > { %v432_v45 = vpop.permute.xlu0 %431  ;;  %v442_v46 = vpop.permute.xlu1 %441 }
 0x157   : > { %v449_v47 = vadd.f32 %v432_v45, %v421_v43  ;;  %v451_v48 = vadd.f32 %v442_v46, %v423_v44 }
 0x159   : > { %506 = vst.msk [vmem:[%s978_s24] sm:$0xff] %vm413_vm2, %v449_v47  ;;  %v457_v49 = vsel %vm413_vm2, %v449_v47, 0.0  ;;  %v463_v50 = vsel %vm413_vm2, %v451_v48, 0.0  ;;  %v482_v59 = vmul.f32 %v449_v47, %v449_v47  ;;  %v484_v63 = vmul.f32 %v451_v48, %v451_v48 }
 0x15a   : > { %458 = vadd.xlane.f32.xlu2 %v457_v49  ;;  %508 = vst.msk [vmem:[%s978_s24 + $0x10] sm:$0xff] %vm413_vm2, %v451_v48  ;;  %464 = vadd.xlane.f32.xlu0 %v463_v50 }
 0x15b   : > { %v486_v60 = vsel %vm413_vm2, %v482_v59, 0.0  ;;  %v492_v0 = vsel %vm413_vm2, %v484_v63, 0.0 }
 0x15e   : > { %v437_v53 = vpop.permute.xlu0 %436  ;;  %v447_v54 = vpop.permute.xlu1 %446 }
 0x15f   : > { %v450_v55 = vadd.f32 %v437_v53, %v422_v51  ;;  %v452_v56 = vadd.f32 %v447_v54, %v424_v52 }
 0x161   : > { %507 = vst.msk [vmem:[%s978_s24 + $0x8] sm:$0xff] %vm413_vm2, %v450_v55  ;;  %v460_v57 = vsel %vm413_vm2, %v450_v55, 0.0  ;;  %v466_v58 = vsel %vm413_vm2, %v452_v56, 0.0  ;;  %v483_v61 = vmul.f32 %v450_v55, %v450_v55  ;;  %v485_v1 = vmul.f32 %v452_v56, %v452_v56 }
 0x162   : > { %461 = vadd.xlane.f32.xlu2 %v460_v57  ;;  %509 = vst.msk [vmem:[%s978_s24 + $0x18] sm:$0xff] %vm413_vm2, %v452_v56  ;;  %467 = vadd.xlane.f32.xlu1 %v466_v58 }
 0x163   : > { %v489_v62 = vsel %vm413_vm2, %v483_v61, 0.0  ;;  %v495_v2 = vsel %vm413_vm2, %v485_v1, 0.0 }
 0x16a   : > { %487 = vadd.xlane.f32.xlu2 %v486_v60 }
 0x172   : > { %490 = vadd.xlane.f32.xlu2 %v489_v62 }
 0x17a   : > { %493 = vadd.xlane.f32.xlu2 %v492_v0 }
 0x182   : > { %496 = vadd.xlane.f32.xlu2 %v495_v2 }
 0x1cd   : > { %v459_v5 = vpop.xlane.xlu2 %458  ;;  %v465_v6 = vpop.xlane.xlu0 %464 }
 0x1ce   : > { %v469_v7 = vadd.f32 %v459_v5, %v453_v3  ;;  %v471_v8 = vadd.f32 %v465_v6, %v455_v4 }
 0x1d0   : > { %474 = vst.msk [vmem:[#allocation3] sm:$0xff] %vm473_vm3, %v469_v7 }
 0x1d1   : > { %476 = vst.msk [vmem:[#allocation3 + $0x10] sm:$0xff] %vm473_vm3, %v471_v8 }
 0x1d5   : > { %v462_v11 = vpop.xlane.xlu2 %461  ;;  %v468_v12 = vpop.xlane.xlu1 %467 }
 0x1d6   : > { %v470_v13 = vadd.f32 %v462_v11, %v454_v9  ;;  %v472_v14 = vadd.f32 %v468_v12, %v456_v10 }
 0x1d8   : > { %475 = vst.msk [vmem:[#allocation3 + $0x8] sm:$0xff] %vm473_vm3, %v470_v13 }
 0x1d9   : > { %477 = vst.msk [vmem:[#allocation3 + $0x18] sm:$0xff] %vm473_vm3, %v472_v14 }
 0x1dd   : > { %v488_v16 = vpop.xlane.xlu2 %487 }
 0x1de   : > { %v498_v17 = vadd.f32 %v488_v16, %v478_v15 }
 0x1e0   : > { %502 = vst.msk [vmem:[#allocation4] sm:$0xff] %vm473_vm3, %v498_v17 }
 0x1e5   : > { %v491_v19 = vpop.xlane.xlu2 %490 }
 0x1e6   : > { %v499_v20 = vadd.f32 %v491_v19, %v479_v18 }
 0x1e8   : > { %503 = vst.msk [vmem:[#allocation4 + $0x8] sm:$0xff] %vm473_vm3, %v499_v20 }
 0x1ed   : > { %v494_v22 = vpop.xlane.xlu2 %493 }
 0x1ee   : > { %v500_v23 = vadd.f32 %v494_v22, %v480_v21 }
 0x1f0   : > { %504 = vst.msk [vmem:[#allocation4 + $0x10] sm:$0xff] %vm473_vm3, %v500_v23 }
 0x1f5   : > { %v497_v25 = vpop.xlane.xlu2 %496 }
 0x1f6   : > { %v501_v26 = vadd.f32 %v497_v25, %v481_v24 }
 0x1f8   : > { %505 = vst.msk [vmem:[#allocation4 + $0x18] sm:$0xff] %vm473_vm3, %v501_v26 }
 0x1f9 PF: > { %513 = sbr.rel (!%p333_p12) target bundleno = 631 (0x277), region = 86  ;;  %v525_v27 = vld [vmem:[#allocation4 + $0x10] sm:$0xff] (%p333_p12)  ;;  %v523_v28 = vld [vmem:[#allocation4] sm:$0xff] (%p333_p12)  ;;  %s885_s14 = smov (%p333_p12), 1   ;;  %v524_v30 = vld [vmem:[#allocation4 + $0x8] sm:$0xff] (%p333_p12)  ;;  %vm518_vm4 = vcmask (%p333_p12), 7168  }
 0x1fa   : > { %535 = vrot.lane.b32.xlu1 (%p333_p12), %v525_v27, %s885_s14  ;;  %531 = vrot.lane.b32.xlu0 (%p333_p12), %v523_v28, %s885_s14  ;;  %v516_v31 = vld [vmem:[#allocation3 + $0x10] sm:$0xff] (%p333_p12)  ;;  %v514_v32 = vld [vmem:[#allocation3] sm:$0xff] (%p333_p12)  ;;  %v517_v33 = vld [vmem:[#allocation3 + $0x18] sm:$0xff] (%p333_p12)  ;;  %vm543_vm5 = vcmask (%p333_p12), 15368  }
 0x1fb   : > { %521 = vst.msk [vmem:[%s983_s29 + $0x10] sm:$0xff] (%p333_p12), %vm518_vm4, %v516_v31  ;;  %v515_v34 = vld [vmem:[#allocation3 + $0x8] sm:$0xff] (%p333_p12) }
 0x1fc   : > { %519 = vst.msk [vmem:[%s983_s29] sm:$0xff] (%p333_p12), %vm518_vm4, %v514_v32 }
 0x1fd   : > { %522 = vst.msk [vmem:[%s983_s29 + $0x18] sm:$0xff] (%p333_p12), %vm518_vm4, %v517_v33 }
 0x1fe   : > { %520 = vst.msk [vmem:[%s983_s29 + $0x8] sm:$0xff] %vm518_vm4, %v515_v34 }
 0x1ff   : > { %v526_v29 = vld [vmem:[#allocation4 + $0x18] sm:$0xff] }
 0x202   : > { %537 = vrot.lane.b32.xlu1 %v526_v29, %s885_s14  ;;  %533 = vrot.lane.b32.xlu0 %v524_v30, %s885_s14 }
 0x26c   : > { %v536_v35 = vpop.permute.xlu1 %535  ;;  %v532_v36 = vpop.permute.xlu0 %531 }
 0x26d   : > { %546 = vst.msk [vmem:[%s983_s29 + $0x10] sm:$0xff] %vm543_vm5, %v536_v35 }
 0x26e   : > { %544 = vst.msk [vmem:[%s983_s29] sm:$0xff] %vm543_vm5, %v532_v36 }
 0x274   : > { %v538_v37 = vpop.permute.xlu1 %537  ;;  %v534_v38 = vpop.permute.xlu0 %533 }
 0x275   : > { %547 = vst.msk [vmem:[%s983_s29 + $0x18] sm:$0xff] %vm543_vm5, %v538_v37 }
 0x276   : > { %545 = vst.msk [vmem:[%s983_s29 + $0x8] sm:$0xff] %vm543_vm5, %v534_v38 }
 0x277 PF: > { %s15_s21 = sadd.s32 1, %s880_s21   ;;  %s1091_s15 = smov %s860_s16 }
 0x278   : > { %p12_p2 = scmp.ge.s32.totalorder %s15_s21, 6   ;;  %s1092_s16 = smov %s960_s26 }
 0x279   : > { %s1093_s17 = smov %s872_s19  ;;  %s1094_s18 = smov %s876_s20 }
 0x27a   : > { %s1095_s19 = smov %s1098_s22  ;;  %s1096_s20 = smov %s1102_s23 }
 0x27b   :  { %14 = sbr.rel (!%p12_p2) target bundleno = 4 (0x4), region = 136 }

// kernel: discriminator_forward.12
= control target key start
LH: loop header
LB: loop body
LE: loop exit
PB: predicated region body
PF: predicated region fallthrough
CT: control target
= control target key end

     0   :  { %s538_s9 = smov 0   ;;  %s540_s10 = smov 0   ;;  %s583_s0 = inlined_call_operand.vmem [shape: f32[2,32,2], index: 0, kind: input, shape index: {}]   ;;  %s584_s1 = inlined_call_operand.vmem [shape: f32[2,32,64], index: 1, kind: input, shape index: {}, may-alias: {1,2}]   ;;  %s585_s2 = inlined_call_operand.vmem [shape: f32[2,32,64], index: 2, kind: output, shape index: {}, may-alias: {1,2}]  }
   0x1   :  { %s542_s11 = smov 0  }
   0x2 LB: > { %s24_s12 = sadd.s32 1, %s514_s10  ;;  %p443_p0 = scmp.ge.s32.totalorder %s518_s11, 1  ;;  %s518_s11 = sphi %s542_s11, %s12_s11   ;;  %s514_s10 = sphi %s540_s10, %s587_s10   ;;  %s510_s9 = sphi %s538_s9, %s586_s9  }
   0x3   : > { %p26_p1 = scmp.ge.s32.totalorder %s24_s12, 2  ;;  %p141_p2 = scmp.lt.s32.totalorder %s518_s11, 3 }
   0x5   : > { %s589_s12 = smov (%p26_p1, %s24_s12), 0  ;;  %p142_p3 = pnand %p443_p0, %p141_p2 }
   0x6   : > { %p174_p4 = scmp.lt.s32.totalorder (!%p142_p3), %s510_s9, 1  ;;  %s520_s17 = smov (!%p142_p3), 1  }
   0x7   : > { %145 = sbr.rel (%p142_p3) target bundleno = 289 (0x121), region = 28 }
   0xc   : > { %s591_s9 = smov (!%p174_p4, %s510_s9), 1  ;;  %v521_v12 = vmov 0   ;;  %v522_v13 = vmov 1   ;;  %vm339_vm13 = vcmask 523264  }
   0xd   : > { %s556_s13 = sshll.u32 %s591_s9, 5  ;;  %483 = vset.pattern.permute.xlu0 %v521_v12  ;;  %482 = vset.pattern.permute.xlu2 %v521_v12 }
   0xe   : > { %s178_s16 = scalar_lea.vmem %s583_s0, %s556_s13  ;;  %484 = vset.pattern.permute.xlu1 %v521_v12  ;;  %s186_s20 = scalar_lea.vmem %s584_s1, %s556_s13 }
   0xf   : > { %v197_v0 = vld [vmem:[%s178_s16 + $0x10] sm:$0xff]  ;;  %v195_v1 = vld [vmem:[%s178_s16] sm:$0xff]  ;;  %v198_v4 = vld [vmem:[%s178_s16 + $0x18] sm:$0xff]  ;;  %s194_s23 = scalar_lea.vmem %s585_s2, %s556_s13 }
  0x10   : > { %v201_v2 = vmul.f32 0.015625, %v197_v0  ;;  %v199_v3 = vmul.f32 0.015625, %v195_v1  ;;  %v196_v5 = vld [vmem:[%s178_s16 + $0x8] sm:$0xff]  ;;  %v202_v8 = vmul.f32 0.015625, %v198_v4  ;;  %v231_v60 = vld [vmem:[%s186_s20] sm:$0xff]  ;;  %v233_v0 = vld [vmem:[%s186_s20 + $0x10] sm:$0xff] }
  0x11   : > { %v200_v9 = vmul.f32 0.015625, %v196_v5  ;;  %v234_v4 = vld [vmem:[%s186_s20 + $0x18] sm:$0xff] }
  0x12   : > { %v205_v6 = vmul.f32 %v201_v2, %v201_v2  ;;  %v203_v7 = vmul.f32 %v199_v3, %v199_v3  ;;  %v206_v10 = vmul.f32 %v202_v8, %v202_v8  ;;  %237 = vperm.xlu2 %482, %v199_v3  }
  0x13   : > { %v204_v11 = vmul.f32 %v200_v9, %v200_v9 }
  0x14   : > { %215 = vrot.lane.b32.xlu1 %v205_v6, %s520_s17  ;;  %211 = vrot.lane.b32.xlu0 %v203_v7, %s520_s17 }
  0x1a   : > { %242 = vperm.xlu2 %482, %v200_v9  }
  0x1c   : > { %217 = vrot.lane.b32.xlu1 %v206_v10, %s520_s17  ;;  %213 = vrot.lane.b32.xlu0 %v204_v11, %s520_s17 }
  0x22   : > { %485 = vset.pattern.permute.xlu2 %v522_v13 }
  0x24   : > { %247 = vperm.xlu0 %483, %v201_v2   ;;  %252 = vperm.xlu1 %484, %v202_v8  }
  0x2c   : > { %486 = vset.pattern.permute.xlu1 %v522_v13  ;;  %487 = vset.pattern.permute.xlu0 %v522_v13 }
  0x6c   : > { %v238_v58 = vpop.permute.xlu2 %237 }
  0x6d   : > { %v255_v61 = vsub.f32 %v231_v60, %v238_v58 }
  0x74   : > { %v243_v59 = vpop.permute.xlu2 %242 }
  0x86   : > { %v216_v14 = vpop.permute.xlu1 %215  ;;  %v212_v15 = vpop.permute.xlu0 %211 }
  0x87   : > { %v225_v16 = vsub.f32 %v201_v2, %v216_v14  ;;  %v223_v17 = vsub.f32 %v199_v3, %v212_v15  ;;  %v232_v2 = vld [vmem:[%s186_s20 + $0x8] sm:$0xff] }
  0x88   : > { %v256_v13 = vsub.f32 %v232_v2, %v243_v59 }
  0x89   : > { %v229_v18 = vmax.f32 %v225_v16, 0.0  ;;  %v227_v19 = vmax.f32 %v223_v17, 0.0 }
  0x8b   : > { %v261_v20 = vadd.f32 1e-05, %v229_v18  ;;  %v259_v21 = vadd.f32 1e-05, %v227_v19 }
  0x8d   : > { %488 = vrsqrt.f32 %v261_v20  ;;  %vm269_vm1 = vweird.f32 %v259_v21  ;;  %vm289_vm5 = vweird.f32 %v261_v20 }
  0x8e   : > { %490 = vrsqrt.f32 %v259_v21  ;;  %v218_v22 = vpop.permute.xlu1 %217  ;;  %v214_v23 = vpop.permute.xlu0 %213 }
  0x8f   : > { %v226_v24 = vsub.f32 %v202_v8, %v218_v22  ;;  %v224_v25 = vsub.f32 %v200_v9, %v214_v23 }
  0x91   : > { %v230_v26 = vmax.f32 %v226_v24, 0.0  ;;  %v228_v27 = vmax.f32 %v224_v25, 0.0 }
  0x93   : > { %v489_v28 = vpop.eup %488  ;;  %v262_v29 = vadd.f32 1e-05, %v230_v26  ;;  %v260_v30 = vadd.f32 1e-05, %v228_v27 }
  0x94   : > { %v491_v31 = vpop.eup %490  ;;  %v284_v32 = vmul.f32 %v489_v28, %v261_v20  ;;  %vm290_vm3 = vweird.f32 %v489_v28 }
  0x95   : > { %v264_v33 = vmul.f32 %v491_v31, %v259_v21  ;;  %492 = vrsqrt.f32 %v262_v29  ;;  %vm270_vm0 = vweird.f32 %v491_v31  ;;  %vm299_vm7 = vweird.f32 %v262_v29  ;;  %vm291_vm8 = vmor %vm289_vm5, %vm290_vm3 }
  0x96   : > { %494 = vrsqrt.f32 %v260_v30  ;;  %v285_v34 = vmul.f32 %v489_v28, %v284_v32  ;;  %vm271_vm2 = vmor %vm269_vm1, %vm270_vm0  ;;  %vm279_vm10 = vweird.f32 %v260_v30  ;;  %v248_v1 = vpop.permute.xlu0 %247  ;;  %v253_v11 = vpop.permute.xlu1 %252 }
  0x97   : > { %v265_v35 = vmul.f32 %v491_v31, %v264_v33  ;;  %v257_v6 = vsub.f32 %v233_v0, %v248_v1  ;;  %v258_v12 = vsub.f32 %v234_v4, %v253_v11 }
  0x98   : > { %v286_v38 = vmul.f32 0.5, %v285_v34 }
  0x99   : > { %v266_v36 = vmul.f32 0.5, %v265_v35 }
  0x9a   : > { %v287_v47 = vsub.f32 1.5, %v286_v38 }
  0x9b   : > { %v493_v37 = vpop.eup %492  ;;  %v267_v39 = vsub.f32 1.5, %v266_v36 }
  0x9c   : > { %v495_v40 = vpop.eup %494  ;;  %v294_v41 = vmul.f32 %v493_v37, %v262_v29  ;;  %vm300_vm4 = vweird.f32 %v493_v37  ;;  %v288_v51 = vmul.f32 %v489_v28, %v287_v47 }
  0x9d   : > { %v274_v42 = vmul.f32 %v495_v40, %v260_v30  ;;  %v268_v43 = vmul.f32 %v491_v31, %v267_v39  ;;  %vm280_vm6 = vweird.f32 %v495_v40  ;;  %vm301_vm9 = vmor %vm299_vm7, %vm300_vm4 }
  0x9e   : > { %v295_v44 = vmul.f32 %v493_v37, %v294_v41  ;;  %vm281_vm11 = vmor %vm279_vm10, %vm280_vm6  ;;  %v292_v56 = vsel %vm291_vm8, %v489_v28, %v288_v51 }
  0x9f   : > { %v275_v45 = vmul.f32 %v495_v40, %v274_v42  ;;  %v272_v46 = vsel %vm271_vm2, %v491_v31, %v268_v43 }
  0xa0   : > { %v296_v48 = vmul.f32 0.5, %v295_v44  ;;  %305 = vperm.xlu2 %485, %v272_v46  }
  0xa1   : > { %v276_v49 = vmul.f32 0.5, %v275_v45 }
  0xa2   : > { %v297_v50 = vsub.f32 1.5, %v296_v48 }
  0xa3   : > { %v277_v52 = vsub.f32 1.5, %v276_v49 }
  0xa4   : > { %v298_v53 = vmul.f32 %v493_v37, %v297_v50 }
  0xa5   : > { %v278_v54 = vmul.f32 %v495_v40, %v277_v52 }
  0xa6   : > { %v302_v55 = vsel %vm301_vm9, %v493_v37, %v298_v53 }
  0xa7   : > { %320 = vperm.xlu0 %487, %v302_v55   ;;  %v282_v57 = vsel %vm281_vm11, %v495_v40, %v278_v54 }
  0xa8   : > { %315 = vperm.xlu2 %485, %v292_v56   ;;  %310 = vperm.xlu1 %486, %v282_v57  }
  0xfa   : > { %v306_v62 = vpop.permute.xlu2 %305 }
  0xfb   : > { %v323_v63 = vmul.f32 %v306_v62, %v255_v61 }
  0xfd   : > { %vm327_vm12 = vcmp.gt.f32.partialorder %v323_v63, 0.0  ;;  %v331_v3 = vmul.f32 0.2, %v323_v63 }
  0xff   : > { %v335_v5 = vsel %vm327_vm12, %v323_v63, %v331_v3 }
 0x100   : > { %340 = vst.msk [vmem:[%s194_s23] sm:$0xff] %vm339_vm13, %v335_v5 }
 0x102   : > { %v316_v7 = vpop.permute.xlu2 %315 }
 0x103   : > { %v325_v8 = vmul.f32 %v316_v7, %v257_v6 }
 0x105   : > { %vm329_vm14 = vcmp.gt.f32.partialorder %v325_v8, 0.0  ;;  %v333_v9 = vmul.f32 0.2, %v325_v8 }
 0x107   : > { %v337_v10 = vsel %vm329_vm14, %v325_v8, %v333_v9 }
 0x108   : > { %342 = vst.msk [vmem:[%s194_s23 + $0x10] sm:$0xff] %vm339_vm13, %v337_v10 }
 0x119   : > { %v321_v14 = vpop.permute.xlu0 %320 }
 0x11a   : > { %v311_v15 = vpop.permute.xlu1 %310  ;;  %v326_v16 = vmul.f32 %v321_v14, %v258_v12 }
 0x11b   : > { %v324_v17 = vmul.f32 %v311_v15, %v256_v13 }
 0x11c   : > { %vm330_vm15 = vcmp.gt.f32.partialorder %v326_v16, 0.0  ;;  %v334_v18 = vmul.f32 0.2, %v326_v16 }
 0x11d   : > { %vm328_vm0 = vcmp.gt.f32.partialorder %v324_v17, 0.0  ;;  %v332_v19 = vmul.f32 0.2, %v324_v17 }
 0x11e   : > { %v338_v20 = vsel %vm330_vm15, %v326_v16, %v334_v18 }
 0x11f   : > { %v336_v21 = vsel %vm328_vm0, %v324_v17, %v332_v19  ;;  %343 = vst.msk [vmem:[%s194_s23 + $0x18] sm:$0xff] %vm339_vm13, %v338_v20 }
 0x120   : > { %341 = vst.msk [vmem:[%s194_s23 + $0x8] sm:$0xff] %vm339_vm13, %v336_v21 }
 0x121 PF: > { %s12_s11 = sadd.s32 1, %s518_s11   ;;  %s586_s9 = smov %s514_s10 }
 0x122   : > { %p9_p5 = scmp.ge.s32.totalorder %s12_s11, 4   ;;  %s587_s10 = smov %s589_s12 }
 0x124   :  { %11 = sbr.rel (!%p9_p5) target bundleno = 2 (0x2), region = 61 }

// kernel: discriminator_forward.13
= control target key start
LH: loop header
LB: loop body
LE: loop exit
PB: predicated region body
PF: predicated region fallthrough
CT: control target
= control target key end

     0   :  { %s1088_s15 = smov 0   ;;  %s1090_s16 = smov 0   ;;  %s1349_s0 = inlined_call_operand.vmem [shape: f32[2,512,49], index: 0, kind: input, shape index: {}]   ;;  %s1350_s1 = inlined_call_operand.vmem [shape: f32[64,512], index: 1, kind: input, shape index: {}]   ;;  %s1351_s2 = inlined_call_operand.vmem [shape: f32[64,1], index: 2, kind: input, shape index: {}]   ;;  %s1352_s3 = inlined_call_operand.vmem [shape: f32[2,64,49], index: 3, kind: output, shape index: {0}]   ;;  %s1353_s4 = inlined_call_operand.vmem [shape: f32[2,64,2], index: 4, kind: output, shape index: {1}]  }
   0x1   :  { %s1092_s17 = smov 0   ;;  %s1094_s18 = smov 0  }
   0x2   :  { %s1096_s19 = smov 0   ;;  %s1098_s20 = smov 0  }
   0x3   :  { %s1100_s21 = smov 0  }
   0x4 LB: > { %s27_s22 = sadd.s32 1, %s1049_s19  ;;  %s34_s23 = sadd.s32 1, %s1053_s20  ;;  %s1057_s21 = sphi %s1100_s21, %s15_s21   ;;  %s1053_s20 = sphi %s1098_s20, %s1359_s20   ;;  %s1049_s19 = sphi %s1096_s19, %s1358_s19   ;;  %s1045_s18 = sphi %s1094_s18, %s1357_s18   ;;  %s1041_s17 = sphi %s1092_s17, %s1356_s17   ;;  %s1037_s16 = sphi %s1090_s16, %s1355_s16   ;;  %s1033_s15 = sphi %s1088_s15, %s1354_s15  }
   0x5   : > { %p28_p0 = scmp.ge.s32.totalorder %s27_s22, 4  ;;  %s71_s24 = sadd.s32 1, %s1037_s16 }
   0x6   : > { %p78_p1 = scmp.ne.s32.totalorder %s1037_s16, %s1033_s15  ;;  %p79_p2 = scmp.eq.s32.totalorder %s1057_s21, 0 }
   0x7   : > { %s1361_s22 = smov (%p28_p0, %s27_s22), 0  ;;  %s1363_s23 = smov (!%p28_p0, %s34_s23), %s1053_s20 }
   0x8   : > { %s68_s25 = ssub.s32 %s1049_s19, %s1361_s22  ;;  %p80_p3 = por %p79_p2, %p78_p1 }
   0x9   : > { %p36_p4 = scmp.ge.s32.totalorder %s1363_s23, 2  ;;  %p69_p5 = scmp.eq.s32.totalorder %s68_s25, 0 }
   0xa   : > { %p870_p6 = scmp.ge.s32.totalorder %s1057_s21, 8 }
   0xb   : > { %s1365_s23 = smov (%p36_p4, %s1363_s23), 0 }
   0xc   : > { %s1137_s26 = scalar_select %p69_p5, %s1037_s16, %s71_s24  }
   0xd   : > { %182 = sbr.rel (%p870_p6) target bundleno = 30 (0x1e), region = 20 }
  0x12   : > { %201 = sbr.rel (!%p80_p3) target bundleno = 30 (0x1e), region = 28  ;;  %s203_s27 = sand.u32 (%p80_p3), 1, %s1037_s16  }
  0x13   : > { %s872_s28 = sshll.u32 (%p80_p3), %s1049_s19, 3  ;;  %s871_s29 = sshll.u32 (%p80_p3), %s203_s27, 6 }
  0x14   : > { %s207_s6 = scalar_lea.vmem (%p80_p3), %s1350_s1, %s872_s28  ;;  %s205_s7 = scalar_lea.vmem (%p80_p3), [#allocation5], %s871_s29 }
  0x15   : > { %v250_v0 = vld [vmem:[%s207_s6] sm:$0xff] (%p80_p3) }
  0x16   : > { %v252_v1 = vld [vmem:[%s207_s6 + $0x20] sm:$0xff] (%p80_p3)  ;;  %251 = vst [vmem:[%s205_s7] sm:$0xff] (%p80_p3), %v250_v0 }
  0x17   : > { %v254_v2 = vld [vmem:[%s207_s6 + $0x40] sm:$0xff]  ;;  %253 = vst [vmem:[%s205_s7 + $0x8] sm:$0xff] %v252_v1 }
  0x18   : > { %v256_v3 = vld [vmem:[%s207_s6 + $0x60] sm:$0xff]  ;;  %255 = vst [vmem:[%s205_s7 + $0x10] sm:$0xff] %v254_v2 }
  0x19   : > { %v258_v4 = vld [vmem:[%s207_s6 + $0x80] sm:$0xff]  ;;  %257 = vst [vmem:[%s205_s7 + $0x18] sm:$0xff] %v256_v3 }
  0x1a   : > { %v260_v5 = vld [vmem:[%s207_s6 + $0xa0] sm:$0xff]  ;;  %259 = vst [vmem:[%s205_s7 + $0x20] sm:$0xff] %v258_v4 }
  0x1b   : > { %v262_v6 = vld [vmem:[%s207_s6 + $0xc0] sm:$0xff]  ;;  %261 = vst [vmem:[%s205_s7 + $0x28] sm:$0xff] %v260_v5 }
  0x1c   : > { %v264_v7 = vld [vmem:[%s207_s6 + $0xe0] sm:$0xff]  ;;  %263 = vst [vmem:[%s205_s7 + $0x30] sm:$0xff] %v262_v6 }
  0x1d   : > { %265 = vst [vmem:[%s205_s7 + $0x38] sm:$0xff] %v264_v7 }
  0x1e PF: > { %p873_p7 = scmp.ge.s32.totalorder %s1057_s21, 1  ;;  %p270_p8 = scmp.lt.s32.totalorder %s1057_s21, 9 }
  0x20   : > { %p271_p9 = pnand %p873_p7, %p270_p8 }
  0x21   : > { %s277_s8 = sand.u32 (!%p271_p9), 1, %s1033_s15   ;;  %s875_s9 = sshll.u32 (!%p271_p9), %s1041_s17, 4 }
  0x22   : > { %274 = sbr.rel (%p271_p9) target bundleno = 665 (0x299), region = 66  ;;  %s874_s10 = sshll.u32 (!%p271_p9), %s277_s8, 6 }
  0x23   : > { %p323_p10 = scmp.lt.s32.totalorder (!%p271_p9), %s1045_s18, 1  ;;  %p325_p11 = scmp.lt.s32.totalorder (!%p271_p9), %s875_s9, 63 }
  0x24   : > { %p349_p12 = scmp.eq.s32.totalorder (!%p271_p9), %s1041_s17, 3  ;;  %p350_p13 = scmp.eq.s32.totalorder (!%p271_p9), %s1041_s17, 0 }
  0x25   : > { %p882_p0 = scmp.ne.s32.totalorder (!%p271_p9), %s1041_s17, 0 }
  0x27   : > { %s1367_s18 = smov (!%p323_p10, %s1045_s18), 1  ;;  %s1369_s9 = smov (!%p325_p11, %s875_s9), 63 }
  0x28   : > { %s876_s11 = sshll.u32 %s1367_s18, 6  ;;  %s1168_s18 = scalar_lea.vmem [#allocation5], %s874_s10 }
  0x29   : > { %s331_s12 = sadd.s32 %s876_s11, %s1369_s9  ;;  %s1155_s24 = scalar_lea.vmem %s1352_s3, %s876_s11 }
  0x2a   : > { %s877_s25 = sshll.u32 %s331_s12, 3  ;;  %s1160_s29 = scalar_lea.vmem %s1353_s4, %s876_s11 }
  0x2b   : > { %s1165_s5 = scalar_lea.vmem %s1349_s0, %s877_s25  ;;  %353 = sbr.rel (%p882_p0) target bundleno = 57 (0x39), region = 74 }
  0x30   : > { %vm354_vm0 = vcmask 400384   ;;  %v1059_v8 = vmov 0.0  }
  0x31   : > { %355 = vst.msk [vmem:[#allocation2] sm:$0xff] %vm354_vm0, %v1059_v8 }
  0x32   : > { %356 = vst.msk [vmem:[#allocation2 + $0x8] sm:$0xff] %vm354_vm0, %v1059_v8 }
  0x33   : > { %357 = vst.msk [vmem:[#allocation2 + $0x10] sm:$0xff] %vm354_vm0, %v1059_v8 }
  0x34   : > { %358 = vst.msk [vmem:[#allocation2 + $0x18] sm:$0xff] %vm354_vm0, %v1059_v8 }
  0x35   : > { %359 = vst.msk [vmem:[#allocation2 + $0x20] sm:$0xff] %vm354_vm0, %v1059_v8 }
  0x36   : > { %360 = vst.msk [vmem:[#allocation2 + $0x28] sm:$0xff] %vm354_vm0, %v1059_v8 }
  0x37   : > { %361 = vst.msk [vmem:[#allocation2 + $0x30] sm:$0xff] %vm354_vm0, %v1059_v8 }
  0x38   : > { %362 = vst.msk [vmem:[#allocation2 + $0x38] sm:$0xff] %vm354_vm0, %v1059_v8 }
  0x39 PF: > { %366 = sbr.rel (!%p350_p13) target bundleno = 74 (0x4a), region = 78  ;;  %vm367_vm1 = vcmask (%p350_p13), 7168   ;;  %v1060_v9 = vmov (%p350_p13), 0.0  }
  0x3a   : > { %368 = vst.msk [vmem:[#allocation3] sm:$0xff] (%p350_p13), %vm367_vm1, %v1060_v9 }
  0x3b   : > { %369 = vst.msk [vmem:[#allocation3 + $0x8] sm:$0xff] (%p350_p13), %vm367_vm1, %v1060_v9 }
  0x3c   : > { %370 = vst.msk [vmem:[#allocation3 + $0x10] sm:$0xff] (%p350_p13), %vm367_vm1, %v1060_v9 }
  0x3d   : > { %371 = vst.msk [vmem:[#allocation3 + $0x18] sm:$0xff] (%p350_p13), %vm367_vm1, %v1060_v9 }
  0x3e   : > { %372 = vst.msk [vmem:[#allocation3 + $0x20] sm:$0xff] %vm367_vm1, %v1060_v9 }
  0x3f   : > { %373 = vst.msk [vmem:[#allocation3 + $0x28] sm:$0xff] %vm367_vm1, %v1060_v9 }
  0x40   : > { %374 = vst.msk [vmem:[#allocation3 + $0x30] sm:$0xff] %vm367_vm1, %v1060_v9 }
  0x41   : > { %375 = vst.msk [vmem:[#allocation3 + $0x38] sm:$0xff] %vm367_vm1, %v1060_v9 }
  0x42   : > { %376 = vst.msk [vmem:[#allocation4] sm:$0xff] %vm367_vm1, %v1060_v9 }
  0x43   : > { %377 = vst.msk [vmem:[#allocation4 + $0x8] sm:$0xff] %vm367_vm1, %v1060_v9 }
  0x44   : > { %378 = vst.msk [vmem:[#allocation4 + $0x10] sm:$0xff] %vm367_vm1, %v1060_v9 }
  0x45   : > { %379 = vst.msk [vmem:[#allocation4 + $0x18] sm:$0xff] %vm367_vm1, %v1060_v9 }
  0x46   : > { %380 = vst.msk [vmem:[#allocation4 + $0x20] sm:$0xff] %vm367_vm1, %v1060_v9 }
  0x47   : > { %381 = vst.msk [vmem:[#allocation4 + $0x28] sm:$0xff] %vm367_vm1, %v1060_v9 }
  0x48   : > { %382 = vst.msk [vmem:[#allocation4 + $0x30] sm:$0xff] %vm367_vm1, %v1060_v9 }
  0x49   : > { %383 = vst.msk [vmem:[#allocation4 + $0x38] sm:$0xff] %vm367_vm1, %v1060_v9 }
  0x4a PF: > { %v415_v10 = vld [vmem:[%s1165_s5 + $0x78] sm:$0xff]  ;;  %v414_v11 = vld [vmem:[%s1165_s5 + $0x70] sm:$0xff]  ;;  %v413_v12 = vld [vmem:[%s1165_s5 + $0x68] sm:$0xff]  ;;  %vm465_vm2 = vcmask 400384   ;;  %p884_p1 = scmp.ne.s32.totalorder %s1041_s17, 3 }
  0x4b   : > { %893 = vmatpush.msra.mxu2 %v415_v10  ;;  %894 = vmatpush.msra.mxu3 %v415_v10  ;;  %v412_v13 = vld [vmem:[%s1165_s5 + $0x60] sm:$0xff]  ;;  %v411_v14 = vld [vmem:[%s1165_s5 + $0x58] sm:$0xff]  ;;  %v410_v15 = vld [vmem:[%s1165_s5 + $0x50] sm:$0xff] }
  0x4c   : > { %416 = vmatpush.msra.mxu0 %v415_v10  ;;  %892 = vmatpush.msra.mxu1 %v415_v10  ;;  %v409_v16 = vld [vmem:[%s1165_s5 + $0x48] sm:$0xff]  ;;  %v408_v17 = vld [vmem:[%s1165_s5 + $0x40] sm:$0xff]  ;;  %v407_v18 = vld [vmem:[%s1165_s5 + $0x38] sm:$0xff] }
  0x4d   : > { %896 = vmatpush.msra.mxu2 %v414_v11  ;;  %897 = vmatpush.msra.mxu3 %v414_v11  ;;  %v406_v19 = vld [vmem:[%s1165_s5 + $0x30] sm:$0xff]  ;;  %v405_v20 = vld [vmem:[%s1165_s5 + $0x28] sm:$0xff]  ;;  %v404_v21 = vld [vmem:[%s1165_s5 + $0x20] sm:$0xff] }
  0x4e   : > { %417 = vmatpush.msra.mxu0 %v414_v11  ;;  %895 = vmatpush.msra.mxu1 %v414_v11  ;;  %v403_v22 = vld [vmem:[%s1165_s5 + $0x18] sm:$0xff]  ;;  %v402_v23 = vld [vmem:[%s1165_s5 + $0x10] sm:$0xff]  ;;  %v401_v24 = vld [vmem:[%s1165_s5 + $0x8] sm:$0xff] }
  0x4f   : > { %899 = vmatpush.msra.mxu2 %v413_v12  ;;  %900 = vmatpush.msra.mxu3 %v413_v12  ;;  %v400_v25 = vld [vmem:[%s1165_s5] sm:$0xff]  ;;  %v398_v27 = vld [vmem:[%s1168_s18 + $0x30] sm:$0xff]  ;;  %v397_v30 = vld [vmem:[%s1168_s18 + $0x28] sm:$0xff] }
  0x50   : > { %418 = vmatpush.msra.mxu0 %v413_v12  ;;  %898 = vmatpush.msra.mxu1 %v413_v12  ;;  %v396_v26 = vld [vmem:[%s1168_s18 + $0x20] sm:$0xff]  ;;  %v394_v29 = vld [vmem:[%s1168_s18 + $0x10] sm:$0xff]  ;;  %v399_v31 = vld [vmem:[%s1168_s18 + $0x38] sm:$0xff] }
  0x51   : > { %902 = vmatpush.msra.mxu2 %v412_v13  ;;  %903 = vmatpush.msra.mxu3 %v412_v13  ;;  %v392_v28 = vld [vmem:[%s1168_s18] sm:$0xff]  ;;  %v393_v32 = vld [vmem:[%s1168_s18 + $0x8] sm:$0xff]  ;;  %v395_v33 = vld [vmem:[%s1168_s18 + $0x18] sm:$0xff] }
  0x52   : > { %419 = vmatpush.msra.mxu0 %v412_v13  ;;  %901 = vmatpush.msra.mxu1 %v412_v13  ;;  %v384_v34 = vld [vmem:[#allocation2] sm:$0xff]  ;;  %v386_v35 = vld [vmem:[#allocation2 + $0x10] sm:$0xff]  ;;  %v385_v46 = vld [vmem:[#allocation2 + $0x8] sm:$0xff] }
  0x53   : > { %905 = vmatpush.msra.mxu2 %v411_v14  ;;  %906 = vmatpush.msra.mxu3 %v411_v14  ;;  %v388_v40 = vld [vmem:[#allocation2 + $0x20] sm:$0xff]  ;;  %v390_v41 = vld [vmem:[#allocation2 + $0x30] sm:$0xff]  ;;  %v387_v47 = vld [vmem:[#allocation2 + $0x18] sm:$0xff] }
  0x54   : > { %420 = vmatpush.msra.mxu0 %v411_v14  ;;  %904 = vmatpush.msra.mxu1 %v411_v14  ;;  %v389_v52 = vld [vmem:[#allocation2 + $0x28] sm:$0xff]  ;;  %v391_v53 = vld [vmem:[#allocation2 + $0x38] sm:$0xff] }
  0x55   : > { %908 = vmatpush.msra.mxu2 %v410_v15  ;;  %909 = vmatpush.msra.mxu3 %v410_v15 }
  0x56   : > { %421 = vmatpush.msra.mxu0 %v410_v15  ;;  %907 = vmatpush.msra.mxu1 %v410_v15 }
  0x57   : > { %911 = vmatpush.msra.mxu2 %v409_v16  ;;  %912 = vmatpush.msra.mxu3 %v409_v16 }
  0x58   : > { %422 = vmatpush.msra.mxu0 %v409_v16  ;;  %910 = vmatpush.msra.mxu1 %v409_v16 }
  0x59   : > { %914 = vmatpush.msra.mxu2 %v408_v17  ;;  %915 = vmatpush.msra.mxu3 %v408_v17 }
  0x5a   : > { %423 = vmatpush.msra.mxu0 %v408_v17  ;;  %913 = vmatpush.msra.mxu1 %v408_v17 }
  0x5b   : > { %917 = vmatpush.msra.mxu2 %v407_v18  ;;  %918 = vmatpush.msra.mxu3 %v407_v18 }
  0x5c   : > { %424 = vmatpush.msra.mxu0 %v407_v18  ;;  %916 = vmatpush.msra.mxu1 %v407_v18 }
  0x5d   : > { %920 = vmatpush.msra.mxu2 %v406_v19  ;;  %921 = vmatpush.msra.mxu3 %v406_v19 }
  0x5e   : > { %425 = vmatpush.msra.mxu0 %v406_v19  ;;  %919 = vmatpush.msra.mxu1 %v406_v19 }
  0x5f   : > { %923 = vmatpush.msra.mxu2 %v405_v20  ;;  %924 = vmatpush.msra.mxu3 %v405_v20 }
  0x60   : > { %426 = vmatpush.msra.mxu0 %v405_v20  ;;  %922 = vmatpush.msra.mxu1 %v405_v20 }
  0x61   : > { %926 = vmatpush.msra.mxu2 %v404_v21  ;;  %927 = vmatpush.msra.mxu3 %v404_v21 }
  0x62   : > { %427 = vmatpush.msra.mxu0 %v404_v21  ;;  %925 = vmatpush.msra.mxu1 %v404_v21 }
  0x63   : > { %929 = vmatpush.msra.mxu2 %v403_v22  ;;  %930 = vmatpush.msra.mxu3 %v403_v22 }
  0x64   : > { %428 = vmatpush.msra.mxu0 %v403_v22  ;;  %928 = vmatpush.msra.mxu1 %v403_v22 }
  0x65   : > { %932 = vmatpush.msra.mxu2 %v402_v23  ;;  %933 = vmatpush.msra.mxu3 %v402_v23 }
  0x66   : > { %429 = vmatpush.msra.mxu0 %v402_v23  ;;  %931 = vmatpush.msra.mxu1 %v402_v23 }
  0x67   : > { %935 = vmatpush.msra.mxu2 %v401_v24  ;;  %936 = vmatpush.msra.mxu3 %v401_v24 }
  0x68   : > { %430 = vmatpush.msra.mxu0 %v401_v24  ;;  %934 = vmatpush.msra.mxu1 %v401_v24 }
  0x69   : > { %938 = vmatpush.msra.mxu2 %v400_v25  ;;  %939 = vmatpush.msra.mxu3 %v400_v25 }
  0x6a   : > { %444 = vmatmul.f32.vlgmr.msra.gmra.mxu2 %v396_v26  ;;  %450 = vmatmul.f32.vlgmr.msra.gmra.mxu3 %v398_v27 }
  0x6b   : > { %431 = vmatpush.msra.mxu0 %v400_v25  ;;  %937 = vmatpush.msra.mxu1 %v400_v25 }
  0x6c   : > { %432 = vmatmul.f32.vlgmr.msra.gmra.mxu0 %v392_v28  ;;  %438 = vmatmul.f32.vlgmr.msra.gmra.mxu1 %v394_v29 }
  0x72   : > { %447 = vmatmul.f32.gmra.mxu2 %v397_v30  ;;  %453 = vmatmul.f32.gmra.mxu3 %v399_v31 }
  0x74   : > { %435 = vmatmul.f32.gmra.mxu0 %v393_v32  ;;  %441 = vmatmul.f32.gmra.mxu1 %v395_v33 }
  0xe9   : > { %v433_v36 = vpop.f32.mrf.mxu0  ;;  %v439_v37 = vpop.f32.mrf.mxu1 }
  0xea   : > { %v457_v38 = vadd.f32 %v433_v36, %v384_v34  ;;  %v459_v39 = vadd.f32 %v439_v37, %v386_v35 }
  0xec   : > { %466 = vst.msk [vmem:[#allocation2] sm:$0xff] %vm465_vm2, %v457_v38 }
  0xed   : > { %468 = vst.msk [vmem:[#allocation2 + $0x10] sm:$0xff] %vm465_vm2, %v459_v39  ;;  %v445_v42 = vpop.f32.mrf.mxu2  ;;  %v451_v43 = vpop.f32.mrf.mxu3 }
  0xee   : > { %v461_v44 = vadd.f32 %v445_v42, %v388_v40  ;;  %v463_v45 = vadd.f32 %v451_v43, %v390_v41 }
  0xf0   : > { %470 = vst.msk [vmem:[#allocation2 + $0x20] sm:$0xff] %vm465_vm2, %v461_v44 }
  0xf1   : > { %472 = vst.msk [vmem:[#allocation2 + $0x30] sm:$0xff] %vm465_vm2, %v463_v45  ;;  %v436_v48 = vpop.f32.mrf.mxu0  ;;  %v442_v49 = vpop.f32.mrf.mxu1 }
  0xf2   : > { %v458_v50 = vadd.f32 %v436_v48, %v385_v46  ;;  %v460_v51 = vadd.f32 %v442_v49, %v387_v47 }
  0xf4   : > { %467 = vst.msk [vmem:[#allocation2 + $0x8] sm:$0xff] %vm465_vm2, %v458_v50 }
  0xf5   : > { %469 = vst.msk [vmem:[#allocation2 + $0x18] sm:$0xff] %vm465_vm2, %v460_v51  ;;  %v448_v54 = vpop.f32.mrf.mxu2  ;;  %v454_v55 = vpop.f32.mrf.mxu3  ;;  %476 = sbr.rel (%p884_p1) target bundleno = 531 (0x213), region = 82 }
  0xf6   : > { %v462_v56 = vadd.f32 %v448_v54, %v389_v52  ;;  %v464_v57 = vadd.f32 %v454_v55, %v391_v53 }
  0xf8   : > { %471 = vst.msk [vmem:[#allocation2 + $0x28] sm:$0xff] %vm465_vm2, %v462_v56 }
  0xf9   : > { %473 = vst.msk [vmem:[#allocation2 + $0x38] sm:$0xff] %vm465_vm2, %v464_v57 }
  0xfa   : > { %v487_v58 = vld [vmem:[%s1351_s2 + $0x10] sm:$0xff]  ;;  %v485_v59 = vld [vmem:[%s1351_s2] sm:$0xff]  ;;  %v1061_v60 = vmov 0   ;;  %v488_v62 = vld [vmem:[%s1351_s2 + $0x18] sm:$0xff]  ;;  %vm581_vm3 = vcmask 7168  }
  0xfb   : > { %1001 = vset.pattern.permute.xlu1 %v1061_v60  ;;  %1000 = vset.pattern.permute.xlu0 %v1061_v60  ;;  %v489_v61 = vld [vmem:[%s1351_s2 + $0x20] sm:$0xff]  ;;  %v486_v63 = vld [vmem:[%s1351_s2 + $0x8] sm:$0xff]  ;;  %v492_v1 = vld [vmem:[%s1351_s2 + $0x38] sm:$0xff] }
  0xfc   : > { %505 = vperm.xlu1 %1001, %v487_v58   ;;  %495 = vperm.xlu0 %1000, %v485_v59   ;;  %v490_v0 = vld [vmem:[%s1351_s2 + $0x28] sm:$0xff]  ;;  %v491_v2 = vld [vmem:[%s1351_s2 + $0x30] sm:$0xff]  ;;  %v481_v3 = vld [vmem:[#allocation2 + $0x20] sm:$0xff] }
  0xfd   : > { %1002 = vset.pattern.permute.xlu2 %v1061_v60  ;;  %v479_v9 = vld [vmem:[#allocation2 + $0x10] sm:$0xff]  ;;  %v477_v10 = vld [vmem:[#allocation2] sm:$0xff]  ;;  %v480_v17 = vld [vmem:[#allocation2 + $0x18] sm:$0xff] }
  0xfe   : > { %515 = vperm.xlu2 %1002, %v489_v61   ;;  %v478_v18 = vld [vmem:[#allocation2 + $0x8] sm:$0xff]  ;;  %v483_v26 = vld [vmem:[#allocation2 + $0x30] sm:$0xff]  ;;  %v541_v52 = vld [vmem:[#allocation3] sm:$0xff] }
  0xff   : > { %v482_v6 = vld [vmem:[#allocation2 + $0x28] sm:$0xff]  ;;  %v543_v51 = vld [vmem:[#allocation3 + $0x10] sm:$0xff]  ;;  %v544_v58 = vld [vmem:[#allocation3 + $0x18] sm:$0xff] }
 0x100   : > { %v484_v25 = vld [vmem:[#allocation2 + $0x38] sm:$0xff]  ;;  %v542_v57 = vld [vmem:[#allocation3 + $0x8] sm:$0xff] }
 0x104   : > { %510 = vperm.xlu1 %1001, %v488_v62   ;;  %500 = vperm.xlu0 %1000, %v486_v63   ;;  %v547_v63 = vld [vmem:[#allocation3 + $0x30] sm:$0xff] }
 0x106   : > { %520 = vperm.xlu2 %1002, %v490_v0   ;;  %v546_v0 = vld [vmem:[#allocation3 + $0x28] sm:$0xff] }
 0x10c   : > { %530 = vperm.xlu1 %1001, %v492_v1   ;;  %525 = vperm.xlu0 %1000, %v491_v2   ;;  %v545_v1 = vld [vmem:[#allocation3 + $0x20] sm:$0xff] }
 0x158   : > { %v516_v4 = vpop.permute.xlu2 %515 }
 0x159   : > { %v537_v5 = vadd.f32 %v516_v4, %v481_v3 }
 0x15b   : > { %650 = vst.msk [vmem:[%s1155_s24 + $0x20] sm:$0xff] %vm465_vm2, %v537_v5  ;;  %v561_v33 = vsel %vm465_vm2, %v537_v5, 0.0  ;;  %v602_v39 = vmul.f32 %v537_v5, %v537_v5 }
 0x15d   : > { %v618_v42 = vsel %vm465_vm2, %v602_v39, 0.0 }
 0x160   : > { %v521_v7 = vpop.permute.xlu2 %520 }
 0x161   : > { %v538_v8 = vadd.f32 %v521_v7, %v482_v6 }
 0x163   : > { %651 = vst.msk [vmem:[%s1155_s24 + $0x28] sm:$0xff] %vm465_vm2, %v538_v8  ;;  %v564_v32 = vsel %vm465_vm2, %v538_v8, 0.0  ;;  %v603_v47 = vmul.f32 %v538_v8, %v538_v8  ;;  %v591_v8 = vld [vmem:[#allocation4 + $0x8] sm:$0xff] }
 0x165   : > { %v621_v50 = vsel %vm465_vm2, %v603_v47, 0.0 }
 0x16e   : > { %v506_v11 = vpop.permute.xlu1 %505  ;;  %v496_v12 = vpop.permute.xlu0 %495 }
 0x16f   : > { %v535_v13 = vadd.f32 %v506_v11, %v479_v9  ;;  %v533_v14 = vadd.f32 %v496_v12, %v477_v10  ;;  %v590_v9 = vld [vmem:[#allocation4] sm:$0xff]  ;;  %v548_v10 = vld [vmem:[#allocation3 + $0x38] sm:$0xff] }
 0x171   : > { %648 = vst.msk [vmem:[%s1155_s24 + $0x10] sm:$0xff] %vm465_vm2, %v535_v13  ;;  %v555_v15 = vsel %vm465_vm2, %v535_v13, 0.0  ;;  %v549_v16 = vsel %vm465_vm2, %v533_v14, 0.0  ;;  %v598_v35 = vmul.f32 %v533_v14, %v533_v14  ;;  %v600_v41 = vmul.f32 %v535_v13, %v535_v13 }
 0x172   : > { %646 = vst.msk [vmem:[%s1155_s24] sm:$0xff] %vm465_vm2, %v533_v14  ;;  %556 = vadd.xlane.f32.xlu1 %v555_v15  ;;  %550 = vadd.xlane.f32.xlu2 %v549_v16 }
 0x173   : > { %v606_v37 = vsel %vm465_vm2, %v598_v35, 0.0  ;;  %v612_v44 = vsel %vm465_vm2, %v600_v41, 0.0 }
 0x176   : > { %v511_v19 = vpop.permute.xlu1 %510  ;;  %v501_v20 = vpop.permute.xlu0 %500 }
 0x177   : > { %v536_v21 = vadd.f32 %v511_v19, %v480_v17  ;;  %v534_v22 = vadd.f32 %v501_v20, %v478_v18  ;;  %v594_v17 = vld [vmem:[#allocation4 + $0x20] sm:$0xff]  ;;  %v593_v18 = vld [vmem:[#allocation4 + $0x18] sm:$0xff]  ;;  %v592_v19 = vld [vmem:[#allocation4 + $0x10] sm:$0xff] }
 0x179   : > { %649 = vst.msk [vmem:[%s1155_s24 + $0x18] sm:$0xff] %vm465_vm2, %v536_v21  ;;  %v552_v23 = vsel %vm465_vm2, %v534_v22, 0.0  ;;  %v558_v24 = vsel %vm465_vm2, %v536_v21, 0.0  ;;  %v599_v34 = vmul.f32 %v534_v22, %v534_v22  ;;  %v601_v40 = vmul.f32 %v536_v21, %v536_v21 }
 0x17a   : > { %647 = vst.msk [vmem:[%s1155_s24 + $0x8] sm:$0xff] %vm465_vm2, %v534_v22  ;;  %553 = vadd.xlane.f32.xlu0 %v552_v23  ;;  %559 = vadd.xlane.f32.xlu2 %v558_v24 }
 0x17b   : > { %v609_v36 = vsel %vm465_vm2, %v599_v34, 0.0  ;;  %v615_v43 = vsel %vm465_vm2, %v601_v40, 0.0 }
 0x17e   : > { %v531_v27 = vpop.permute.xlu1 %530  ;;  %v526_v28 = vpop.permute.xlu0 %525 }
 0x17f   : > { %v540_v29 = vadd.f32 %v531_v27, %v484_v25  ;;  %v539_v30 = vadd.f32 %v526_v28, %v483_v26  ;;  %v597_v26 = vld [vmem:[#allocation4 + $0x38] sm:$0xff]  ;;  %v596_v27 = vld [vmem:[#allocation4 + $0x30] sm:$0xff]  ;;  %v595_v28 = vld [vmem:[#allocation4 + $0x28] sm:$0xff] }
 0x181   : > { %653 = vst.msk [vmem:[%s1155_s24 + $0x38] sm:$0xff] %vm465_vm2, %v540_v29  ;;  %v567_v31 = vsel %vm465_vm2, %v539_v30, 0.0  ;;  %v570_v38 = vsel %vm465_vm2, %v540_v29, 0.0  ;;  %v605_v45 = vmul.f32 %v540_v29, %v540_v29  ;;  %v604_v46 = vmul.f32 %v539_v30, %v539_v30 }
 0x182   : > { %652 = vst.msk [vmem:[%s1155_s24 + $0x30] sm:$0xff] %vm465_vm2, %v539_v30  ;;  %568 = vadd.xlane.f32.xlu1 %v567_v31  ;;  %565 = vadd.xlane.f32.xlu0 %v564_v32 }
 0x183   : > { %562 = vadd.xlane.f32.xlu2 %v561_v33  ;;  %v627_v48 = vsel %vm465_vm2, %v605_v45, 0.0  ;;  %v624_v49 = vsel %vm465_vm2, %v604_v46, 0.0 }
 0x18a   : > { %610 = vadd.xlane.f32.xlu1 %v609_v36  ;;  %607 = vadd.xlane.f32.xlu0 %v606_v37 }
 0x18b   : > { %571 = vadd.xlane.f32.xlu2 %v570_v38 }
 0x192   : > { %619 = vadd.xlane.f32.xlu1 %v618_v42  ;;  %616 = vadd.xlane.f32.xlu0 %v615_v43 }
 0x193   : > { %613 = vadd.xlane.f32.xlu2 %v612_v44 }
 0x19a   : > { %628 = vadd.xlane.f32.xlu1 %v627_v48  ;;  %625 = vadd.xlane.f32.xlu0 %v624_v49 }
 0x19b   : > { %622 = vadd.xlane.f32.xlu2 %v621_v50 }
 0x1e5   : > { %v557_v53 = vpop.xlane.xlu1 %556  ;;  %v551_v54 = vpop.xlane.xlu2 %550 }
 0x1e6   : > { %v575_v55 = vadd.f32 %v557_v53, %v543_v51  ;;  %v573_v56 = vadd.f32 %v551_v54, %v541_v52 }
 0x1e8   : > { %584 = vst.msk [vmem:[#allocation3 + $0x10] sm:$0xff] %vm581_vm3, %v575_v55 }
 0x1e9   : > { %582 = vst.msk [vmem:[#allocation3] sm:$0xff] %vm581_vm3, %v573_v56 }
 0x1ed   : > { %v554_v59 = vpop.xlane.xlu0 %553  ;;  %v560_v60 = vpop.xlane.xlu2 %559 }
 0x1ee   : > { %v574_v61 = vadd.f32 %v554_v59, %v542_v57  ;;  %v576_v62 = vadd.f32 %v560_v60, %v544_v58 }
 0x1f0   : > { %583 = vst.msk [vmem:[#allocation3 + $0x8] sm:$0xff] %vm581_vm3, %v574_v61 }
 0x1f1   : > { %585 = vst.msk [vmem:[#allocation3 + $0x18] sm:$0xff] %vm581_vm3, %v576_v62 }
 0x1f5   : > { %v569_v2 = vpop.xlane.xlu1 %568  ;;  %v566_v3 = vpop.xlane.xlu0 %565 }
 0x1f6   : > { %v579_v4 = vadd.f32 %v569_v2, %v547_v63  ;;  %v578_v5 = vadd.f32 %v566_v3, %v546_v0  ;;  %v563_v6 = vpop.xlane.xlu2 %562 }
 0x1f7   : > { %v577_v7 = vadd.f32 %v563_v6, %v545_v1 }
 0x1f8   : > { %588 = vst.msk [vmem:[#allocation3 + $0x30] sm:$0xff] %vm581_vm3, %v579_v4 }
 0x1f9   : > { %587 = vst.msk [vmem:[#allocation3 + $0x28] sm:$0xff] %vm581_vm3, %v578_v5 }
 0x1fa   : > { %586 = vst.msk [vmem:[#allocation3 + $0x20] sm:$0xff] %vm581_vm3, %v577_v7 }
 0x1fd   : > { %v611_v11 = vpop.xlane.xlu1 %610  ;;  %v608_v12 = vpop.xlane.xlu0 %607 }
 0x1fe   : > { %v631_v13 = vadd.f32 %v611_v11, %v591_v8  ;;  %v630_v14 = vadd.f32 %v608_v12, %v590_v9  ;;  %v572_v15 = vpop.xlane.xlu2 %571 }
 0x1ff   : > { %v580_v16 = vadd.f32 %v572_v15, %v548_v10 }
 0x200   : > { %639 = vst.msk [vmem:[#allocation4 + $0x8] sm:$0xff] %vm581_vm3, %v631_v13 }
 0x201   : > { %638 = vst.msk [vmem:[#allocation4] sm:$0xff] %vm581_vm3, %v630_v14 }
 0x202   : > { %589 = vst.msk [vmem:[#allocation3 + $0x38] sm:$0xff] %vm581_vm3, %v580_v16 }
 0x205   : > { %v620_v20 = vpop.xlane.xlu1 %619  ;;  %v617_v21 = vpop.xlane.xlu0 %616 }
 0x206   : > { %v634_v22 = vadd.f32 %v620_v20, %v594_v17  ;;  %v633_v23 = vadd.f32 %v617_v21, %v593_v18  ;;  %v614_v24 = vpop.xlane.xlu2 %613 }
 0x207   : > { %v632_v25 = vadd.f32 %v614_v24, %v592_v19 }
 0x208   : > { %642 = vst.msk [vmem:[#allocation4 + $0x20] sm:$0xff] %vm581_vm3, %v634_v22 }
 0x209   : > { %641 = vst.msk [vmem:[#allocation4 + $0x18] sm:$0xff] %vm581_vm3, %v633_v23 }
 0x20a   : > { %640 = vst.msk [vmem:[#allocation4 + $0x10] sm:$0xff] %vm581_vm3, %v632_v25 }
 0x20d   : > { %v629_v29 = vpop.xlane.xlu1 %628  ;;  %v626_v30 = vpop.xlane.xlu0 %625 }
 0x20e   : > { %v637_v31 = vadd.f32 %v629_v29, %v597_v26  ;;  %v636_v32 = vadd.f32 %v626_v30, %v596_v27  ;;  %v623_v33 = vpop.xlane.xlu2 %622 }
 0x20f   : > { %v635_v34 = vadd.f32 %v623_v33, %v595_v28 }
 0x210   : > { %645 = vst.msk [vmem:[#allocation4 + $0x38] sm:$0xff] %vm581_vm3, %v637_v31 }
 0x211   : > { %644 = vst.msk [vmem:[#allocation4 + $0x30] sm:$0xff] %vm581_vm3, %v636_v32 }
 0x212   : > { %643 = vst.msk [vmem:[#allocation4 + $0x28] sm:$0xff] %vm581_vm3, %v635_v34 }
 0x213 PF: > { %657 = sbr.rel (!%p349_p12) target bundleno = 665 (0x299), region = 86  ;;  %v677_v35 = vld [vmem:[#allocation4 + $0x10] sm:$0xff] (%p349_p12)  ;;  %v675_v36 = vld [vmem:[#allocation4] sm:$0xff] (%p349_p12)  ;;  %s1062_s24 = smov (%p349_p12), 1   ;;  %v678_v38 = vld [vmem:[#allocation4 + $0x18] sm:$0xff] (%p349_p12)  ;;  %vm666_vm4 = vcmask (%p349_p12), 7168  }
 0x214   : > { %695 = vrot.lane.b32.xlu1 (%p349_p12), %v677_v35, %s1062_s24  ;;  %691 = vrot.lane.b32.xlu0 (%p349_p12), %v675_v36, %s1062_s24  ;;  %v679_v37 = vld [vmem:[#allocation4 + $0x20] sm:$0xff] (%p349_p12)  ;;  %v676_v39 = vld [vmem:[#allocation4 + $0x8] sm:$0xff] (%p349_p12)  ;;  %v660_v43 = vld [vmem:[#allocation3 + $0x10] sm:$0xff] (%p349_p12)  ;;  %vm715_vm5 = vcmask (%p349_p12), 15368  }
 0x215   : > { %699 = vrot.lane.b32.xlu2 (%p349_p12), %v679_v37, %s1062_s24  ;;  %v658_v44 = vld [vmem:[#allocation3] sm:$0xff] (%p349_p12)  ;;  %669 = vst.msk [vmem:[%s1160_s29 + $0x10] sm:$0xff] (%p349_p12), %vm666_vm4, %v660_v43  ;;  %v661_v46 = vld [vmem:[#allocation3 + $0x18] sm:$0xff] (%p349_p12)  ;;  %v659_v47 = vld [vmem:[#allocation3 + $0x8] sm:$0xff] (%p349_p12) }
 0x216   : > { %667 = vst.msk [vmem:[%s1160_s29] sm:$0xff] (%p349_p12), %vm666_vm4, %v658_v44  ;;  %v662_v45 = vld [vmem:[#allocation3 + $0x20] sm:$0xff] (%p349_p12)  ;;  %v663_v49 = vld [vmem:[#allocation3 + $0x28] sm:$0xff] (%p349_p12)  ;;  %v665_v50 = vld [vmem:[#allocation3 + $0x38] sm:$0xff] (%p349_p12) }
 0x217   : > { %v682_v41 = vld [vmem:[#allocation4 + $0x38] sm:$0xff] (%p349_p12)  ;;  %671 = vst.msk [vmem:[%s1160_s29 + $0x20] sm:$0xff] (%p349_p12), %vm666_vm4, %v662_v45  ;;  %v664_v51 = vld [vmem:[#allocation3 + $0x30] sm:$0xff] (%p349_p12) }
 0x218   : > { %v681_v42 = vld [vmem:[#allocation4 + $0x30] sm:$0xff]  ;;  %670 = vst.msk [vmem:[%s1160_s29 + $0x18] sm:$0xff] %vm666_vm4, %v661_v46 }
 0x219   : > { %v680_v40 = vld [vmem:[#allocation4 + $0x28] sm:$0xff]  ;;  %668 = vst.msk [vmem:[%s1160_s29 + $0x8] sm:$0xff] %vm666_vm4, %v659_v47 }
 0x21a   : > { %672 = vst.msk [vmem:[%s1160_s29 + $0x28] sm:$0xff] %vm666_vm4, %v663_v49 }
 0x21b   : > { %674 = vst.msk [vmem:[%s1160_s29 + $0x38] sm:$0xff] %vm666_vm4, %v665_v50 }
 0x21c   : > { %697 = vrot.lane.b32.xlu1 %v678_v38, %s1062_s24  ;;  %693 = vrot.lane.b32.xlu0 %v676_v39, %s1062_s24  ;;  %673 = vst.msk [vmem:[%s1160_s29 + $0x30] sm:$0xff] %vm666_vm4, %v664_v51 }
 0x21d   : > { %701 = vrot.lane.b32.xlu2 %v680_v40, %s1062_s24 }
 0x224   : > { %705 = vrot.lane.b32.xlu1 %v682_v41, %s1062_s24  ;;  %703 = vrot.lane.b32.xlu0 %v681_v42, %s1062_s24 }
 0x26f   : > { %v700_v48 = vpop.permute.xlu2 %699 }
 0x270   : > { %720 = vst.msk [vmem:[%s1160_s29 + $0x20] sm:$0xff] %vm715_vm5, %v700_v48 }
 0x277   : > { %v702_v52 = vpop.permute.xlu2 %701 }
 0x278   : > { %721 = vst.msk [vmem:[%s1160_s29 + $0x28] sm:$0xff] %vm715_vm5, %v702_v52 }
 0x286   : > { %v696_v53 = vpop.permute.xlu1 %695  ;;  %v692_v54 = vpop.permute.xlu0 %691 }
 0x287   : > { %718 = vst.msk [vmem:[%s1160_s29 + $0x10] sm:$0xff] %vm715_vm5, %v696_v53 }
 0x288   : > { %716 = vst.msk [vmem:[%s1160_s29] sm:$0xff] %vm715_vm5, %v692_v54 }
 0x28e   : > { %v698_v55 = vpop.permute.xlu1 %697  ;;  %v694_v56 = vpop.permute.xlu0 %693 }
 0x28f   : > { %719 = vst.msk [vmem:[%s1160_s29 + $0x18] sm:$0xff] %vm715_vm5, %v698_v55 }
 0x290   : > { %717 = vst.msk [vmem:[%s1160_s29 + $0x8] sm:$0xff] %vm715_vm5, %v694_v56 }
 0x296   : > { %v706_v57 = vpop.permute.xlu1 %705  ;;  %v704_v58 = vpop.permute.xlu0 %703 }
 0x297   : > { %723 = vst.msk [vmem:[%s1160_s29 + $0x38] sm:$0xff] %vm715_vm5, %v706_v57 }
 0x298   : > { %722 = vst.msk [vmem:[%s1160_s29 + $0x30] sm:$0xff] %vm715_vm5, %v704_v58 }
 0x299 PF: > { %s15_s21 = sadd.s32 1, %s1057_s21   ;;  %s1354_s15 = smov %s1037_s16 }
 0x29a   : > { %p12_p2 = scmp.ge.s32.totalorder %s15_s21, 10   ;;  %s1355_s16 = smov %s1137_s26 }
 0x29b   : > { %s1356_s17 = smov %s1049_s19  ;;  %s1357_s18 = smov %s1053_s20 }
 0x29c   : > { %s1358_s19 = smov %s1361_s22  ;;  %s1359_s20 = smov %s1365_s23 }
 0x29d   :  { %14 = sbr.rel (!%p12_p2) target bundleno = 4 (0x4), region = 136 }

// kernel: discriminator_forward.14
= control target key start
LH: loop header
LB: loop body
LE: loop exit
PB: predicated region body
PF: predicated region fallthrough
CT: control target
= control target key end

     0   :  { %s694_s9 = smov 0   ;;  %s696_s10 = smov 0   ;;  %s815_s0 = inlined_call_operand.vmem [shape: f32[2,64,2], index: 0, kind: input, shape index: {}]   ;;  %s816_s1 = inlined_call_operand.vmem [shape: f32[2,64,49], index: 1, kind: input, shape index: {}, may-alias: {1,2}]   ;;  %s817_s2 = inlined_call_operand.vmem [shape: f32[2,64,49], index: 2, kind: output, shape index: {}, may-alias: {1,2}]  }
   0x1   :  { %s698_s11 = smov 0  }
   0x2 LB: > { %s24_s12 = sadd.s32 1, %s670_s10  ;;  %p591_p0 = scmp.ge.s32.totalorder %s674_s11, 1  ;;  %s674_s11 = sphi %s698_s11, %s12_s11   ;;  %s670_s10 = sphi %s696_s10, %s821_s10   ;;  %s666_s9 = sphi %s694_s9, %s820_s9  }
   0x3   : > { %p26_p1 = scmp.ge.s32.totalorder %s24_s12, 2  ;;  %p141_p2 = scmp.lt.s32.totalorder %s674_s11, 3 }
   0x5   : > { %s823_s12 = smov (%p26_p1, %s24_s12), 0  ;;  %p142_p3 = pnand %p591_p0, %p141_p2 }
   0x6   : > { %p174_p4 = scmp.lt.s32.totalorder (!%p142_p3), %s666_s9, 1  ;;  %s677_s17 = smov (!%p142_p3), 1  }
   0x7   : > { %145 = sbr.rel (%p142_p3) target bundleno = 297 (0x129), region = 28 }
   0xc   : > { %v676_v0 = vmov 0   ;;  %s825_s9 = smov (!%p174_p4, %s666_s9), 1  ;;  %v678_v27 = vmov 1  }
   0xd   : > { %632 = vset.pattern.permute.xlu1 %v676_v0  ;;  %630 = vset.pattern.permute.xlu2 %v676_v0  ;;  %s712_s13 = sshll.u32 %s825_s9, 6 }
   0xe   : > { %631 = vset.pattern.permute.xlu0 %v676_v0  ;;  %s178_s16 = scalar_lea.vmem %s815_s0, %s712_s13  ;;  %s186_s20 = scalar_lea.vmem %s816_s1, %s712_s13 }
   0xf   : > { %v197_v1 = vld [vmem:[%s178_s16 + $0x10] sm:$0xff]  ;;  %v195_v2 = vld [vmem:[%s178_s16] sm:$0xff]  ;;  %v198_v5 = vld [vmem:[%s178_s16 + $0x18] sm:$0xff]  ;;  %s788_s23 = scalar_lea.vmem %s817_s2, %s712_s13 }
  0x10   : > { %v205_v3 = vmul.f32 0.020408163, %v197_v1  ;;  %v203_v4 = vmul.f32 0.020408163, %v195_v2  ;;  %v196_v6 = vld [vmem:[%s178_s16 + $0x8] sm:$0xff]  ;;  %v199_v9 = vld [vmem:[%s178_s16 + $0x20] sm:$0xff] }
  0x11   : > { %v207_v10 = vmul.f32 0.020408163, %v199_v9  ;;  %v206_v11 = vmul.f32 0.020408163, %v198_v5  ;;  %v204_v12 = vmul.f32 0.020408163, %v196_v6 }
  0x12   : > { %v213_v7 = vmul.f32 %v205_v3, %v205_v3  ;;  %v211_v8 = vmul.f32 %v203_v4, %v203_v4  ;;  %v200_v13 = vld [vmem:[%s178_s16 + $0x28] sm:$0xff]  ;;  %v202_v18 = vld [vmem:[%s178_s16 + $0x38] sm:$0xff]  ;;  %v201_v19 = vld [vmem:[%s178_s16 + $0x30] sm:$0xff] }
  0x13   : > { %v215_v14 = vmul.f32 %v207_v10, %v207_v10  ;;  %v208_v15 = vmul.f32 0.020408163, %v200_v13  ;;  %v214_v16 = vmul.f32 %v206_v11, %v206_v11  ;;  %v212_v17 = vmul.f32 %v204_v12, %v204_v12 }
  0x14   : > { %231 = vrot.lane.b32.xlu1 %v213_v7, %s677_s17  ;;  %227 = vrot.lane.b32.xlu0 %v211_v8, %s677_s17  ;;  %v718_v21 = vmul.f32 0.020408163, %v202_v18  ;;  %v720_v22 = vmul.f32 0.020408163, %v201_v19 }
  0x15   : > { %235 = vrot.lane.b32.xlu2 %v215_v14, %s677_s17  ;;  %v216_v20 = vmul.f32 %v208_v15, %v208_v15 }
  0x16   : > { %v218_v23 = vmul.f32 %v718_v21, %v718_v21  ;;  %v217_v24 = vmul.f32 %v720_v22, %v720_v22 }
  0x1c   : > { %233 = vrot.lane.b32.xlu1 %v214_v16, %s677_s17  ;;  %229 = vrot.lane.b32.xlu0 %v212_v17, %s677_s17 }
  0x1d   : > { %237 = vrot.lane.b32.xlu2 %v216_v20, %s677_s17 }
  0x24   : > { %241 = vrot.lane.b32.xlu1 %v218_v23, %s677_s17  ;;  %239 = vrot.lane.b32.xlu0 %v217_v24, %s677_s17 }
  0x25   : > { %277 = vperm.xlu2 %630, %v203_v4  }
  0x2c   : > { %287 = vperm.xlu1 %632, %v205_v3   ;;  %282 = vperm.xlu0 %631, %v204_v12  }
  0x2d   : > { %292 = vperm.xlu2 %630, %v206_v11  }
  0x34   : > { %297 = vperm.xlu1 %632, %v207_v10   ;;  %307 = vperm.xlu0 %631, %v720_v22  }
  0x35   : > { %302 = vperm.xlu2 %630, %v208_v15  }
  0x3c   : > { %312 = vperm.xlu1 %632, %v718_v21   ;;  %634 = vset.pattern.permute.xlu0 %v678_v27 }
  0x3d   : > { %633 = vset.pattern.permute.xlu2 %v678_v27 }
  0x44   : > { %635 = vset.pattern.permute.xlu1 %v678_v27 }
  0x6f   : > { %v236_v25 = vpop.permute.xlu2 %235 }
  0x70   : > { %v255_v26 = vsub.f32 %v207_v10, %v236_v25 }
  0x72   : > { %v263_v29 = vmax.f32 %v255_v26, 0.0 }
  0x74   : > { %v728_v31 = vadd.f32 1e-05, %v263_v29 }
  0x76   : > { %636 = vrsqrt.f32 %v728_v31  ;;  %vm377_vm6 = vweird.f32 %v728_v31 }
  0x77   : > { %v238_v28 = vpop.permute.xlu2 %237 }
  0x78   : > { %v256_v30 = vsub.f32 %v208_v15, %v238_v28 }
  0x7a   : > { %v264_v36 = vmax.f32 %v256_v30, 0.0 }
  0x7c   : > { %v731_v41 = vadd.f32 1e-05, %v264_v36  ;;  %v733_v44 = vpop.eup %636 }
  0x7d   : > { %v372_v49 = vmul.f32 %v733_v44, %v728_v31  ;;  %vm378_vm7 = vweird.f32 %v733_v44 }
  0x7e   : > { %vm763_vm9 = vmor %vm377_vm6, %vm378_vm7  ;;  %vm387_vm15 = vweird.f32 %v731_v41 }
  0x7f   : > { %v373_v57 = vmul.f32 %v733_v44, %v372_v49 }
  0x81   : > { %v374_v5 = vmul.f32 0.5, %v373_v57 }
  0x83   : > { %v375_v19 = vsub.f32 1.5, %v374_v5 }
  0x85   : > { %v376_v25 = vmul.f32 %v733_v44, %v375_v19 }
  0x86   : > { %v232_v32 = vpop.permute.xlu1 %231  ;;  %v228_v33 = vpop.permute.xlu0 %227 }
  0x87   : > { %v253_v34 = vsub.f32 %v205_v3, %v232_v32  ;;  %v251_v35 = vsub.f32 %v203_v4, %v228_v33 }
  0x89   : > { %v261_v37 = vmax.f32 %v253_v34, 0.0  ;;  %v259_v38 = vmax.f32 %v251_v35, 0.0 }
  0x8b   : > { %v325_v39 = vadd.f32 1e-05, %v261_v37  ;;  %v323_v40 = vadd.f32 1e-05, %v259_v38  ;;  %v380_v37 = vsel %vm763_vm9, %v733_v44, %v376_v25  ;;  %vm483_vm9 = vcmask 400384  }
  0x8d   : > { %638 = vrsqrt.f32 %v325_v39  ;;  %vm357_vm2 = vweird.f32 %v325_v39  ;;  %vm337_vm4 = vweird.f32 %v323_v40 }
  0x8e   : > { %640 = vrsqrt.f32 %v323_v40  ;;  %v234_v42 = vpop.permute.xlu1 %233  ;;  %v230_v43 = vpop.permute.xlu0 %229 }
  0x8f   : > { %v254_v45 = vsub.f32 %v206_v11, %v234_v42  ;;  %v252_v46 = vsub.f32 %v204_v12, %v230_v43  ;;  %642 = vrsqrt.f32 %v731_v41 }
  0x91   : > { %v262_v47 = vmax.f32 %v254_v45, 0.0  ;;  %v260_v48 = vmax.f32 %v252_v46, 0.0 }
  0x93   : > { %v639_v50 = vpop.eup %638  ;;  %v738_v51 = vadd.f32 1e-05, %v262_v47  ;;  %v740_v52 = vadd.f32 1e-05, %v260_v48 }
  0x94   : > { %v641_v53 = vpop.eup %640  ;;  %v352_v54 = vmul.f32 %v639_v50, %v325_v39  ;;  %vm358_vm0 = vweird.f32 %v639_v50 }
  0x95   : > { %v742_v55 = vpop.eup %642  ;;  %v332_v56 = vmul.f32 %v641_v53, %v323_v40  ;;  %644 = vrsqrt.f32 %v738_v51  ;;  %vm338_vm1 = vweird.f32 %v641_v53  ;;  %vm359_vm3 = vmor %vm357_vm2, %vm358_vm0  ;;  %vm367_vm11 = vweird.f32 %v738_v51 }
  0x96   : > { %v353_v58 = vmul.f32 %v639_v50, %v352_v54  ;;  %646 = vrsqrt.f32 %v740_v52  ;;  %v242_v59 = vpop.permute.xlu1 %241  ;;  %v240_v60 = vpop.permute.xlu0 %239  ;;  %v382_v1 = vmul.f32 %v742_v55, %v731_v41  ;;  %vm339_vm5 = vmor %vm337_vm4, %vm338_vm1  ;;  %vm347_vm13 = vweird.f32 %v740_v52  ;;  %v267_v54 = vld [vmem:[%s186_s20] sm:$0xff] }
  0x97   : > { %v333_v61 = vmul.f32 %v641_v53, %v332_v56  ;;  %v258_v62 = vsub.f32 %v718_v21, %v242_v59  ;;  %v257_v63 = vsub.f32 %v720_v22, %v240_v60  ;;  %vm388_vm0 = vweird.f32 %v742_v55  ;;  %v268_v60 = vld [vmem:[%s186_s20 + $0x8] sm:$0xff] }
  0x98   : > { %v354_v0 = vmul.f32 0.5, %v353_v58  ;;  %v383_v13 = vmul.f32 %v742_v55, %v382_v1  ;;  %vm389_vm2 = vmor %vm387_vm15, %vm388_vm0 }
  0x99   : > { %v334_v2 = vmul.f32 0.5, %v333_v61  ;;  %v266_v3 = vmax.f32 %v258_v62, 0.0  ;;  %v265_v4 = vmax.f32 %v257_v63, 0.0  ;;  %v273_v61 = vld [vmem:[%s186_s20 + $0x30] sm:$0xff]  ;;  %v270_v63 = vld [vmem:[%s186_s20 + $0x18] sm:$0xff] }
  0x9a   : > { %v355_v6 = vsub.f32 1.5, %v354_v0  ;;  %v384_v24 = vmul.f32 0.5, %v383_v13  ;;  %v269_v62 = vld [vmem:[%s186_s20 + $0x10] sm:$0xff]  ;;  %v271_v0 = vld [vmem:[%s186_s20 + $0x20] sm:$0xff] }
  0x9b   : > { %v645_v7 = vpop.eup %644  ;;  %v751_v8 = vadd.f32 1e-05, %v266_v3  ;;  %v753_v9 = vadd.f32 1e-05, %v265_v4  ;;  %v335_v10 = vsub.f32 1.5, %v334_v2  ;;  %v272_v2 = vld [vmem:[%s186_s20 + $0x28] sm:$0xff] }
  0x9c   : > { %v647_v11 = vpop.eup %646  ;;  %v362_v12 = vmul.f32 %v645_v7, %v738_v51  ;;  %v356_v14 = vmul.f32 %v639_v50, %v355_v6  ;;  %vm368_vm8 = vweird.f32 %v645_v7  ;;  %v385_v35 = vsub.f32 1.5, %v384_v24  ;;  %v278_v51 = vpop.permute.xlu2 %277  ;;  %v274_v3 = vld [vmem:[%s186_s20 + $0x38] sm:$0xff] }
  0x9d   : > { %v342_v15 = vmul.f32 %v647_v11, %v740_v52  ;;  %648 = vrsqrt.f32 %v751_v8  ;;  %v336_v16 = vmul.f32 %v641_v53, %v335_v10  ;;  %vm348_vm10 = vweird.f32 %v647_v11  ;;  %vm369_vm12 = vmor %vm367_vm11, %vm368_vm8 }
  0x9e   : > { %v363_v17 = vmul.f32 %v645_v7, %v362_v12  ;;  %650 = vrsqrt.f32 %v753_v9  ;;  %v360_v18 = vsel %vm359_vm3, %v639_v50, %v356_v14  ;;  %vm349_vm14 = vmor %vm347_vm13, %vm348_vm10  ;;  %v386_v45 = vmul.f32 %v742_v55, %v385_v35  ;;  %v288_v56 = vpop.permute.xlu1 %287  ;;  %v283_v10 = vpop.permute.xlu0 %282 }
  0x9f   : > { %v343_v20 = vmul.f32 %v647_v11, %v342_v15  ;;  %423 = vperm.xlu1 %635, %v360_v18   ;;  %v340_v21 = vsel %vm339_vm5, %v641_v53, %v336_v16  ;;  %vm407_vm4 = vweird.f32 %v751_v8  ;;  %vm397_vm6 = vweird.f32 %v753_v9 }
  0xa0   : > { %v364_v22 = vmul.f32 0.5, %v363_v17  ;;  %413 = vperm.xlu2 %633, %v340_v21   ;;  %v390_v41 = vsel %vm389_vm2, %v742_v55, %v386_v45  ;;  %v315_v55 = vsub.f32 %v267_v54, %v278_v51  ;;  %v317_v17 = vsub.f32 %v269_v62, %v288_v56 }
  0xa1   : > { %v344_v23 = vmul.f32 0.5, %v343_v20  ;;  %v316_v24 = vsub.f32 %v268_v60, %v283_v10 }
  0xa2   : > { %v365_v26 = vsub.f32 1.5, %v364_v22 }
  0xa3   : > { %v649_v27 = vpop.eup %648  ;;  %v345_v29 = vsub.f32 1.5, %v344_v23 }
  0xa4   : > { %v651_v30 = vpop.eup %650  ;;  %v402_v32 = vmul.f32 %v649_v27, %v751_v8  ;;  %v366_v33 = vmul.f32 %v645_v7, %v365_v26  ;;  %vm408_vm1 = vweird.f32 %v649_v27  ;;  %v293_v52 = vpop.permute.xlu2 %292 }
  0xa5   : > { %v392_v31 = vmul.f32 %v651_v30, %v753_v9  ;;  %v346_v34 = vmul.f32 %v647_v11, %v345_v29  ;;  %vm398_vm3 = vweird.f32 %v651_v30  ;;  %vm409_vm5 = vmor %vm407_vm4, %vm408_vm1  ;;  %v318_v5 = vsub.f32 %v270_v63, %v293_v52 }
  0xa6   : > { %v403_v36 = vmul.f32 %v649_v27, %v402_v32  ;;  %v370_v38 = vsel %vm369_vm12, %v645_v7, %v366_v33  ;;  %vm399_vm7 = vmor %vm397_vm6, %vm398_vm3  ;;  %v298_v1 = vpop.permute.xlu1 %297  ;;  %v308_v19 = vpop.permute.xlu0 %307 }
  0xa7   : > { %v393_v39 = vmul.f32 %v651_v30, %v392_v31  ;;  %433 = vperm.xlu1 %635, %v380_v37   ;;  %v350_v40 = vsel %vm349_vm14, %v647_v11, %v346_v34  ;;  %v319_v23 = vsub.f32 %v271_v0, %v298_v1  ;;  %v321_v34 = vsub.f32 %v273_v61, %v308_v19 }
  0xa8   : > { %v404_v42 = vmul.f32 0.5, %v403_v36  ;;  %428 = vperm.xlu2 %633, %v370_v38   ;;  %418 = vperm.xlu0 %634, %v350_v40  }
  0xa9   : > { %v394_v43 = vmul.f32 0.5, %v393_v39 }
  0xaa   : > { %v405_v46 = vsub.f32 1.5, %v404_v42 }
  0xab   : > { %v395_v47 = vsub.f32 1.5, %v394_v43 }
  0xac   : > { %v406_v44 = vmul.f32 %v649_v27, %v405_v46  ;;  %v303_v53 = vpop.permute.xlu2 %302 }
  0xad   : > { %v396_v48 = vmul.f32 %v651_v30, %v395_v47  ;;  %v320_v11 = vsub.f32 %v272_v2, %v303_v53 }
  0xae   : > { %v410_v49 = vsel %vm409_vm5, %v649_v27, %v406_v44  ;;  %v313_v12 = vpop.permute.xlu1 %312 }
  0xaf   : > { %448 = vperm.xlu1 %635, %v410_v49   ;;  %v400_v50 = vsel %vm399_vm7, %v651_v30, %v396_v48  ;;  %v322_v31 = vsub.f32 %v274_v3, %v313_v12 }
  0xb0   : > { %438 = vperm.xlu2 %633, %v390_v41   ;;  %443 = vperm.xlu0 %634, %v400_v50  }
  0xfa   : > { %v414_v57 = vpop.permute.xlu2 %413 }
  0xfb   : > { %v451_v58 = vmul.f32 %v414_v57, %v315_v55 }
  0xfd   : > { %vm459_vm8 = vcmp.gt.f32.partialorder %v451_v58, 0.0  ;;  %v467_v59 = vmul.f32 0.2, %v451_v58 }
  0xff   : > { %v475_v4 = vsel %vm459_vm8, %v451_v58, %v467_v59 }
 0x100   : > { %484 = vst.msk [vmem:[%s788_s23] sm:$0xff] %vm483_vm9, %v475_v4 }
 0x102   : > { %v429_v6 = vpop.permute.xlu2 %428 }
 0x103   : > { %v454_v7 = vmul.f32 %v429_v6, %v318_v5 }
 0x105   : > { %vm462_vm10 = vcmp.gt.f32.partialorder %v454_v7, 0.0  ;;  %v470_v8 = vmul.f32 0.2, %v454_v7 }
 0x107   : > { %v478_v9 = vsel %vm462_vm10, %v454_v7, %v470_v8 }
 0x108   : > { %487 = vst.msk [vmem:[%s788_s23 + $0x18] sm:$0xff] %vm483_vm9, %v478_v9 }
 0x10a   : > { %v439_v13 = vpop.permute.xlu2 %438 }
 0x10b   : > { %v456_v14 = vmul.f32 %v439_v13, %v320_v11 }
 0x10d   : > { %vm464_vm11 = vcmp.gt.f32.partialorder %v456_v14, 0.0  ;;  %v472_v15 = vmul.f32 0.2, %v456_v14 }
 0x10f   : > { %v480_v16 = vsel %vm464_vm11, %v456_v14, %v472_v15 }
 0x110   : > { %489 = vst.msk [vmem:[%s788_s23 + $0x28] sm:$0xff] %vm483_vm9, %v480_v16 }
 0x111   : > { %v424_v18 = vpop.permute.xlu1 %423 }
 0x112   : > { %v453_v20 = vmul.f32 %v424_v18, %v317_v17 }
 0x114   : > { %vm461_vm12 = vcmp.gt.f32.partialorder %v453_v20, 0.0  ;;  %v469_v21 = vmul.f32 0.2, %v453_v20 }
 0x116   : > { %v477_v22 = vsel %vm461_vm12, %v453_v20, %v469_v21 }
 0x117   : > { %486 = vst.msk [vmem:[%s788_s23 + $0x10] sm:$0xff] %vm483_vm9, %v477_v22 }
 0x119   : > { %v434_v25 = vpop.permute.xlu1 %433 }
 0x11a   : > { %v455_v26 = vmul.f32 %v434_v25, %v319_v23  ;;  %v419_v27 = vpop.permute.xlu0 %418 }
 0x11b   : > { %v452_v28 = vmul.f32 %v419_v27, %v316_v24 }
 0x11c   : > { %vm463_vm13 = vcmp.gt.f32.partialorder %v455_v26, 0.0  ;;  %v471_v29 = vmul.f32 0.2, %v455_v26 }
 0x11d   : > { %vm460_vm14 = vcmp.gt.f32.partialorder %v452_v28, 0.0  ;;  %v468_v30 = vmul.f32 0.2, %v452_v28 }
 0x11e   : > { %v479_v32 = vsel %vm463_vm13, %v455_v26, %v471_v29 }
 0x11f   : > { %488 = vst.msk [vmem:[%s788_s23 + $0x20] sm:$0xff] %vm483_vm9, %v479_v32  ;;  %v476_v33 = vsel %vm460_vm14, %v452_v28, %v468_v30 }
 0x120   : > { %485 = vst.msk [vmem:[%s788_s23 + $0x8] sm:$0xff] %vm483_vm9, %v476_v33 }
 0x121   : > { %v449_v35 = vpop.permute.xlu1 %448 }
 0x122   : > { %v458_v36 = vmul.f32 %v449_v35, %v322_v31  ;;  %v444_v37 = vpop.permute.xlu0 %443 }
 0x123   : > { %v457_v38 = vmul.f32 %v444_v37, %v321_v34 }
 0x124   : > { %vm466_vm15 = vcmp.gt.f32.partialorder %v458_v36, 0.0  ;;  %v474_v39 = vmul.f32 0.2, %v458_v36 }
 0x125   : > { %vm465_vm0 = vcmp.gt.f32.partialorder %v457_v38, 0.0  ;;  %v473_v40 = vmul.f32 0.2, %v457_v38 }
 0x126   : > { %v482_v42 = vsel %vm466_vm15, %v458_v36, %v474_v39 }
 0x127   : > { %491 = vst.msk [vmem:[%s788_s23 + $0x38] sm:$0xff] %vm483_vm9, %v482_v42  ;;  %v481_v43 = vsel %vm465_vm0, %v457_v38, %v473_v40 }
 0x128   : > { %490 = vst.msk [vmem:[%s788_s23 + $0x30] sm:$0xff] %vm483_vm9, %v481_v43 }
 0x129 PF: > { %s12_s11 = sadd.s32 1, %s674_s11   ;;  %s820_s9 = smov %s670_s10 }
 0x12a   : > { %p9_p5 = scmp.ge.s32.totalorder %s12_s11, 4   ;;  %s821_s10 = smov %s823_s12 }
 0x12c   :  { %11 = sbr.rel (!%p9_p5) target bundleno = 2 (0x2), region = 61 }

// kernel: discriminator_forward.15
= control target key start
LH: loop header
LB: loop body
LE: loop exit
PB: predicated region body
PF: predicated region fallthrough
CT: control target
= control target key end

     0   :  { %s516_s14 = smov 0   ;;  %s518_s15 = smov 0   ;;  %s616_s0 = inlined_call_operand.vmem [shape: f32[2,1024,36], index: 0, kind: input, shape index: {}]   ;;  %s617_s1 = inlined_call_operand.vmem [shape: f32[1,1024], index: 1, kind: input, shape index: {}]   ;;  %s618_s2 = inlined_call_operand.<no memory space> [shape: f32[1,1], index: 2, kind: input, shape index: {}]   ;;  %s619_s3 = inlined_call_operand.vmem [shape: f32[2,1,1], index: 3, kind: output, shape index: {}]  }
   0x1   :  { %v8_v0 = vstv %s618_s2  ;;  %s520_s16 = smov 0   ;;  %s522_s17 = smov 0  }
   0x2   :  { %9 = vst [vmem:[#allocation4] sm:$0x1] %v8_v0  ;;  %s524_s18 = smov 0  }
   0x3 LB: > { %s27_s2 = sadd.s32 1, %s480_s16  ;;  %s34_s19 = sadd.s32 1, %s484_s17  ;;  %s488_s18 = sphi %s524_s18, %s15_s18   ;;  %s484_s17 = sphi %s522_s17, %s623_s17   ;;  %s480_s16 = sphi %s520_s16, %s622_s16   ;;  %s476_s15 = sphi %s518_s15, %s621_s15   ;;  %s472_s14 = sphi %s516_s14, %s620_s14  }
   0x4   : > { %p28_p0 = scmp.ge.s32.totalorder %s27_s2, 8  ;;  %p394_p1 = scmp.ge.s32.totalorder %s488_s18, 1 }
   0x5   : > { %p178_p2 = scmp.lt.s32.totalorder %s488_s18, 17 }
   0x6   : > { %s625_s2 = smov (%p28_p0, %s27_s2), 0  ;;  %s627_s19 = smov (!%p28_p0, %s34_s19), %s484_s17 }
   0x7   : > { %p179_p3 = pnand %p394_p1, %p178_p2  ;;  %p36_p4 = scmp.ge.s32.totalorder %s627_s19, 2 }
   0x8   : > { %s395_s20 = sshll.u32 (!%p179_p3), %s472_s14, 4  ;;  %p211_p5 = scmp.lt.s32.totalorder (!%p179_p3), %s476_s15, 1 }
   0x9   : > { %s629_s19 = smov (%p36_p4, %s627_s19), 0  ;;  %182 = sbr.rel (%p179_p3) target bundleno = 441 (0x1b9), region = 32 }
   0xa   : > { %p213_p6 = scmp.lt.s32.totalorder (!%p179_p3), %s395_s20, 127  ;;  %p223_p7 = scmp.lt.s32.totalorder (!%p179_p3), %s472_s14, 7 }
   0xb   : > { %p230_p8 = scmp.eq.s32.totalorder (!%p179_p3), %s472_s14, 7  ;;  %p231_p9 = scmp.eq.s32.totalorder (!%p179_p3), %s472_s14, 0 }
   0xc   : > { %p398_p10 = scmp.ne.s32.totalorder (!%p179_p3), %s472_s14, 0 }
   0xe   : > { %s631_s15 = smov (!%p211_p5, %s476_s15), 1  ;;  %s633_s20 = smov (!%p213_p6, %s395_s20), 127 }
   0xf   : > { %s396_s21 = sshll.u32 %s631_s15, 7  ;;  %s228_s24 = scalar_lea.vmem %s619_s3, %s631_s15 }
  0x10   : > { %s219_s25 = sadd.s32 %s396_s21, %s633_s20 }
  0x11   : > { %s397_s26 = sshll.u32 %s219_s25, 3  ;;  %234 = sbr.rel (%p398_p10) target bundleno = 24 (0x18), region = 36 }
  0x12   : > { %s562_s29 = scalar_lea.vmem %s616_s0, %s397_s26 }
  0x13   : > { %s565_s30 = scalar_select %p223_p7, %s472_s14, 7 }
  0x15   : > { %s225_s6 = scalar_lea.vmem %s617_s1, %s565_s30 }
  0x16   : > { %vm235_vm0 = vcmask 286720   ;;  %v490_v1 = vmov 0.0  }
  0x17   : > { %236 = vst.msk [vmem:[#allocation2] sm:$0x1] %vm235_vm0, %v490_v1 }
  0x18 PF: > { %240 = sbr.rel (!%p231_p9) target bundleno = 29 (0x1d), region = 40  ;;  %vm241_vm1 = vcmask (%p231_p9), 0   ;;  %v491_v2 = vmov (%p231_p9), 0.0  }
  0x19   : > { %242 = vst.msk [vmem:[#allocation3] sm:$0x1] (%p231_p9), %vm241_vm1, %v491_v2 }
  0x1d PF: > { %v260_v3 = vld [vmem:[%s562_s29 + $0x78] sm:$0xff]  ;;  %v259_v4 = vld [vmem:[%s562_s29 + $0x70] sm:$0xff]  ;;  %v258_v5 = vld [vmem:[%s562_s29 + $0x68] sm:$0xff]  ;;  %vm282_vm2 = vcmask 286720   ;;  %p400_p11 = scmp.ne.s32.totalorder %s472_s14, 7 }
  0x1e   : > { %261 = vmatpush.msra.mxu0 %v260_v3  ;;  %v257_v6 = vld [vmem:[%s562_s29 + $0x60] sm:$0xff]  ;;  %v256_v7 = vld [vmem:[%s562_s29 + $0x58] sm:$0xff]  ;;  %v255_v8 = vld [vmem:[%s562_s29 + $0x50] sm:$0xff] }
  0x1f   : > { %v254_v9 = vld [vmem:[%s562_s29 + $0x48] sm:$0xff]  ;;  %v253_v10 = vld [vmem:[%s562_s29 + $0x40] sm:$0xff]  ;;  %v252_v11 = vld [vmem:[%s562_s29 + $0x38] sm:$0xff] }
  0x20   : > { %262 = vmatpush.msra.mxu0 %v259_v4  ;;  %v251_v12 = vld [vmem:[%s562_s29 + $0x30] sm:$0xff]  ;;  %v250_v13 = vld [vmem:[%s562_s29 + $0x28] sm:$0xff]  ;;  %v249_v14 = vld [vmem:[%s562_s29 + $0x20] sm:$0xff] }
  0x21   : > { %v248_v15 = vld [vmem:[%s562_s29 + $0x18] sm:$0xff]  ;;  %v247_v16 = vld [vmem:[%s562_s29 + $0x10] sm:$0xff]  ;;  %v246_v17 = vld [vmem:[%s562_s29 + $0x8] sm:$0xff] }
  0x22   : > { %263 = vmatpush.msra.mxu0 %v258_v5  ;;  %v245_v18 = vld [vmem:[%s562_s29] sm:$0xff] }
  0x23   : > { %v244_v19 = vld [vmem:[%s225_s6] sm:$0x1] }
  0x24   : > { %264 = vmatpush.msra.mxu0 %v257_v6  ;;  %v243_v20 = vld [vmem:[#allocation2] sm:$0x1] }
  0x26   : > { %265 = vmatpush.msra.mxu0 %v256_v7 }
  0x28   : > { %266 = vmatpush.msra.mxu0 %v255_v8 }
  0x2a   : > { %267 = vmatpush.msra.mxu0 %v254_v9 }
  0x2c   : > { %268 = vmatpush.msra.mxu0 %v253_v10 }
  0x2e   : > { %269 = vmatpush.msra.mxu0 %v252_v11 }
  0x30   : > { %270 = vmatpush.msra.mxu0 %v251_v12 }
  0x32   : > { %271 = vmatpush.msra.mxu0 %v250_v13 }
  0x34   : > { %272 = vmatpush.msra.mxu0 %v249_v14 }
  0x36   : > { %273 = vmatpush.msra.mxu0 %v248_v15 }
  0x38   : > { %274 = vmatpush.msra.mxu0 %v247_v16 }
  0x3a   : > { %275 = vmatpush.msra.mxu0 %v246_v17 }
  0x3c   : > { %276 = vmatpush.msra.mxu0 %v245_v18 }
  0x3d   : > { %277 = vmatmul.f32.vlgmr.msra.gmra.mxu0 %v244_v19 }
  0xb9   : > { %286 = sbr.rel (%p400_p11) target bundleno = 431 (0x1af), region = 44 }
  0xba   : > { %v278_v21 = vpop.f32.mrf.mxu0 }
  0xbb   : > { %v281_v22 = vadd.f32 %v278_v21, %v243_v20 }
  0xbd   : > { %283 = vst.msk [vmem:[#allocation2] sm:$0x1] %vm282_vm2, %v281_v22 }
  0xbe   : > { %v288_v23 = vld [vmem:[#allocation4] sm:$0x1]  ;;  %v492_v24 = vmov 0   ;;  %v296_v30 = vld [vmem:[#allocation3] sm:$0x1]  ;;  %vm301_vm3 = vcmask 0  }
  0xbf   : > { %449 = vset.pattern.permute.xlu0 %v492_v24 }
  0xc0   : > { %291 = vperm.xlu0 %449, %v288_v23  }
  0xc4   : > { %v287_v26 = vld [vmem:[#allocation2] sm:$0x1] }
 0x132   : > { %v292_v25 = vpop.permute.xlu0 %291 }
 0x133   : > { %v294_v27 = vperm.slane %v292_v25, 0 }
 0x135   : > { %v295_v28 = vadd.f32 %v294_v27, %v287_v26 }
 0x137   : > { %v297_v29 = vsel %vm282_vm2, %v295_v28, 0.0 }
 0x138   : > { %298 = vadd.xlane.f32.xlu0 %v297_v29 }
 0x1ab   : > { %v299_v31 = vpop.xlane.xlu0 %298 }
 0x1ac   : > { %v300_v32 = vadd.f32 %v299_v31, %v296_v30 }
 0x1ae   : > { %302 = vst.msk [vmem:[#allocation3] sm:$0x1] %vm301_vm3, %v300_v32 }
 0x1af PF: > { %306 = sbr.rel (!%p230_p8) target bundleno = 441 (0x1b9), region = 48  ;;  %vm309_vm4 = vcmask (%p230_p8), 0  }
 0x1b5   : > { %v307_v33 = vld [vmem:[#allocation3] sm:$0x1] }
 0x1b6   : > { %v308_v34 = vmul.f32 0.027777778, %v307_v33 }
 0x1b8   : > { %310 = vst.msk [vmem:[%s228_s24] sm:$0x1] %vm309_vm4, %v308_v34 }
 0x1b9 PF: > { %s15_s18 = sadd.s32 1, %s488_s18   ;;  %s620_s14 = smov %s480_s16 }
 0x1ba   : > { %p12_p12 = scmp.ge.s32.totalorder %s15_s18, 18   ;;  %s621_s15 = smov %s484_s17 }
 0x1bb   : > { %s622_s16 = smov %s625_s2  ;;  %s623_s17 = smov %s629_s19 }
 0x1bc   :  { %14 = sbr.rel (!%p12_p12) target bundleno = 3 (0x3), region = 81 }

</bundles_post_ra>
